<compile_context>
chip_gen: v6e
topology: v6e:2x2x1
jax: 0.10.0
libtpu: 0.0.40
codegen_flags: <defaults>
</compile_context>

<pallas_src>
import functools
import math
from math import sqrt

import numpy as np
import jax
import jax.numpy as jnp
from jax.experimental import pallas as pl
from jax.experimental.pallas import tpu as pltpu


_TWO_PI = 2.0 * math.pi
_INV_TWO_PI = 1.0 / _TWO_PI


def _sin_poly_coefs(degree=11):
    """Odd-power least-squares fit of sin on [-pi, pi] (near-minimax).

    Fit in the normalized variable t = x/pi (well-conditioned Vandermonde),
    then rescale to x.  Max abs error over [-pi, pi] is < 1e-6 at degree 11.
    """
    t = np.linspace(-1.0, 1.0, 4001)
    powers = np.arange(1, degree + 1, 2)          # 1, 3, 5, 7, 9, 11
    A = t[:, None] ** powers[None, :]
    c, *_ = np.linalg.lstsq(A, np.sin(np.pi * t), rcond=None)
    c = c / np.pi ** powers
    return tuple(float(v) for v in c)


def _poly_sin(z, coefs):
    """sin(z) via one 2*pi range reduction + odd polynomial on [-pi, pi].

    Accurate to ~1e-6 for the |z| <= ~50 arguments a w0-folded SIREN produces.
    ~16 VPU ops/element vs the much longer generic sin lowering.
    """
    k = jnp.floor(z * _INV_TWO_PI + 0.5)          # nearest multiple of 2*pi
    r = z - k * _TWO_PI                           # r in ~[-pi, pi]
    r2 = r * r
    p = coefs[-1]
    for c in reversed(coefs[:-1]):
        p = p * r2 + c
    return r * p                                  # odd poly: exact 0 at r == 0


def _siren_kernel(*refs, num_hidden, sin_coefs):
    # refs = (x_ref, W0, W1, b1, ..., W_{nh-1}, b_{nh-1}, W_last, b_last, o_ref)
    #   x_ref  : (K0p, TILE) feature-major; row `dim_in` is the constant-1 bias
    #            carrier (first-layer bias is folded into W0's column dim_in).
    #   W0     : (Hp, K0p)   w0-folded first-layer weight (+ bias column)
    #   Wk, bk : (Hp, Hp), (Hp, 1)   w0-folded hidden affine maps
    #   W_last : (Dp, Hp), b_last (Dp, 1)   final Linear (Identity activation)
    #   o_ref  : (Dp, TILE)
    x_ref = refs[0]
    o_ref = refs[-1]
    w_refs = refs[1:-1]

    # Layer 0: bias already folded via the ones row of x.
    h = _poly_sin(
        jnp.dot(w_refs[0][...], x_ref[...], preferred_element_type=jnp.float32),
        sin_coefs)

    idx = 1
    for _ in range(1, num_hidden):
        w = w_refs[idx][...]
        b = w_refs[idx + 1][...]
        idx += 2
        z = jnp.dot(w, h, preferred_element_type=jnp.float32) + b
        h = _poly_sin(z, sin_coefs)

    w = w_refs[idx][...]
    b = w_refs[idx + 1][...]
    out = jnp.dot(w, h, preferred_element_type=jnp.float32) + b
    o_ref[...] = out.astype(o_ref.dtype)


def _round_up(n, m):
    return (n + m - 1) // m * m


def siren_forward(x, params, w0s, *, tile=2048):
    """x: (N, dim_in) f32.  params: list of (W, b) with W (out, in), b (1, out)."""
    N, dim_in = x.shape
    num_hidden = len(params) - 1
    dim_hidden = params[0][0].shape[0]
    dim_out = params[-1][0].shape[0]

    k0 = _round_up(dim_in + 1, 8)      # input features + ones row, sublane-aligned
    hp = _round_up(dim_hidden, 8)      # hidden rows, sublane-aligned
    dp = _round_up(dim_out, 8)         # output rows, sublane-aligned

    tile = min(tile, _round_up(N, 128))
    n_blocks = pl.cdiv(N, tile)
    n_pad = n_blocks * tile

    # Feature-major augmented input: [x^T ; ones ; zero pad rows] -> (k0, n_pad)
    # TODO(synk): for very large N, keep the surrounding program feature-major
    # so this transpose (and the output one) disappear.
    xt = jnp.concatenate(
        [x.T.astype(jnp.float32),
         jnp.ones((1, N), jnp.float32),
         jnp.zeros((k0 - dim_in - 1, N), jnp.float32)], axis=0)
    if n_pad != N:
        xt = jnp.pad(xt, ((0, 0), (0, n_pad - N)))

    flat = []
    in_specs = [pl.BlockSpec((k0, tile), lambda i: (0, i))]

    def _add_const(a):
        flat.append(a)
        in_specs.append(pl.BlockSpec(a.shape, lambda i: (0, 0)))

    # Layer 0: fold w0 AND the bias (goes into the ones-row column).
    W, b = params[0]
    W0a = jnp.zeros((hp, k0), jnp.float32)
    W0a = W0a.at[:dim_hidden, :dim_in].set(w0s[0] * W.astype(jnp.float32))
    W0a = W0a.at[:dim_hidden, dim_in].set(w0s[0] * b.reshape(-1).astype(jnp.float32))
    _add_const(W0a)

    # Hidden layers 1..num_hidden-1: fold w0 into W and b.
    for idx in range(1, num_hidden):
        W, b = params[idx]
        Wk = jnp.zeros((hp, hp), jnp.float32)
        Wk = Wk.at[:dim_hidden, :dim_hidden].set(w0s[idx] * W.astype(jnp.float32))
        bk = jnp.zeros((hp, 1), jnp.float32)
        bk = bk.at[:dim_hidden, 0].set(w0s[idx] * b.reshape(-1).astype(jnp.float32))
        _add_const(Wk)
        _add_const(bk)

    # Final Linear (Identity activation), rows padded to dp.
    W, b = params[-1]
    Wl = jnp.zeros((dp, hp), jnp.float32)
    Wl = Wl.at[:dim_out, :dim_hidden].set(W.astype(jnp.float32))
    bl = jnp.zeros((dp, 1), jnp.float32)
    bl = bl.at[:dim_out, 0].set(b.reshape(-1).astype(jnp.float32))
    _add_const(Wl)
    _add_const(bl)

    kernel = functools.partial(_siren_kernel, num_hidden=num_hidden,
                               sin_coefs=_sin_poly_coefs())

    out_t = pl.pallas_call(
        kernel,
        out_shape=jax.ShapeDtypeStruct((dp, n_pad), jnp.float32),
        grid=(n_blocks,),
        in_specs=in_specs,
        out_specs=pl.BlockSpec((dp, tile), lambda i: (0, i)),
        compiler_params=pltpu.CompilerParams(
            dimension_semantics=("parallel",)),
    )(xt, *flat)

    # Back to the PyTorch-facing (N, dim_out) layout; drop padding rows/cols.
    return out_t[:dim_out, :N].T


def init_siren_params(key, dim_in, dim_hidden, dim_out, num_layers,
                      w0=30.0, w0_initial=30.0, c=6.0):
    """Deterministic init matching SirenLayer's uniform(-w_std, w_std) scheme."""
    params, w0s = [], []
    for ind in range(num_layers):
        is_first = ind == 0
        layer_w0 = w0_initial if is_first else w0
        layer_dim_in = dim_in if is_first else dim_hidden
        w_std = (1.0 / layer_dim_in) if is_first else sqrt(c / layer_dim_in) / layer_w0
        key, kw, kb = jax.random.split(key, 3)
        W = jax.random.uniform(kw, (dim_hidden, layer_dim_in),
                               minval=-w_std, maxval=w_std, dtype=jnp.float32)
        b = jax.random.uniform(kb, (1, dim_hidden),
                               minval=-w_std, maxval=w_std, dtype=jnp.float32)
        params.append((W, b))
        w0s.append(layer_w0)
    # last layer (activation = Identity)
    w_std = sqrt(c / dim_hidden) / w0
    key, kw, kb = jax.random.split(key, 3)
    W = jax.random.uniform(kw, (dim_out, dim_hidden),
                           minval=-w_std, maxval=w_std, dtype=jnp.float32)
    b = jax.random.uniform(kb, (1, dim_out),
                           minval=-w_std, maxval=w_std, dtype=jnp.float32)
    params.append((W, b))
    return params, w0s


def siren_reference(x, params, w0s):
    h = x
    for k in range(len(params) - 1):
        W, b = params[k]
        h = jnp.sin(w0s[k] * (h @ W.T + b))
    W, b = params[-1]
    return h @ W.T + b


if __name__ == "__main__":
    key = jax.random.PRNGKey(0)

    dim_in, dim_hidden, dim_out, num_layers = 2, 32, 3, 3
    # 8 point blocks: enough grid steps to double-buffer DMA on v5e/v6e and to
    # shard the "parallel" axis across both TensorCores on v7x.
    N, TILE = 8192, 1024

    params, w0s = init_siren_params(key, dim_in, dim_hidden, dim_out, num_layers)

    key, kx = jax.random.split(key)
    x = jax.random.uniform(kx, (N, dim_in), minval=-1.0, maxval=1.0,
                           dtype=jnp.float32)

    out = jax.block_until_ready(siren_forward(x, params, w0s, tile=TILE))

    ref = siren_reference(x, params, w0s)
    assert out.shape == (N, dim_out)
    assert jnp.allclose(out, ref, atol=1e-4, rtol=1e-4), \
        float(jnp.max(jnp.abs(out - ref)))

    print("KERNEL_OK")
</pallas_src>

<mosaic_0001>
module attributes {stable_mosaic.version = 11 : i64} {
  func.func @_siren_kernel(%arg0: i32, %arg1: memref<8x1024xf32, #tpu.memory_space<vmem>>, %arg2: memref<32x8xf32, #tpu.memory_space<vmem>>, %arg3: memref<32x32xf32, #tpu.memory_space<vmem>>, %arg4: memref<32x1xf32, #tpu.memory_space<vmem>>, %arg5: memref<32x32xf32, #tpu.memory_space<vmem>>, %arg6: memref<32x1xf32, #tpu.memory_space<vmem>>, %arg7: memref<8x32xf32, #tpu.memory_space<vmem>>, %arg8: memref<8x1xf32, #tpu.memory_space<vmem>>, %arg9: memref<8x1024xf32, #tpu.memory_space<vmem>>) attributes {dimension_semantics = [#tpu.dimension_semantics<parallel>], iteration_bounds = array<i64: 8>, scalar_prefetch = 0 : i64, scratch_operands = 0 : i64, tpu.core_type = #tpu.core_type<tc>, window_params = [{transform_indices = @transform_0, window_bounds = array<i64: 8, 1024>}, {pipeline_mode = #tpu.pipeline_mode<synchronous>, transform_indices = @transform_1, window_bounds = array<i64: 32, 8>}, {pipeline_mode = #tpu.pipeline_mode<synchronous>, transform_indices = @transform_2, window_bounds = array<i64: 32, 32>}, {pipeline_mode = #tpu.pipeline_mode<synchronous>, transform_indices = @transform_3, window_bounds = array<i64: 32, 1>}, {pipeline_mode = #tpu.pipeline_mode<synchronous>, transform_indices = @transform_4, window_bounds = array<i64: 32, 32>}, {pipeline_mode = #tpu.pipeline_mode<synchronous>, transform_indices = @transform_5, window_bounds = array<i64: 32, 1>}, {pipeline_mode = #tpu.pipeline_mode<synchronous>, transform_indices = @transform_6, window_bounds = array<i64: 8, 32>}, {pipeline_mode = #tpu.pipeline_mode<synchronous>, transform_indices = @transform_7, window_bounds = array<i64: 8, 1>}, {transform_indices = @transform_8, window_bounds = array<i64: 8, 1024>}]} {
    %c0 = arith.constant 0 : index
    %c0_0 = arith.constant 0 : index
    %0 = vector.load %arg2[%c0, %c0_0] : memref<32x8xf32, #tpu.memory_space<vmem>>, vector<32x8xf32>
    %c0_1 = arith.constant 0 : index
    %c0_2 = arith.constant 0 : index
    %1 = vector.load %arg1[%c0_1, %c0_2] : memref<8x1024xf32, #tpu.memory_space<vmem>>, vector<8x1024xf32>
    %cst = arith.constant dense<0.000000e+00> : vector<32x1024xf32>
    %2 = tpu.matmul %0, %1, %cst {dimension_numbers = #tpu.dot_dimension_numbers<[1], [0], [0], [1], [0, 0, 1, 1], [], []>} : vector<32x8xf32>, vector<8x1024xf32>, vector<32x1024xf32> -> vector<32x1024xf32>
    %cst_3 = arith.constant 0.159154937 : f32
    %3 = vector.broadcast %cst_3 : f32 to vector<32x1024xf32>
    %4 = arith.mulf %2, %3 : vector<32x1024xf32>
    %cst_4 = arith.constant 5.000000e-01 : f32
    %5 = vector.broadcast %cst_4 : f32 to vector<32x1024xf32>
    %6 = arith.addf %4, %5 : vector<32x1024xf32>
    %7 = math.floor %6 : vector<32x1024xf32>
    %cst_5 = arith.constant 6.28318548 : f32
    %8 = vector.broadcast %cst_5 : f32 to vector<32x1024xf32>
    %9 = arith.mulf %7, %8 : vector<32x1024xf32>
    %10 = arith.subf %2, %9 : vector<32x1024xf32>
    %11 = arith.mulf %10, %10 : vector<32x1024xf32>
    %cst_6 = arith.constant -2.05322426E-8 : f32
    %12 = vector.broadcast %cst_6 : f32 to vector<32x1024xf32>
    %13 = arith.mulf %12, %11 : vector<32x1024xf32>
    %cst_7 = arith.constant 2.70400392E-6 : f32
    %14 = vector.broadcast %cst_7 : f32 to vector<32x1024xf32>
    %15 = arith.addf %13, %14 : vector<32x1024xf32>
    %16 = arith.mulf %15, %11 : vector<32x1024xf32>
    %cst_8 = arith.constant -1.98125359E-4 : f32
    %17 = vector.broadcast %cst_8 : f32 to vector<32x1024xf32>
    %18 = arith.addf %16, %17 : vector<32x1024xf32>
    %19 = arith.mulf %18, %11 : vector<32x1024xf32>
    %cst_9 = arith.constant 0.00833255704 : f32
    %20 = vector.broadcast %cst_9 : f32 to vector<32x1024xf32>
    %21 = arith.addf %19, %20 : vector<32x1024xf32>
    %22 = arith.mulf %21, %11 : vector<32x1024xf32>
    %cst_10 = arith.constant -0.166665763 : f32
    %23 = vector.broadcast %cst_10 : f32 to vector<32x1024xf32>
    %24 = arith.addf %22, %23 : vector<32x1024xf32>
    %25 = arith.mulf %24, %11 : vector<32x1024xf32>
    %cst_11 = arith.constant 0.999999701 : f32
    %26 = vector.broadcast %cst_11 : f32 to vector<32x1024xf32>
    %27 = arith.addf %25, %26 : vector<32x1024xf32>
    %28 = arith.mulf %10, %27 : vector<32x1024xf32>
    %c0_12 = arith.constant 0 : index
    %c0_13 = arith.constant 0 : index
    %29 = vector.load %arg3[%c0_12, %c0_13] : memref<32x32xf32, #tpu.memory_space<vmem>>, vector<32x32xf32>
    %c0_14 = arith.constant 0 : index
    %c0_15 = arith.constant 0 : index
    %30 = vector.load %arg4[%c0_14, %c0_15] : memref<32x1xf32, #tpu.memory_space<vmem>>, vector<32x1xf32>
    %cst_16 = arith.constant dense<0.000000e+00> : vector<32x1024xf32>
    %31 = tpu.matmul %29, %28, %cst_16 {dimension_numbers = #tpu.dot_dimension_numbers<[1], [0], [0], [1], [0, 0, 1, 1], [], []>} : vector<32x32xf32>, vector<32x1024xf32>, vector<32x1024xf32> -> vector<32x1024xf32>
    %32 = vector.broadcast %30 : vector<32x1xf32> to vector<32x1024xf32>
    %33 = arith.addf %31, %32 : vector<32x1024xf32>
    %cst_17 = arith.constant 0.159154937 : f32
    %34 = vector.broadcast %cst_17 : f32 to vector<32x1024xf32>
    %35 = arith.mulf %33, %34 : vector<32x1024xf32>
    %cst_18 = arith.constant 5.000000e-01 : f32
    %36 = vector.broadcast %cst_18 : f32 to vector<32x1024xf32>
    %37 = arith.addf %35, %36 : vector<32x1024xf32>
    %38 = math.floor %37 : vector<32x1024xf32>
    %cst_19 = arith.constant 6.28318548 : f32
    %39 = vector.broadcast %cst_19 : f32 to vector<32x1024xf32>
    %40 = arith.mulf %38, %39 : vector<32x1024xf32>
    %41 = arith.subf %33, %40 : vector<32x1024xf32>
    %42 = arith.mulf %41, %41 : vector<32x1024xf32>
    %cst_20 = arith.constant -2.05322426E-8 : f32
    %43 = vector.broadcast %cst_20 : f32 to vector<32x1024xf32>
    %44 = arith.mulf %43, %42 : vector<32x1024xf32>
    %cst_21 = arith.constant 2.70400392E-6 : f32
    %45 = vector.broadcast %cst_21 : f32 to vector<32x1024xf32>
    %46 = arith.addf %44, %45 : vector<32x1024xf32>
    %47 = arith.mulf %46, %42 : vector<32x1024xf32>
    %cst_22 = arith.constant -1.98125359E-4 : f32
    %48 = vector.broadcast %cst_22 : f32 to vector<32x1024xf32>
    %49 = arith.addf %47, %48 : vector<32x1024xf32>
    %50 = arith.mulf %49, %42 : vector<32x1024xf32>
    %cst_23 = arith.constant 0.00833255704 : f32
    %51 = vector.broadcast %cst_23 : f32 to vector<32x1024xf32>
    %52 = arith.addf %50, %51 : vector<32x1024xf32>
    %53 = arith.mulf %52, %42 : vector<32x1024xf32>
    %cst_24 = arith.constant -0.166665763 : f32
    %54 = vector.broadcast %cst_24 : f32 to vector<32x1024xf32>
    %55 = arith.addf %53, %54 : vector<32x1024xf32>
    %56 = arith.mulf %55, %42 : vector<32x1024xf32>
    %cst_25 = arith.constant 0.999999701 : f32
    %57 = vector.broadcast %cst_25 : f32 to vector<32x1024xf32>
    %58 = arith.addf %56, %57 : vector<32x1024xf32>
    %59 = arith.mulf %41, %58 : vector<32x1024xf32>
    %c0_26 = arith.constant 0 : index
    %c0_27 = arith.constant 0 : index
    %60 = vector.load %arg5[%c0_26, %c0_27] : memref<32x32xf32, #tpu.memory_space<vmem>>, vector<32x32xf32>
    %c0_28 = arith.constant 0 : index
    %c0_29 = arith.constant 0 : index
    %61 = vector.load %arg6[%c0_28, %c0_29] : memref<32x1xf32, #tpu.memory_space<vmem>>, vector<32x1xf32>
    %cst_30 = arith.constant dense<0.000000e+00> : vector<32x1024xf32>
    %62 = tpu.matmul %60, %59, %cst_30 {dimension_numbers = #tpu.dot_dimension_numbers<[1], [0], [0], [1], [0, 0, 1, 1], [], []>} : vector<32x32xf32>, vector<32x1024xf32>, vector<32x1024xf32> -> vector<32x1024xf32>
    %63 = vector.broadcast %61 : vector<32x1xf32> to vector<32x1024xf32>
    %64 = arith.addf %62, %63 : vector<32x1024xf32>
    %cst_31 = arith.constant 0.159154937 : f32
    %65 = vector.broadcast %cst_31 : f32 to vector<32x1024xf32>
    %66 = arith.mulf %64, %65 : vector<32x1024xf32>
    %cst_32 = arith.constant 5.000000e-01 : f32
    %67 = vector.broadcast %cst_32 : f32 to vector<32x1024xf32>
    %68 = arith.addf %66, %67 : vector<32x1024xf32>
    %69 = math.floor %68 : vector<32x1024xf32>
    %cst_33 = arith.constant 6.28318548 : f32
    %70 = vector.broadcast %cst_33 : f32 to vector<32x1024xf32>
    %71 = arith.mulf %69, %70 : vector<32x1024xf32>
    %72 = arith.subf %64, %71 : vector<32x1024xf32>
    %73 = arith.mulf %72, %72 : vector<32x1024xf32>
    %cst_34 = arith.constant -2.05322426E-8 : f32
    %74 = vector.broadcast %cst_34 : f32 to vector<32x1024xf32>
    %75 = arith.mulf %74, %73 : vector<32x1024xf32>
    %cst_35 = arith.constant 2.70400392E-6 : f32
    %76 = vector.broadcast %cst_35 : f32 to vector<32x1024xf32>
    %77 = arith.addf %75, %76 : vector<32x1024xf32>
    %78 = arith.mulf %77, %73 : vector<32x1024xf32>
    %cst_36 = arith.constant -1.98125359E-4 : f32
    %79 = vector.broadcast %cst_36 : f32 to vector<32x1024xf32>
    %80 = arith.addf %78, %79 : vector<32x1024xf32>
    %81 = arith.mulf %80, %73 : vector<32x1024xf32>
    %cst_37 = arith.constant 0.00833255704 : f32
    %82 = vector.broadcast %cst_37 : f32 to vector<32x1024xf32>
    %83 = arith.addf %81, %82 : vector<32x1024xf32>
    %84 = arith.mulf %83, %73 : vector<32x1024xf32>
    %cst_38 = arith.constant -0.166665763 : f32
    %85 = vector.broadcast %cst_38 : f32 to vector<32x1024xf32>
    %86 = arith.addf %84, %85 : vector<32x1024xf32>
    %87 = arith.mulf %86, %73 : vector<32x1024xf32>
    %cst_39 = arith.constant 0.999999701 : f32
    %88 = vector.broadcast %cst_39 : f32 to vector<32x1024xf32>
    %89 = arith.addf %87, %88 : vector<32x1024xf32>
    %90 = arith.mulf %72, %89 : vector<32x1024xf32>
    %c0_40 = arith.constant 0 : index
    %c0_41 = arith.constant 0 : index
    %91 = vector.load %arg7[%c0_40, %c0_41] : memref<8x32xf32, #tpu.memory_space<vmem>>, vector<8x32xf32>
    %c0_42 = arith.constant 0 : index
    %c0_43 = arith.constant 0 : index
    %92 = vector.load %arg8[%c0_42, %c0_43] : memref<8x1xf32, #tpu.memory_space<vmem>>, vector<8x1xf32>
    %cst_44 = arith.constant dense<0.000000e+00> : vector<8x1024xf32>
    %93 = tpu.matmul %91, %90, %cst_44 {dimension_numbers = #tpu.dot_dimension_numbers<[1], [0], [0], [1], [0, 0, 1, 1], [], []>} : vector<8x32xf32>, vector<32x1024xf32>, vector<8x1024xf32> -> vector<8x1024xf32>
    %94 = vector.broadcast %92 : vector<8x1xf32> to vector<8x1024xf32>
    %95 = arith.addf %93, %94 : vector<8x1024xf32>
    %c0_45 = arith.constant 0 : index
    %c0_46 = arith.constant 0 : index
    %96 = vector.load %arg9[%c0_45, %c0_46] : memref<8x1024xf32, #tpu.memory_space<vmem>>, vector<8x1024xf32>
    tpu.vector_store %arg9[%c0_45, %c0_46], %95 {strides = array<i32>} : memref<8x1024xf32, #tpu.memory_space<vmem>>, vector<8x1024xf32>,
    return
  }
  func.func @transform_0(%arg0: i32) -> (i32, i32) {
    %c0_i32 = arith.constant 0 : i32
    %c0_i32_0 = arith.constant 0 : i32
    return %c0_i32, %arg0 : i32, i32
  }
  func.func @transform_1(%arg0: i32) -> (i32, i32) {
    %c0_i32 = arith.constant 0 : i32
    %c0_i32_0 = arith.constant 0 : i32
    %c0_i32_1 = arith.constant 0 : i32
    return %c0_i32, %c0_i32_0 : i32, i32
  }
  func.func @transform_2(%arg0: i32) -> (i32, i32) {
    %c0_i32 = arith.constant 0 : i32
    %c0_i32_0 = arith.constant 0 : i32
    %c0_i32_1 = arith.constant 0 : i32
    return %c0_i32, %c0_i32_0 : i32, i32
  }
  func.func @transform_3(%arg0: i32) -> (i32, i32) {
    %c0_i32 = arith.constant 0 : i32
    %c0_i32_0 = arith.constant 0 : i32
    %c0_i32_1 = arith.constant 0 : i32
    return %c0_i32, %c0_i32_0 : i32, i32
  }
  func.func @transform_4(%arg0: i32) -> (i32, i32) {
    %c0_i32 = arith.constant 0 : i32
    %c0_i32_0 = arith.constant 0 : i32
    %c0_i32_1 = arith.constant 0 : i32
    return %c0_i32, %c0_i32_0 : i32, i32
  }
  func.func @transform_5(%arg0: i32) -> (i32, i32) {
    %c0_i32 = arith.constant 0 : i32
    %c0_i32_0 = arith.constant 0 : i32
    %c0_i32_1 = arith.constant 0 : i32
    return %c0_i32, %c0_i32_0 : i32, i32
  }
  func.func @transform_6(%arg0: i32) -> (i32, i32) {
    %c0_i32 = arith.constant 0 : i32
    %c0_i32_0 = arith.constant 0 : i32
    %c0_i32_1 = arith.constant 0 : i32
    return %c0_i32, %c0_i32_0 : i32, i32
  }
  func.func @transform_7(%arg0: i32) -> (i32, i32) {
    %c0_i32 = arith.constant 0 : i32
    %c0_i32_0 = arith.constant 0 : i32
    %c0_i32_1 = arith.constant 0 : i32
    return %c0_i32, %c0_i32_0 : i32, i32
  }
  func.func @transform_8(%arg0: i32) -> (i32, i32) {
    %c0_i32 = arith.constant 0 : i32
    %c0_i32_0 = arith.constant 0 : i32
    return %c0_i32, %arg0 : i32, i32
  }
}

</mosaic_0001>

<bundles_post_ra>
// kernel: tpu_custom_call.1
= control target key start
LH: loop header
LB: loop body
LE: loop exit
PB: predicated region body
PF: predicated region fallthrough
CT: control target
= control target key end

     0   :  { %13 = vsyncpa [#allocation3], 0  ;;  %s5647_s0 = inlined_call_operand.hbm [shape: f32[8,8192], index: 0, kind: input, shape index: {}]   ;;  %s5648_s1 = inlined_call_operand.vmem [shape: f32[32,8], index: 1, kind: input, shape index: {}]   ;;  %s5649_s2 = inlined_call_operand.vmem [shape: f32[32,32], index: 2, kind: input, shape index: {}]   ;;  %s5650_s3 = inlined_call_operand.vmem [shape: f32[32,1], index: 3, kind: input, shape index: {}]   ;;  %s5651_s4 = inlined_call_operand.vmem [shape: f32[32,32], index: 4, kind: input, shape index: {}]   ;;  %s5652_s5 = inlined_call_operand.vmem [shape: f32[32,1], index: 5, kind: input, shape index: {}]   ;;  %s5653_s6 = inlined_call_operand.vmem [shape: f32[8,32], index: 6, kind: input, shape index: {}]   ;;  %s5654_s7 = inlined_call_operand.vmem [shape: f32[8,1], index: 7, kind: input, shape index: {}]   ;;  %s5655_s8 = inlined_call_operand.hbm [shape: f32[8,8192], index: 8, kind: output, shape index: {}]  }
   0x1   :  { %15 = vsyncpa [#allocation3 + $0x1], 0 }
   0x2   :  { %16 = vsyncpa [#allocation4], 0 }
   0x3   :  { %18 = vsyncpa [#allocation4 + $0x1], 0  ;;  %s3778_s27 = smov 0   ;;  %s3780_s28 = smov 0  }
   0x4   :  { %s3782_s29 = smov 0   ;;  %s3784_s30 = smov 0  }
   0x5 LB: > { %s3799_s9 = sadd.s32 4294967295, %s3727_s30   ;;  %s3517_s10 = sadd.s32 4294967294, %s3727_s30   ;;  %s3727_s30 = sphi %s3784_s30, %s5766_s30   ;;  %s3723_s29 = sphi %s3782_s29, %s5765_s29   ;;  %s3719_s28 = sphi %s3780_s28, %s5764_s28   ;;  %s3715_s27 = sphi %s3778_s27, %s5763_s27  }
   0x6   : > { %s3803_s11 = sadd.s32 1, %s3727_s30   ;;  %s31_s12 = sadd.s32 1, %s3723_s29 }
   0x7   : > { %s28_s13 = ssub.s32 %s3727_s30, %s3803_s11  ;;  %p38_p0 = scmp.ne.s32.totalorder %s3723_s29, %s3719_s28 }
   0x8   : > { %p29_p1 = scmp.eq.s32.totalorder %s28_s13, 0  ;;  %p39_p2 = scmp.eq.s32.totalorder %s3727_s30, 0 }
   0x9   : > { %p44_p3 = scmp.ne.s32.totalorder %s3719_s28, %s3715_s27  ;;  %p45_p4 = scmp.eq.s32.totalorder %s3799_s9, 0 }
   0xa   : > { %s3815_s14 = scalar_select %p29_p1, %s3723_s29, %s31_s12  }
   0xb   : > { %p3817_p5 = por %p39_p2, %p38_p0  ;;  %p3821_p6 = por %p45_p4, %p44_p3 }
   0xc   : > { %5687 = sst [smem:[#allocation8_spill]] %s3815_s14  ;;  %p215_p7 = scmp.eq.s32.totalorder %s3799_s9, 7 }
   0xd   : > { %s5689_s16 = scalar_select %p3821_p6, 1, 0 }
   0xe   : > { %p221_p8 = scmp.eq.s32.totalorder %s3517_s10, 7  ;;  %p3597_p9 = scmp.lt.s32.totalorder %s3727_s30, 8 }
   0xf   : > { %p3827_p10 = por %p215_p7, %p38_p0  ;;  %s262_s19 = sand.u32 1, %s3723_s29  }
  0x10   : > { %p3831_p11 = por %p221_p8, %p44_p3  ;;  %s3583_s20 = sshll.u32 %s3727_s30, 10 }
  0x11   : > { %s5690_s17 = scalar_select %p3827_p10, 1, 0 }
  0x12   : > { %s5691_s18 = scalar_select %p3831_p11, 1, 0 }
  0x13   : > { %s3520_s21 = sshll.u32 %s262_s19, 6  ;;  %s3840_s24 = scalar_lea.hbm %s5647_s0, %s3583_s20 }
  0x14   : > { %s266_s25 = scalar_lea.vmem [#allocation2], %s3520_s21  ;;  %p3844_p12 = pnand %p3597_p9, %p3817_p5 }
  0x15   : > { %s274_s26 = sshll.u32 %s266_s25, 4  ;;  %s263_s12 = scalar_lea.sflag [#allocation3], %s262_s19  ;;  %s3848_s26 = int_to_ptr.vmem [resolvable:$true] %s274_s26 }
  0x16   : > { %s3635_s13 = scalar_lea.hbm %s3840_s24, 1024  ;;  %p3637_p2 = pneg %p3844_p12 }
  0x17   : > { %p3636_p1 = scmp.ne.s32.totalorder %s3840_s24, %s3635_s13  ;;  %s3640_s15 = scalar_lea.hbm %s5647_s0, 8192 }
  0x18   : > { %p3641_p5 = scmp.lt.s32.totalorder %s3840_s24, %s5647_s0  ;;  %p3642_p7 = scmp.lt.s32.totalorder %s3640_s15, %s3635_s13 }
  0x19   : > { %p3638_p3 = pnand %p3637_p2, %p3636_p1 }
  0x1a   : > { %p3643_p8 = por %p3642_p7, %p3641_p5 }
  0x1b   : > { %p3639_p4 = pneg %p3638_p3 }
  0x1d   : > { %p3644_p9 = pnand %p3643_p8, %p3639_p4 }
  0x1f   : > { %3647 = shalt.err (!%p3644_p9)
}
  0x20   : > { %s3648_s19 = scalar_lea.vmem %s3848_s26, 1024  ;;  %s3729_s25 = smov [#allocation2]  }
  0x21   : > { %p3649_p13 = scmp.ne.s32.totalorder %s3848_s26, %s3648_s19  ;;  %s3653_s14 = sshll.u32 %s3729_s25, 4  ;;  %s3654_s14 = int_to_ptr.vmem [resolvable:$false] %s3653_s14 }
  0x22   : > { %s3655_s20 = scalar_lea.vmem %s3654_s14, 2048  ;;  %p3656_p3 = scmp.lt.s32.totalorder %s3848_s26, %s3654_s14 }
  0x23   : > { %p3651_p0 = pnand %p3649_p13, %p3637_p2  ;;  %p3657_p11 = scmp.lt.s32.totalorder %s3655_s20, %s3648_s19 }
  0x25   : > { %p3652_p1 = pneg %p3651_p0  ;;  %p3658_p10 = por %p3657_p11, %p3656_p3 }
  0x27   : > { %p3659_p6 = pnand %p3658_p10, %p3652_p1 }
  0x29   : > { %3662 = shalt.err (!%p3659_p6)
}
  0x2a   : > { %3592 = dma.hbm_to_vmem [thread:$0]  (!%p3844_p12), %s3840_s24, 1024, %s3848_s26, %s263_s12  }
  0x2b   : > { %p5693_p4 = scmp.lt.s32.totalorder %s3727_s30, 9  ;;  %p5694_p5 = scmp.ge.s32.totalorder %s3727_s30, 1 }
  0x2d   : > { %p280_p13 = pnand %p5694_p5, %p5693_p4 }
  0x2f   : > { %283 = sbr.rel (%p280_p13) target bundleno = 1258 (0x4ea), region = 52 }
  0x34   : > { %s3875_s13 = sand.u32 1, %s3719_s28   ;;  %p5695_p6 = scmp.ne.s32.totalorder %s5689_s16, 0 }
  0x35   : > { %s3524_s14 = sshll.u32 %s3875_s13, 6  ;;  %s286_s21 = scalar_lea.sflag [#allocation3], %s3875_s13 }
  0x36   : > { %s289_s10 = scalar_lea.vmem [#allocation2], %s3524_s14 }
  0x37   : > { %3706 = dma.done.wait (%p5695_p6), %s286_s21, 1024  }
  0x38   : > { %3708 = vsyncadd (%p5695_p6), %s286_s21, 4294966272  ;;  %v5658_v0 = vmov 0.0   ;;  %v329_v1 = vld [vmem:[%s289_s10 + $0x8] sm:$0xff]  ;;  %v331_v2 = vld [vmem:[%s289_s10 + $0x18] sm:$0xff]  ;;  %vm336_vm0 = vcmask 64512   ;;  %vm1277_vm1 = vcmask 261120  }
  0x39   : > { %413 = vmatprep.mubr.f32.mxu0 %v5658_v0  ;;  %502 = vmatprep.mubr.f32.mxu1 %v5658_v0  ;;  %v328_v3 = vld [vmem:[%s289_s10] sm:$0xff]  ;;  %v330_v4 = vld [vmem:[%s289_s10 + $0x10] sm:$0xff]  ;;  %v333_v6 = vld [vmem:[%s289_s10 + $0x28] sm:$0xff]  ;;  %s321_s25 = scalar_lea.vmem [#allocation5], %s3524_s14  ;;  %s3584_s20 = sshll.u32 %s3799_s9, 10 }
  0x3a   : > { %379 = vmatprep.subr.mxu0 %v329_v1  ;;  %468 = vmatprep.subr.mxu1 %v331_v2  ;;  %v324_v5 = vld [vmem:[%s5648_s1] sm:$0xff]  ;;  %v335_v7 = vld [vmem:[%s289_s10 + $0x38] sm:$0xff]  ;;  %v334_v9 = vld [vmem:[%s289_s10 + $0x30] sm:$0xff]  ;;  %s3447_s21 = sshll.u32 %s321_s25, 4  ;;  %s5611_s24 = scalar_lea.hbm %s5655_s8, %s3584_s20  ;;  %s3448_s21 = int_to_ptr.vmem [resolvable:$true] %s3447_s21 }
  0x3b   : > { %380 = vmatpush1.msra.mxu0 %v328_v3  ;;  %469 = vmatpush1.msra.mxu1 %v330_v4  ;;  %v332_v8 = vld [vmem:[%s289_s10 + $0x20] sm:$0xff]  ;;  %v325_v10 = vld [vmem:[%s5648_s1 + $0x8] sm:$0xff]  ;;  %v326_v11 = vld [vmem:[%s5648_s1 + $0x10] sm:$0xff]  ;;  %s3433_s26 = scalar_lea.sflag [#allocation4], %s3875_s13  ;;  %s3663_s9 = scalar_lea.vmem %s3448_s21, 1024 }
  0x3c   : > { %3526 = vmatmul.mubr.msk.f32.vlgmr.msra.gmra.mxu0 %vm336_vm0, %v324_v5  ;;  %3530 = vmatmul.mubr.msk.f32.vlgmr.msra.gmra.mxu1 %vm336_vm0, %v324_v5  ;;  %v327_v12 = vld [vmem:[%s5648_s1 + $0x18] sm:$0xff]  ;;  %p3664_p10 = scmp.ne.s32.totalorder %s3448_s21, %s3663_s9  ;;  %p5760_p11 = scmp.ne.s32.totalorder %s5690_s17, 0 }
  0x3d   : > { %419 = vmatprep.mubr.f32.mxu0 %v5658_v0  ;;  %508 = vmatprep.mubr.f32.mxu1 %v5658_v0  ;;  %s3732_s16 = smov [#allocation5]  }
  0x3e   : > { %557 = vmatprep.subr.mxu0 %v333_v6  ;;  %646 = vmatprep.subr.mxu1 %v335_v7  ;;  %p3665_p12 = pnand %p3664_p10, %p5760_p11  ;;  %s3667_s12 = sshll.u32 %s3732_s16, 4  ;;  %s3668_s12 = int_to_ptr.vmem [resolvable:$false] %s3667_s12 }
  0x3f   : > { %558 = vmatpush1.msra.mxu0 %v332_v8  ;;  %647 = vmatpush1.msra.mxu1 %v334_v9  ;;  %s3669_s15 = scalar_lea.vmem %s3668_s12, 2048  ;;  %p3670_p2 = scmp.lt.s32.totalorder %s3448_s21, %s3668_s12 }
  0x40   : > { %3527 = vmatmul.mubr.msk.f32.gmra.mxu0 %vm336_vm0, %v325_v10  ;;  %3531 = vmatmul.mubr.msk.f32.gmra.mxu1 %vm336_vm0, %v325_v10  ;;  %p3666_p0 = pneg %p3665_p12  ;;  %p3671_p7 = scmp.lt.s32.totalorder %s3669_s15, %s3663_s9 }
  0x41   : > { %425 = vmatprep.mubr.f32.mxu0 %v5658_v0  ;;  %514 = vmatprep.mubr.f32.mxu1 %v5658_v0 }
  0x42   : > { %p3672_p8 = por %p3671_p7, %p3670_p2 }
  0x44   : > { %3528 = vmatmul.mubr.msk.f32.gmra.mxu0 %vm336_vm0, %v326_v11  ;;  %3532 = vmatmul.mubr.msk.f32.gmra.mxu1 %vm336_vm0, %v326_v11  ;;  %p3673_p9 = pnand %p3672_p8, %p3666_p0 }
  0x45   : > { %431 = vmatprep.mubr.f32.mxu0 %v5658_v0  ;;  %520 = vmatprep.mubr.f32.mxu1 %v5658_v0 }
  0x48   : > { %3529 = vmatmul.mubr.msk.f32.gmra.mxu0 %vm336_vm0, %v327_v12  ;;  %3533 = vmatmul.mubr.msk.f32.gmra.mxu1 %vm336_vm0, %v327_v12 }
  0x49   : > { %591 = vmatprep.mubr.f32.mxu0 %v5658_v0  ;;  %680 = vmatprep.mubr.f32.mxu1 %v5658_v0 }
  0x4c   : > { %3534 = vmatmul.mubr.msk.f32.vlgmr.msra.gmra.mxu0 %vm336_vm0, %v324_v5  ;;  %3538 = vmatmul.mubr.msk.f32.vlgmr.msra.gmra.mxu1 %vm336_vm0, %v324_v5 }
  0x4d   : > { %597 = vmatprep.mubr.f32.mxu0 %v5658_v0  ;;  %686 = vmatprep.mubr.f32.mxu1 %v5658_v0 }
  0x50   : > { %3535 = vmatmul.mubr.msk.f32.gmra.mxu0 %vm336_vm0, %v325_v10  ;;  %3539 = vmatmul.mubr.msk.f32.gmra.mxu1 %vm336_vm0, %v325_v10 }
  0x51   : > { %603 = vmatprep.mubr.f32.mxu0 %v5658_v0  ;;  %692 = vmatprep.mubr.f32.mxu1 %v5658_v0 }
  0x54   : > { %3536 = vmatmul.mubr.msk.f32.gmra.mxu0 %vm336_vm0, %v326_v11  ;;  %3540 = vmatmul.mubr.msk.f32.gmra.mxu1 %vm336_vm0, %v326_v11 }
  0x55   : > { %609 = vmatprep.mubr.f32.mxu0 %v5658_v0  ;;  %698 = vmatprep.mubr.f32.mxu1 %v5658_v0 }
  0x58   : > { %3537 = vmatmul.mubr.msk.f32.gmra.mxu0 %vm336_vm0, %v327_v12  ;;  %3541 = vmatmul.mubr.msk.f32.gmra.mxu1 %vm336_vm0, %v327_v12 }
  0x59   : > { %1354 = vmatprep.mubr.f32.mxu0 %v5658_v0  ;;  %1443 = vmatprep.mubr.f32.mxu1 %v5658_v0 }
  0xfc   : > { %v415_v13 = vpop.f32.mrf.mxu0  ;;  %v504_v14 = vpop.f32.mrf.mxu1 }
  0xfd   : > { %v705_v15 = vmul.f32 0.15915494, %v415_v13  ;;  %v707_v16 = vmul.f32 0.15915494, %v504_v14 }
  0xfe   : > { %v417_v17 = vpop.f32.mrf.mxu0  ;;  %v506_v18 = vpop.f32.mrf.mxu1 }
  0xff   : > { %v737_v19 = vadd.f32 0.5, %v705_v15  ;;  %v739_v20 = vadd.f32 0.5, %v707_v16  ;;  %v706_v21 = vmul.f32 0.15915494, %v417_v17  ;;  %v708_v22 = vmul.f32 0.15915494, %v506_v18 }
 0x100   : > { %v421_v23 = vpop.f32.mrf.mxu0  ;;  %v510_v24 = vpop.f32.mrf.mxu1 }
 0x101   : > { %v769_v25 = vfloor.f32 %v737_v19  ;;  %v771_v26 = vfloor.f32 %v739_v20  ;;  %v738_v27 = vadd.f32 0.5, %v706_v21  ;;  %v740_v28 = vadd.f32 0.5, %v708_v22 }
 0x102   : > { %v713_v29 = vmul.f32 0.15915494, %v421_v23  ;;  %v715_v30 = vmul.f32 0.15915494, %v510_v24  ;;  %v423_v31 = vpop.f32.mrf.mxu0  ;;  %v512_v32 = vpop.f32.mrf.mxu1 }
 0x103   : > { %v801_v33 = vmul.f32 6.2831855, %v769_v25  ;;  %v803_v34 = vmul.f32 6.2831855, %v771_v26  ;;  %v770_v35 = vfloor.f32 %v738_v27  ;;  %v772_v36 = vfloor.f32 %v740_v28 }
 0x104   : > { %v745_v37 = vadd.f32 0.5, %v713_v29  ;;  %v747_v38 = vadd.f32 0.5, %v715_v30  ;;  %v714_v39 = vmul.f32 0.15915494, %v423_v31  ;;  %v716_v40 = vmul.f32 0.15915494, %v512_v32 }
 0x105   : > { %v3931_v41 = vsub.f32 %v415_v13, %v801_v33  ;;  %v3933_v42 = vsub.f32 %v504_v14, %v803_v34  ;;  %v802_v43 = vmul.f32 6.2831855, %v770_v35  ;;  %v804_v44 = vmul.f32 6.2831855, %v772_v36 }
 0x106   : > { %v777_v45 = vfloor.f32 %v745_v37  ;;  %v779_v46 = vfloor.f32 %v747_v38  ;;  %v746_v47 = vadd.f32 0.5, %v714_v39  ;;  %v748_v48 = vadd.f32 0.5, %v716_v40 }
 0x107   : > { %v3937_v49 = vmul.f32 %v3931_v41, %v3931_v41  ;;  %v3941_v50 = vmul.f32 %v3933_v42, %v3933_v42  ;;  %v3943_v51 = vsub.f32 %v417_v17, %v802_v43  ;;  %v3945_v52 = vsub.f32 %v506_v18, %v804_v44 }
 0x108   : > { %v809_v53 = vmul.f32 6.2831855, %v777_v45  ;;  %v811_v54 = vmul.f32 6.2831855, %v779_v46  ;;  %v778_v55 = vfloor.f32 %v746_v47  ;;  %v780_v56 = vfloor.f32 %v748_v48 }
 0x109   : > { %v897_v57 = vmul.f32 -2.0532243e-08, %v3937_v49  ;;  %v899_v58 = vmul.f32 -2.0532243e-08, %v3941_v50  ;;  %v3951_v59 = vmul.f32 %v3943_v51, %v3943_v51  ;;  %v3955_v60 = vmul.f32 %v3945_v52, %v3945_v52 }
 0x10a   : > { %v3957_v61 = vsub.f32 %v421_v23, %v809_v53  ;;  %v3959_v62 = vsub.f32 %v510_v24, %v811_v54  ;;  %v810_v63 = vmul.f32 6.2831855, %v778_v55  ;;  %v812_v1 = vmul.f32 6.2831855, %v780_v56 }
 0x10b   : > { %v929_v2 = vadd.f32 2.704004e-06, %v897_v57  ;;  %v931_v3 = vadd.f32 2.704004e-06, %v899_v58  ;;  %v898_v4 = vmul.f32 -2.0532243e-08, %v3951_v59 }
 0x10c   : > { %v900_v5 = vmul.f32 -2.0532243e-08, %v3955_v60  ;;  %v3965_v6 = vmul.f32 %v3957_v61, %v3957_v61  ;;  %v3969_v7 = vmul.f32 %v3959_v62, %v3959_v62  ;;  %v3971_v8 = vsub.f32 %v423_v31, %v810_v63  ;;  %v4004_v63 = vpop.f32.mrf.mxu0 }
 0x10d   : > { %v961_v9 = vmul.f32 %v929_v2, %v3937_v49  ;;  %v963_v10 = vmul.f32 %v931_v3, %v3941_v50  ;;  %v930_v11 = vadd.f32 2.704004e-06, %v898_v4  ;;  %v3975_v12 = vsub.f32 %v512_v32, %v812_v1 }
 0x10e   : > { %v932_v13 = vadd.f32 2.704004e-06, %v900_v5  ;;  %v905_v14 = vmul.f32 -2.0532243e-08, %v3965_v6  ;;  %v907_v15 = vmul.f32 -2.0532243e-08, %v3969_v7  ;;  %v3981_v16 = vmul.f32 %v3971_v8, %v3971_v8  ;;  %v516_v5 = vpop.f32.mrf.mxu1 }
 0x10f   : > { %v993_v17 = vadd.f32 -0.00019812536, %v961_v9  ;;  %v995_v18 = vadd.f32 -0.00019812536, %v963_v10  ;;  %v962_v19 = vmul.f32 %v930_v11, %v3951_v59  ;;  %v3986_v20 = vmul.f32 %v3975_v12, %v3975_v12 }
 0x110   : > { %v964_v21 = vmul.f32 %v932_v13, %v3955_v60  ;;  %v937_v22 = vadd.f32 2.704004e-06, %v905_v14  ;;  %v939_v23 = vadd.f32 2.704004e-06, %v907_v15  ;;  %v906_v24 = vmul.f32 -2.0532243e-08, %v3981_v16 }
 0x111   : > { %v1025_v25 = vmul.f32 %v993_v17, %v3937_v49  ;;  %v1027_v26 = vmul.f32 %v995_v18, %v3941_v50  ;;  %v994_v27 = vadd.f32 -0.00019812536, %v962_v19  ;;  %v908_v28 = vmul.f32 -2.0532243e-08, %v3986_v20 }
 0x112   : > { %v996_v29 = vadd.f32 -0.00019812536, %v964_v21  ;;  %v969_v30 = vmul.f32 %v937_v22, %v3965_v6  ;;  %v971_v31 = vmul.f32 %v939_v23, %v3969_v7  ;;  %v938_v32 = vadd.f32 2.704004e-06, %v906_v24  ;;  %v429_v23 = vpop.f32.mrf.mxu0 }
 0x113   : > { %v1057_v33 = vadd.f32 0.008332557, %v1025_v25  ;;  %v1059_v34 = vadd.f32 0.008332557, %v1027_v26  ;;  %v1026_v35 = vmul.f32 %v994_v27, %v3951_v59  ;;  %v940_v36 = vadd.f32 2.704004e-06, %v908_v28  ;;  %v518_v26 = vpop.f32.mrf.mxu1 }
 0x114   : > { %v1028_v37 = vmul.f32 %v996_v29, %v3955_v60  ;;  %v1001_v38 = vadd.f32 -0.00019812536, %v969_v30  ;;  %v1003_v39 = vadd.f32 -0.00019812536, %v971_v31  ;;  %v970_v40 = vmul.f32 %v938_v32, %v3981_v16 }
 0x115   : > { %v1089_v43 = vmul.f32 %v1057_v33, %v3937_v49  ;;  %v1091_v44 = vmul.f32 %v1059_v34, %v3941_v50  ;;  %v1058_v45 = vadd.f32 0.008332557, %v1026_v35  ;;  %v972_v46 = vmul.f32 %v940_v36, %v3986_v20  ;;  %v433_v35 = vpop.f32.mrf.mxu0 }
 0x116   : > { %v1060_v47 = vadd.f32 0.008332557, %v1028_v37  ;;  %v1033_v48 = vmul.f32 %v1001_v38, %v3965_v6  ;;  %v1035_v53 = vmul.f32 %v1003_v39, %v3969_v7  ;;  %v1002_v54 = vadd.f32 -0.00019812536, %v970_v40  ;;  %v522_v40 = vpop.f32.mrf.mxu1 }
 0x117   : > { %v1121_v55 = vadd.f32 -0.16666576, %v1089_v43  ;;  %v1123_v56 = vadd.f32 -0.16666576, %v1091_v44  ;;  %v1090_v57 = vmul.f32 %v1058_v45, %v3951_v59  ;;  %v1004_v58 = vadd.f32 -0.00019812536, %v972_v46 }
 0x118   : > { %v1092_v1 = vmul.f32 %v1060_v47, %v3955_v60  ;;  %v1065_v2 = vadd.f32 0.008332557, %v1033_v48  ;;  %v1067_v3 = vadd.f32 0.008332557, %v1035_v53  ;;  %v1034_v4 = vmul.f32 %v1002_v54, %v3981_v16 }
 0x119   : > { %v1153_v9 = vmul.f32 %v1121_v55, %v3937_v49  ;;  %v1155_v10 = vmul.f32 %v1123_v56, %v3941_v50  ;;  %v1122_v11 = vadd.f32 -0.16666576, %v1090_v57  ;;  %v1036_v13 = vmul.f32 %v1004_v58, %v3986_v20  ;;  %v435_v56 = vpop.f32.mrf.mxu0 }
 0x11a   : > { %v1124_v14 = vadd.f32 -0.16666576, %v1092_v1  ;;  %v1097_v15 = vmul.f32 %v1065_v2, %v3965_v6  ;;  %v1099_v17 = vmul.f32 %v1067_v3, %v3969_v7  ;;  %v1066_v18 = vadd.f32 0.008332557, %v1034_v4  ;;  %v524_v1 = vpop.f32.mrf.mxu1 }
 0x11b   : > { %v1185_v19 = vadd.f32 0.9999997, %v1153_v9  ;;  %v1154_v21 = vmul.f32 %v1122_v11, %v3951_v59  ;;  %v1068_v22 = vadd.f32 0.008332557, %v1036_v13  ;;  %v4016_v27 = vadd.f32 0.9999997, %v1155_v10 }
 0x11c   : > { %v1156_v24 = vmul.f32 %v1124_v14, %v3955_v60  ;;  %v1129_v25 = vadd.f32 -0.16666576, %v1097_v15  ;;  %v1131_v49 = vadd.f32 -0.16666576, %v1099_v17  ;;  %v1098_v50 = vmul.f32 %v1066_v18, %v3981_v16 }
 0x11d   : > { %v1100_v28 = vmul.f32 %v1068_v22, %v3986_v20  ;;  %v1186_v29 = vadd.f32 0.9999997, %v1154_v21  ;;  %v4022_v59 = vmul.f32 %v1185_v19, %v3931_v41  ;;  %v721_v60 = vmul.f32 0.15915494, %v4004_v63 }
 0x11e   : > { %v1161_v30 = vmul.f32 %v1129_v25, %v3965_v6  ;;  %v1163_v31 = vmul.f32 %v1131_v49, %v3969_v7  ;;  %v1130_v32 = vadd.f32 -0.16666576, %v1098_v50  ;;  %v723_v34 = vmul.f32 0.15915494, %v516_v5 }
 0x11f   : > { %v1132_v33 = vadd.f32 -0.16666576, %v1100_v28  ;;  %v4025_v36 = vadd.f32 0.9999997, %v1156_v24  ;;  %v753_v43 = vadd.f32 0.5, %v721_v60  ;;  %v4030_v41 = vmul.f32 %v1186_v29, %v3943_v51 }
 0x120   : > { %v1193_v37 = vadd.f32 0.9999997, %v1161_v30  ;;  %v1195_v38 = vadd.f32 0.9999997, %v1163_v31  ;;  %v1162_v39 = vmul.f32 %v1130_v32, %v3981_v16  ;;  %v755_v7 = vadd.f32 0.5, %v723_v34 }
 0x121   : > { %v1164_v6 = vmul.f32 %v1132_v33, %v3986_v20  ;;  %v722_v44 = vmul.f32 0.15915494, %v429_v23  ;;  %v724_v47 = vmul.f32 0.15915494, %v518_v26  ;;  %v785_v53 = vfloor.f32 %v753_v43 }
 0x122   : > { %v4033_v45 = vmul.f32 %v1193_v37, %v3957_v61  ;;  %v1194_v46 = vadd.f32 0.9999997, %v1162_v39  ;;  %v787_v54 = vfloor.f32 %v755_v7  ;;  %v4036_v16 = vmul.f32 %v1195_v38, %v3959_v62 }
 0x123   : > { %v1196_v48 = vadd.f32 0.9999997, %v1164_v6  ;;  %v754_v55 = vadd.f32 0.5, %v722_v44  ;;  %v756_v20 = vadd.f32 0.5, %v724_v47  ;;  %v729_v57 = vmul.f32 0.15915494, %v433_v35 }
 0x124   : > { %v731_v58 = vmul.f32 0.15915494, %v522_v40  ;;  %v4039_v51 = vmul.f32 %v1194_v46, %v3971_v8  ;;  %v817_v2 = vmul.f32 6.2831855, %v785_v53  ;;  %v819_v61 = vmul.f32 6.2831855, %v787_v54 }
 0x125   : > { %v786_v3 = vfloor.f32 %v754_v55  ;;  %v788_v4 = vfloor.f32 %v756_v20  ;;  %v761_v9 = vadd.f32 0.5, %v729_v57  ;;  %v730_v11 = vmul.f32 0.15915494, %v435_v56 }
 0x126   : > { %v763_v10 = vadd.f32 0.5, %v731_v58  ;;  %v4042_v13 = vsub.f32 %v4004_v63, %v817_v2  ;;  %v4044_v14 = vsub.f32 %v516_v5, %v819_v61  ;;  %v732_v15 = vmul.f32 0.15915494, %v524_v1 }
 0x127   : > { %v818_v62 = vmul.f32 6.2831855, %v786_v3  ;;  %v820_v17 = vmul.f32 6.2831855, %v788_v4  ;;  %v793_v18 = vfloor.f32 %v761_v9  ;;  %v762_v21 = vadd.f32 0.5, %v730_v11 }
 0x128   : > { %v795_v19 = vfloor.f32 %v763_v10  ;;  %v4048_v8 = vmul.f32 %v4042_v13, %v4042_v13  ;;  %v4052_v22 = vmul.f32 %v4044_v14, %v4044_v14  ;;  %v764_v63 = vadd.f32 0.5, %v732_v15 }
 0x129   : > { %v4054_v24 = vsub.f32 %v429_v23, %v818_v62  ;;  %v4056_v25 = vsub.f32 %v518_v26, %v820_v17  ;;  %v825_v5 = vmul.f32 6.2831855, %v793_v18  ;;  %v794_v50 = vfloor.f32 %v762_v21 }
 0x12a   : > { %v827_v49 = vmul.f32 6.2831855, %v795_v19  ;;  %v913_v28 = vmul.f32 -2.0532243e-08, %v4048_v8  ;;  %v915_v29 = vmul.f32 -2.0532243e-08, %v4052_v22  ;;  %v796_v31 = vfloor.f32 %v764_v63 }
 0x12b   : > { %v4062_v30 = vmul.f32 %v4054_v24, %v4054_v24  ;;  %v4066_v32 = vmul.f32 %v4056_v25, %v4056_v25  ;;  %v4068_v23 = vsub.f32 %v433_v35, %v825_v5  ;;  %v826_v33 = vmul.f32 6.2831855, %v794_v50 }
 0x12c   : > { %v4070_v26 = vsub.f32 %v522_v40, %v827_v49  ;;  %v4073_v60 = vmul.f32 %v1196_v48, %v3975_v12  ;;  %v945_v34 = vadd.f32 2.704004e-06, %v913_v28  ;;  %v947_v37 = vadd.f32 2.704004e-06, %v915_v29 }
 0x12d   : > { %v914_v38 = vmul.f32 -2.0532243e-08, %v4062_v30  ;;  %v916_v39 = vmul.f32 -2.0532243e-08, %v4066_v32  ;;  %v4079_v6 = vmul.f32 %v4068_v23, %v4068_v23  ;;  %v4085_v40 = vsub.f32 %v435_v56, %v826_v33 }
 0x12e   : > { %v4083_v35 = vmul.f32 %v4070_v26, %v4070_v26  ;;  %v977_v43 = vmul.f32 %v945_v34, %v4048_v8  ;;  %v979_v12 = vmul.f32 %v947_v37, %v4052_v22  ;;  %v828_v44 = vmul.f32 6.2831855, %v796_v31 }
 0x12f   : > { %v946_v7 = vadd.f32 2.704004e-06, %v914_v38  ;;  %v948_v46 = vadd.f32 2.704004e-06, %v916_v39  ;;  %v921_v47 = vmul.f32 -2.0532243e-08, %v4079_v6  ;;  %v4093_v53 = vmul.f32 %v4085_v40, %v4085_v40 }
 0x130   : > { %v923_v48 = vmul.f32 -2.0532243e-08, %v4083_v35  ;;  %v1009_v54 = vadd.f32 -0.00019812536, %v977_v43  ;;  %v1011_v55 = vadd.f32 -0.00019812536, %v979_v12  ;;  %v4096_v20 = vsub.f32 %v524_v1, %v828_v44 }
 0x131   : > { %v978_v56 = vmul.f32 %v946_v7, %v4062_v30  ;;  %v980_v57 = vmul.f32 %v948_v46, %v4066_v32  ;;  %v953_v58 = vadd.f32 2.704004e-06, %v921_v47  ;;  %v922_v61 = vmul.f32 -2.0532243e-08, %v4093_v53  ;;  %v4118_v46 = vpop.f32.mrf.mxu0 }
 0x132   : > { %v955_v2 = vadd.f32 2.704004e-06, %v923_v48  ;;  %v1041_v3 = vmul.f32 %v1009_v54, %v4048_v8  ;;  %v1043_v4 = vmul.f32 %v1011_v55, %v4052_v22  ;;  %v4104_v10 = vmul.f32 %v4096_v20, %v4096_v20 }
 0x133   : > { %v1010_v9 = vadd.f32 -0.00019812536, %v978_v56  ;;  %v1012_v11 = vadd.f32 -0.00019812536, %v980_v57  ;;  %v985_v62 = vmul.f32 %v953_v58, %v4079_v6  ;;  %v954_v15 = vadd.f32 2.704004e-06, %v922_v61  ;;  %v682_v61 = vpop.f32.mrf.mxu1 }
 0x134   : > { %v987_v1 = vmul.f32 %v955_v2, %v4083_v35  ;;  %v1073_v17 = vadd.f32 0.008332557, %v1041_v3  ;;  %v1075_v18 = vadd.f32 0.008332557, %v1043_v4  ;;  %v924_v21 = vmul.f32 -2.0532243e-08, %v4104_v10 }
 0x135   : > { %v1042_v19 = vmul.f32 %v1010_v9, %v4062_v30  ;;  %v1044_v63 = vmul.f32 %v1012_v11, %v4066_v32  ;;  %v1017_v5 = vadd.f32 -0.00019812536, %v985_v62  ;;  %v986_v50 = vmul.f32 %v954_v15, %v4093_v53 }
 0x136   : > { %v1019_v49 = vadd.f32 -0.00019812536, %v987_v1  ;;  %v1105_v28 = vmul.f32 %v1073_v17, %v4048_v8  ;;  %v1107_v29 = vmul.f32 %v1075_v18, %v4052_v22  ;;  %v956_v33 = vadd.f32 2.704004e-06, %v924_v21  ;;  %v4128_v18 = vpop.f32.mrf.mxu0 }
 0x137   : > { %v1074_v31 = vadd.f32 0.008332557, %v1042_v19  ;;  %v1076_v34 = vadd.f32 0.008332557, %v1044_v63  ;;  %v1049_v37 = vmul.f32 %v1017_v5, %v4079_v6  ;;  %v1018_v39 = vadd.f32 -0.00019812536, %v986_v50 }
 0x138   : > { %v1051_v38 = vmul.f32 %v1019_v49, %v4083_v35  ;;  %v1137_v43 = vadd.f32 -0.16666576, %v1105_v28  ;;  %v1139_v12 = vadd.f32 -0.16666576, %v1107_v29  ;;  %v988_v44 = vmul.f32 %v956_v33, %v4104_v10  ;;  %v684_v28 = vpop.f32.mrf.mxu1 }
 0x139   : > { %v1106_v7 = vmul.f32 %v1074_v31, %v4062_v30  ;;  %v1108_v47 = vmul.f32 %v1076_v34, %v4066_v32  ;;  %v1081_v48 = vadd.f32 0.008332557, %v1049_v37  ;;  %v1050_v55 = vmul.f32 %v1018_v39, %v4093_v53 }
 0x13a   : > { %v1083_v54 = vadd.f32 0.008332557, %v1051_v38  ;;  %v1169_v56 = vmul.f32 %v1137_v43, %v4048_v8  ;;  %v1171_v57 = vmul.f32 %v1139_v12, %v4052_v22  ;;  %v1020_v2 = vadd.f32 -0.00019812536, %v988_v44 }
 0x13b   : > { %v1138_v58 = vadd.f32 -0.16666576, %v1106_v7  ;;  %v1140_v3 = vadd.f32 -0.16666576, %v1108_v47  ;;  %v1113_v4 = vmul.f32 %v1081_v48, %v4079_v6  ;;  %v1082_v11 = vadd.f32 0.008332557, %v1050_v55  ;;  %v688_v47 = vpop.f32.mrf.mxu1 }
 0x13c   : > { %v1115_v9 = vmul.f32 %v1083_v54, %v4083_v35  ;;  %v1201_v62 = vadd.f32 0.9999997, %v1169_v56  ;;  %v1203_v1 = vadd.f32 0.9999997, %v1171_v57  ;;  %v1052_v17 = vmul.f32 %v1020_v2, %v4104_v10 }
 0x13d   : > { %v1170_v15 = vmul.f32 %v1138_v58, %v4062_v30  ;;  %v1172_v8 = vmul.f32 %v1140_v3, %v4066_v32  ;;  %v1145_v22 = vadd.f32 -0.16666576, %v1113_v4  ;;  %v1114_v21 = vmul.f32 %v1082_v11, %v4093_v53 }
 0x13e   : > { %v1147_v19 = vadd.f32 -0.16666576, %v1115_v9  ;;  %v1233_v63 = vmul.f32 %v1201_v62, %v4042_v13  ;;  %v4134_v5 = vmul.f32 %v1203_v1, %v4044_v14  ;;  %v1084_v50 = vadd.f32 0.008332557, %v1052_v17  ;;  %v599_v13 = vpop.f32.mrf.mxu0 }
 0x13f   : > { %v1202_v49 = vadd.f32 0.9999997, %v1170_v15  ;;  %v1204_v29 = vadd.f32 0.9999997, %v1172_v8  ;;  %v1177_v30 = vmul.f32 %v1145_v22, %v4079_v6  ;;  %v1146_v33 = vadd.f32 -0.16666576, %v1114_v21  ;;  %v690_v22 = vpop.f32.mrf.mxu1 }
 0x140   : > { %v1179_v31 = vmul.f32 %v1147_v19, %v4083_v35  ;;  %v1116_v34 = vmul.f32 %v1084_v50, %v4104_v10  ;;  %v709_v37 = vmul.f32 0.15915494, %v4118_v46  ;;  %v711_v38 = vmul.f32 0.15915494, %v682_v61  ;;  %v601_v2 = vpop.f32.mrf.mxu0 }
 0x141   : > { %v1234_v32 = vmul.f32 %v1202_v49, %v4054_v24  ;;  %v1236_v14 = vmul.f32 %v1204_v29, %v4056_v25  ;;  %v1209_v39 = vadd.f32 0.9999997, %v1177_v30  ;;  %v1178_v12 = vmul.f32 %v1146_v33, %v4093_v53 }
 0x142   : > { %v1211_v43 = vadd.f32 0.9999997, %v1179_v31  ;;  %v1148_v7 = vadd.f32 -0.16666576, %v1116_v34  ;;  %v741_v44 = vadd.f32 0.5, %v709_v37  ;;  %v743_v6 = vadd.f32 0.5, %v711_v38 }
 0x143   : > { %v710_v35 = vmul.f32 0.15915494, %v4128_v18  ;;  %v1241_v24 = vmul.f32 %v1209_v39, %v4068_v23  ;;  %v1210_v54 = vadd.f32 0.9999997, %v1178_v12  ;;  %v712_v55 = vmul.f32 0.15915494, %v684_v28 }
 0x144   : > { %v1243_v48 = vmul.f32 %v1211_v43, %v4070_v26  ;;  %v1180_v56 = vmul.f32 %v1148_v7, %v4104_v10  ;;  %v773_v57 = vfloor.f32 %v741_v44  ;;  %v775_v25 = vfloor.f32 %v743_v6 }
 0x145   : > { %v742_v58 = vadd.f32 0.5, %v710_v35  ;;  %v1242_v53 = vmul.f32 %v1210_v54, %v4085_v40  ;;  %v744_v3 = vadd.f32 0.5, %v712_v55  ;;  %v717_v4 = vmul.f32 0.15915494, %v599_v13 }
 0x146   : > { %v719_v9 = vmul.f32 0.15915494, %v688_v47  ;;  %v1212_v11 = vadd.f32 0.9999997, %v1180_v56  ;;  %v805_v62 = vmul.f32 6.2831855, %v773_v57  ;;  %v1219_v7 = vmul.f32 %v4016_v27, %v3933_v42 }
 0x147   : > { %v807_v1 = vmul.f32 6.2831855, %v775_v25  ;;  %v774_v15 = vfloor.f32 %v742_v58  ;;  %v776_v23 = vfloor.f32 %v744_v3  ;;  %v749_v17 = vadd.f32 0.5, %v717_v4  ;;  %1314 = vmatprep.subr.mxu0 %v1242_v53 }
 0x148   : > { %v751_v26 = vadd.f32 0.5, %v719_v9  ;;  %v718_v8 = vmul.f32 0.15915494, %v601_v2  ;;  %v1244_v10 = vmul.f32 %v1212_v11, %v4096_v20  ;;  %v4150_v19 = vsub.f32 %v4118_v46, %v805_v62  ;;  %1315 = vmatpush1.msra.mxu0 %v1241_v24  ;;  %v605_v9 = vpop.f32.mrf.mxu0 }
 0x149   : > { %v4152_v21 = vsub.f32 %v682_v61, %v807_v1  ;;  %v806_v40 = vmul.f32 6.2831855, %v774_v15  ;;  %v808_v49 = vmul.f32 6.2831855, %v776_v23  ;;  %v781_v50 = vfloor.f32 %v749_v17  ;;  %1316 = vmatprep.subr.mxu0 %v1234_v32  ;;  %v694_v23 = vpop.f32.mrf.mxu1 }
 0x14a   : > { %v783_v29 = vfloor.f32 %v751_v26  ;;  %v750_v30 = vadd.f32 0.5, %v718_v8  ;;  %v4156_v31 = vmul.f32 %v4150_v19, %v4150_v19  ;;  %v720_v46 = vmul.f32 0.15915494, %v690_v22  ;;  %1403 = vmatprep.subr.mxu1 %v1244_v10  ;;  %1317 = vmatpush1.msra.mxu0 %v1233_v63  ;;  %v607_v10 = vpop.f32.mrf.mxu0 }
 0x14b   : > { %v4160_v33 = vmul.f32 %v4152_v21, %v4152_v21  ;;  %v4163_v20 = vsub.f32 %v4128_v18, %v806_v40  ;;  %v4165_v61 = vsub.f32 %v684_v28, %v808_v49  ;;  %v813_v34 = vmul.f32 6.2831855, %v781_v50  ;;  %1404 = vmatpush1.msra.mxu1 %v1243_v48  ;;  %1318 = vmatprep.subr.mxu0 %v4039_v51 }
 0x14c   : > { %v815_v37 = vmul.f32 6.2831855, %v783_v29  ;;  %v782_v38 = vfloor.f32 %v750_v30  ;;  %v901_v32 = vmul.f32 -2.0532243e-08, %v4156_v31  ;;  %v752_v18 = vadd.f32 0.5, %v720_v46  ;;  %1405 = vmatprep.subr.mxu1 %v1236_v14  ;;  %1319 = vmatpush1.msra.mxu0 %v4033_v45  ;;  %v696_v30 = vpop.f32.mrf.mxu1 }
 0x14d   : > { %v903_v39 = vmul.f32 -2.0532243e-08, %v4160_v33  ;;  %v4172_v43 = vmul.f32 %v4163_v20, %v4163_v20  ;;  %v4177_v63 = vmul.f32 %v4165_v61, %v4165_v61  ;;  %v4179_v28 = vsub.f32 %v599_v13, %v813_v34  ;;  %1406 = vmatpush1.msra.mxu1 %v4134_v5  ;;  %1320 = vmatprep.subr.mxu0 %v4030_v41 }
 0x14e   : > { %v4181_v12 = vsub.f32 %v688_v47, %v815_v37  ;;  %v814_v51 = vmul.f32 6.2831855, %v782_v38  ;;  %v1220_v14 = vmul.f32 %v4025_v36, %v3945_v52  ;;  %v933_v45 = vadd.f32 2.704004e-06, %v901_v32  ;;  %1407 = vmatprep.subr.mxu1 %v4073_v60  ;;  %1321 = vmatpush1.msra.mxu0 %v4022_v59 }
 0x14f   : > { %v784_v44 = vfloor.f32 %v752_v18  ;;  %v935_v13 = vadd.f32 2.704004e-06, %v903_v39  ;;  %v902_v6 = vmul.f32 -2.0532243e-08, %v4172_v43  ;;  %v904_v35 = vmul.f32 -2.0532243e-08, %v4177_v63  ;;  %1408 = vmatpush1.msra.mxu1 %v4036_v16  ;;  %v611_v18 = vpop.f32.mrf.mxu0 }
 0x150   : > { %v4195_v41 = vmul.f32 %v4179_v28, %v4179_v28  ;;  %v4198_v42 = vsub.f32 %v601_v2, %v814_v51  ;;  %1409 = vmatprep.subr.mxu1 %v1220_v14  ;;  %v965_v52 = vmul.f32 %v933_v45, %v4156_v31  ;;  %v4203_v27 = vmul.f32 %v4181_v12, %v4181_v12 }
 0x151   : > { %v816_v59 = vmul.f32 6.2831855, %v784_v44  ;;  %1410 = vmatpush1.msra.mxu1 %v1219_v7  ;;  %v967_v60 = vmul.f32 %v935_v13, %v4160_v33  ;;  %v934_v5 = vadd.f32 2.704004e-06, %v902_v6  ;;  %v936_v47 = vadd.f32 2.704004e-06, %v904_v35  ;;  %v700_v35 = vpop.f32.mrf.mxu1 }
 0x152   : > { %v909_v36 = vmul.f32 -2.0532243e-08, %v4195_v41  ;;  %v4209_v16 = vmul.f32 %v4198_v42, %v4198_v42  ;;  %v997_v24 = vadd.f32 -0.00019812536, %v965_v52  ;;  %v911_v48 = vmul.f32 -2.0532243e-08, %v4203_v27 }
 0x153   : > { %v4212_v54 = vsub.f32 %v690_v22, %v816_v59  ;;  %v999_v56 = vadd.f32 -0.00019812536, %v967_v60  ;;  %v966_v57 = vmul.f32 %v934_v5, %v4172_v43  ;;  %v968_v25 = vmul.f32 %v936_v47, %v4177_v63 }
 0x154   : > { %v941_v55 = vadd.f32 2.704004e-06, %v909_v36  ;;  %v910_v58 = vmul.f32 -2.0532243e-08, %v4209_v16  ;;  %v1029_v2 = vmul.f32 %v997_v24, %v4156_v31  ;;  %v943_v53 = vadd.f32 2.704004e-06, %v911_v48 }
 0x155   : > { %v4220_v3 = vmul.f32 %v4212_v54, %v4212_v54  ;;  %v1031_v11 = vmul.f32 %v999_v56, %v4160_v33  ;;  %v998_v62 = vadd.f32 -0.00019812536, %v966_v57  ;;  %v1000_v1 = vadd.f32 -0.00019812536, %v968_v25 }
 0x156   : > { %v973_v4 = vmul.f32 %v941_v55, %v4195_v41  ;;  %v942_v15 = vadd.f32 2.704004e-06, %v910_v58  ;;  %v1061_v17 = vadd.f32 0.008332557, %v1029_v2  ;;  %v975_v26 = vmul.f32 %v943_v53, %v4203_v27  ;;  %v613_v55 = vpop.f32.mrf.mxu0 }
 0x157   : > { %v912_v8 = vmul.f32 -2.0532243e-08, %v4220_v3  ;;  %v1063_v40 = vadd.f32 0.008332557, %v1031_v11  ;;  %v1030_v49 = vmul.f32 %v998_v62, %v4172_v43  ;;  %v1032_v50 = vmul.f32 %v1000_v1, %v4177_v63 }
 0x158   : > { %v1005_v22 = vadd.f32 -0.00019812536, %v973_v4  ;;  %v974_v29 = vmul.f32 %v942_v15, %v4209_v16  ;;  %v1093_v46 = vmul.f32 %v1061_v17, %v4156_v31  ;;  %v1007_v34 = vadd.f32 -0.00019812536, %v975_v26  ;;  %v702_v26 = vpop.f32.mrf.mxu1 }
 0x159   : > { %v944_v37 = vadd.f32 2.704004e-06, %v912_v8  ;;  %v725_v32 = vmul.f32 0.15915494, %v605_v9  ;;  %v727_v39 = vmul.f32 0.15915494, %v694_v23  ;;  %v4232_v51 = vmul.f32 %v1063_v40, %v4160_v33 }
 0x15a   : > { %v1037_v38 = vmul.f32 %v1005_v22, %v4195_v41  ;;  %v1062_v7 = vadd.f32 0.008332557, %v1030_v49  ;;  %v4234_v14 = vadd.f32 0.008332557, %v1032_v50  ;;  %v1006_v45 = vadd.f32 -0.00019812536, %v974_v29 }
 0x15b   : > { %v757_v44 = vadd.f32 0.5, %v725_v32  ;;  %v759_v13 = vadd.f32 0.5, %v727_v39  ;;  %v726_v6 = vmul.f32 0.15915494, %v607_v10  ;;  %v4236_v52 = vadd.f32 -0.16666576, %v1093_v46 }
 0x15c   : > { %v4239_v59 = vmul.f32 %v1007_v34, %v4203_v27  ;;  %v976_v36 = vmul.f32 %v944_v37, %v4220_v3  ;;  %v728_v60 = vmul.f32 0.15915494, %v696_v30  ;;  %v4242_v5 = vadd.f32 0.008332557, %v1037_v38 }
 0x15d   : > { %v789_v47 = vfloor.f32 %v757_v44  ;;  %v791_v24 = vfloor.f32 %v759_v13  ;;  %v758_v48 = vadd.f32 0.5, %v726_v6  ;;  %v4245_v56 = vmul.f32 %v1062_v7, %v4172_v43 }
 0x15e   : > { %v760_v57 = vadd.f32 0.5, %v728_v60  ;;  %v733_v25 = vmul.f32 0.15915494, %v611_v18  ;;  %v735_v58 = vmul.f32 0.15915494, %v700_v35  ;;  %v4248_v2 = vmul.f32 %v1006_v45, %v4209_v16 }
 0x15f   : > { %v821_v53 = vmul.f32 6.2831855, %v789_v47  ;;  %v823_v4 = vmul.f32 6.2831855, %v791_v24  ;;  %v790_v11 = vfloor.f32 %v758_v48  ;;  %v734_v17 = vmul.f32 0.15915494, %v613_v55 }
 0x160   : > { %v792_v62 = vfloor.f32 %v760_v57  ;;  %v765_v1 = vadd.f32 0.5, %v733_v25  ;;  %v767_v15 = vadd.f32 0.5, %v735_v58  ;;  %v1008_v8 = vadd.f32 -0.00019812536, %v976_v36 }
 0x161   : > { %v4250_v22 = vsub.f32 %v605_v9, %v821_v53  ;;  %v4252_v40 = vsub.f32 %v694_v23, %v823_v4  ;;  %v822_v49 = vmul.f32 6.2831855, %v790_v11  ;;  %v766_v34 = vadd.f32 0.5, %v734_v17 }
 0x162   : > { %v824_v50 = vmul.f32 6.2831855, %v792_v62  ;;  %v797_v29 = vfloor.f32 %v765_v1  ;;  %v799_v46 = vfloor.f32 %v767_v15  ;;  %v736_v39 = vmul.f32 0.15915494, %v702_v26 }
 0x163   : > { %v4256_v37 = vmul.f32 %v4250_v22, %v4250_v22  ;;  %v4260_v38 = vmul.f32 %v4252_v40, %v4252_v40  ;;  %v4262_v32 = vsub.f32 %v607_v10, %v822_v49  ;;  %v798_v45 = vfloor.f32 %v766_v34 }
 0x164   : > { %v4264_v9 = vsub.f32 %v696_v30, %v824_v50  ;;  %v829_v23 = vmul.f32 6.2831855, %v797_v29  ;;  %v831_v7 = vmul.f32 6.2831855, %v799_v46  ;;  %v768_v36 = vadd.f32 0.5, %v736_v39 }
 0x165   : > { %v917_v44 = vmul.f32 -2.0532243e-08, %v4256_v37  ;;  %v919_v13 = vmul.f32 -2.0532243e-08, %v4260_v38  ;;  %v4270_v6 = vmul.f32 %v4262_v32, %v4262_v32  ;;  %v830_v47 = vmul.f32 6.2831855, %v798_v45 }
 0x166   : > { %v4274_v60 = vmul.f32 %v4264_v9, %v4264_v9  ;;  %v4276_v10 = vsub.f32 %v611_v18, %v829_v23  ;;  %v4278_v30 = vsub.f32 %v700_v35, %v831_v7  ;;  %v800_v25 = vfloor.f32 %v768_v36 }
 0x167   : > { %v949_v24 = vadd.f32 2.704004e-06, %v917_v44  ;;  %v951_v48 = vadd.f32 2.704004e-06, %v919_v13  ;;  %v918_v57 = vmul.f32 -2.0532243e-08, %v4270_v6  ;;  %v4290_v18 = vsub.f32 %v613_v55, %v830_v47 }
 0x168   : > { %v920_v58 = vmul.f32 -2.0532243e-08, %v4274_v60  ;;  %v4284_v53 = vmul.f32 %v4276_v10, %v4276_v10  ;;  %v4288_v4 = vmul.f32 %v4278_v30, %v4278_v30  ;;  %v832_v1 = vmul.f32 6.2831855, %v800_v25 }
 0x169   : > { %v981_v35 = vmul.f32 %v949_v24, %v4256_v37  ;;  %v983_v11 = vmul.f32 %v951_v48, %v4260_v38  ;;  %v950_v62 = vadd.f32 2.704004e-06, %v918_v57  ;;  %v4298_v50 = vmul.f32 %v4290_v18, %v4290_v18 }
 0x16a   : > { %v952_v15 = vadd.f32 2.704004e-06, %v920_v58  ;;  %v925_v17 = vmul.f32 -2.0532243e-08, %v4284_v53  ;;  %v927_v49 = vmul.f32 -2.0532243e-08, %v4288_v4  ;;  %v4301_v34 = vsub.f32 %v702_v26, %v832_v1 }
 0x16b   : > { %v1013_v29 = vadd.f32 -0.00019812536, %v981_v35  ;;  %v1015_v46 = vadd.f32 -0.00019812536, %v983_v11  ;;  %v982_v55 = vmul.f32 %v950_v62, %v4270_v6  ;;  %v926_v45 = vmul.f32 -2.0532243e-08, %v4298_v50 }
 0x16c   : > { %v984_v39 = vmul.f32 %v952_v15, %v4274_v60  ;;  %v957_v23 = vadd.f32 2.704004e-06, %v925_v17  ;;  %v959_v7 = vadd.f32 2.704004e-06, %v927_v49  ;;  %v4309_v47 = vmul.f32 %v4301_v34, %v4301_v34 }
 0x16d   : > { %v1045_v44 = vmul.f32 %v1013_v29, %v4256_v37  ;;  %v1047_v13 = vmul.f32 %v1015_v46, %v4260_v38  ;;  %v1014_v36 = vadd.f32 -0.00019812536, %v982_v55  ;;  %v958_v57 = vadd.f32 2.704004e-06, %v926_v45 }
 0x16e   : > { %v1016_v24 = vadd.f32 -0.00019812536, %v984_v39  ;;  %v989_v48 = vmul.f32 %v957_v23, %v4284_v53  ;;  %v991_v26 = vmul.f32 %v959_v7, %v4288_v4  ;;  %v1040_v25 = vmul.f32 %v1008_v8, %v4220_v3 }
 0x16f   : > { %v1077_v58 = vadd.f32 0.008332557, %v1045_v44  ;;  %v1046_v35 = vmul.f32 %v1014_v36, %v4270_v6  ;;  %v928_v11 = vmul.f32 -2.0532243e-08, %v4309_v47  ;;  %v990_v17 = vmul.f32 %v958_v57, %v4298_v50 }
 0x170   : > { %v1048_v62 = vmul.f32 %v1016_v24, %v4274_v60  ;;  %v1021_v1 = vadd.f32 -0.00019812536, %v989_v48  ;;  %v1023_v15 = vadd.f32 -0.00019812536, %v991_v26  ;;  %v1096_v49 = vmul.f32 %v4234_v14, %v4177_v63 }
 0x171   : > { %v1079_v29 = vadd.f32 0.008332557, %v1047_v13  ;;  %v1078_v46 = vadd.f32 0.008332557, %v1046_v35  ;;  %v960_v55 = vadd.f32 2.704004e-06, %v928_v11  ;;  %v1101_v57 = vmul.f32 %v4242_v5, %v4195_v41 }
 0x172   : > { %v1080_v39 = vadd.f32 0.008332557, %v1048_v62  ;;  %v1053_v8 = vmul.f32 %v1021_v1, %v4284_v53  ;;  %v1055_v23 = vmul.f32 %v1023_v15, %v4288_v4  ;;  %v1022_v7 = vadd.f32 -0.00019812536, %v990_v17 }
 0x173   : > { %v1071_v45 = vadd.f32 0.008332557, %v4239_v59  ;;  %v1070_v44 = vadd.f32 0.008332557, %v4248_v2  ;;  %v1110_v36 = vmul.f32 %v1078_v46, %v4270_v6  ;;  %v992_v24 = vmul.f32 %v960_v55, %v4309_v47 }
 0x174   : > { %v1072_v48 = vadd.f32 0.008332557, %v1040_v25  ;;  %v1085_v26 = vadd.f32 0.008332557, %v1053_v8  ;;  %v1087_v14 = vadd.f32 0.008332557, %v1055_v23  ;;  %v1054_v13 = vmul.f32 %v1022_v7, %v4298_v50 }
 0x175   : > { %v1109_v35 = vmul.f32 %v1077_v58, %v4256_v37  ;;  %v1112_v11 = vmul.f32 %v1080_v39, %v4274_v60  ;;  %v1024_v62 = vadd.f32 -0.00019812536, %v992_v24  ;;  %v1111_v59 = vmul.f32 %v1079_v29, %v4260_v38  ;;  %v4342_v29 = vld [vmem:[%s5649_s2] sm:$0xff] }
 0x176   : > { %v1117_v2 = vmul.f32 %v1085_v26, %v4284_v53  ;;  %v1119_v1 = vmul.f32 %v1087_v14, %v4288_v4  ;;  %v1086_v15 = vadd.f32 0.008332557, %v1054_v13  ;;  %v1126_v25 = vadd.f32 -0.16666576, %v4245_v56  ;;  %3542 = vmatmul.mubr.msk.f32.vlgmr.msra.gmra.mxu0 %vm1277_vm1, %v4342_v29  ;;  %3546 = vmatmul.mubr.msk.f32.vlgmr.msra.gmra.mxu1 %vm1277_vm1, %v4342_v29 }
 0x177   : > { %v1102_v17 = vmul.f32 %v1070_v44, %v4209_v16  ;;  %v1142_v46 = vadd.f32 -0.16666576, %v1110_v36  ;;  %v1056_v55 = vmul.f32 %v1024_v62, %v4309_v47  ;;  %v1104_v5 = vmul.f32 %v1072_v48, %v4220_v3  ;;  %v4351_v62 = vld [vmem:[%s5649_s2 + $0x8] sm:$0xff]  ;;  %1360 = vmatprep.mubr.f32.mxu0 %v5658_v0  ;;  %1449 = vmatprep.mubr.f32.mxu1 %v5658_v0 }
 0x178   : > { %v1149_v58 = vadd.f32 -0.16666576, %v1117_v2  ;;  %v1151_v8 = vadd.f32 -0.16666576, %v1119_v1  ;;  %v1118_v39 = vmul.f32 %v1086_v15, %v4298_v50  ;;  %v1133_v23 = vadd.f32 -0.16666576, %v1101_v57 }
 0x179   : > { %v1103_v7 = vmul.f32 %v1071_v45, %v4203_v27  ;;  %v1144_v56 = vadd.f32 -0.16666576, %v1112_v11  ;;  %v1088_v24 = vadd.f32 0.008332557, %v1056_v55  ;;  %v1141_v44 = vadd.f32 -0.16666576, %v1109_v35 }
 0x17a   : > { %v1143_v36 = vadd.f32 -0.16666576, %v1111_v59  ;;  %v1181_v26 = vmul.f32 %v1149_v58, %v4284_v53  ;;  %v1150_v14 = vadd.f32 -0.16666576, %v1118_v39  ;;  %v1174_v48 = vmul.f32 %v1142_v46, %v4270_v6  ;;  %v1254_v6 = vld [vmem:[%s5650_s3 + $0x8] sm:$0xff]  ;;  %v1256_v53 = vld [vmem:[%s5650_s3 + $0x18] sm:$0xff]  ;;  %3543 = vmatmul.mubr.msk.f32.gmra.mxu0 %vm1277_vm1, %v4351_v62  ;;  %3547 = vmatmul.mubr.msk.f32.gmra.mxu1 %vm1277_vm1, %v4351_v62 }
 0x17b   : > { %v1120_v13 = vmul.f32 %v1088_v24, %v4309_v47  ;;  %v1134_v57 = vadd.f32 -0.16666576, %v1102_v17  ;;  %v1136_v2 = vadd.f32 -0.16666576, %v1104_v5  ;;  %v1183_v45 = vmul.f32 %v1151_v8, %v4288_v4  ;;  %1366 = vmatprep.mubr.f32.mxu0 %v5658_v0  ;;  %1455 = vmatprep.mubr.f32.mxu1 %v5658_v0 }
 0x17c   : > { %v1182_v35 = vmul.f32 %v1150_v14, %v4298_v50  ;;  %v1135_v11 = vadd.f32 -0.16666576, %v1103_v7  ;;  %v1176_v59 = vmul.f32 %v1144_v56, %v4274_v60  ;;  %v1213_v4 = vadd.f32 0.9999997, %v1181_v26 }
 0x17d   : > { %v1152_v1 = vadd.f32 -0.16666576, %v1120_v13  ;;  %v1128_v50 = vadd.f32 -0.16666576, %v1096_v49  ;;  %v1173_v15 = vmul.f32 %v1141_v44, %v4256_v37  ;;  %v1175_v17 = vmul.f32 %v1143_v36, %v4260_v38 }
 0x17e   : > { %v1214_v46 = vadd.f32 0.9999997, %v1182_v35  ;;  %v3731_v55 = vmov 0   ;;  %v1127_v5 = vadd.f32 -0.16666576, %v4232_v51  ;;  %v1165_v58 = vmul.f32 %v1133_v23, %v4195_v41  ;;  %v1253_v41 = vld [vmem:[%s5650_s3] sm:$0xff] }
 0x17f   : > { %3634 = vset.pattern.permute.xlu1 %v3731_v55  ;;  %3633 = vset.pattern.permute.xlu0 %v3731_v55  ;;  %v1206_v60 = vadd.f32 0.9999997, %v1174_v48  ;;  %v1184_v8 = vmul.f32 %v1152_v1, %v4309_v47  ;;  %v1166_v39 = vmul.f32 %v1134_v57, %v4209_v16  ;;  %v1168_v49 = vmul.f32 %v1136_v2, %v4220_v3  ;;  %v4390_v3 = vld [vmem:[%s5649_s2 + $0x10] sm:$0xff] }
 0x180   : > { %1264 = vperm.xlu1 %3634, %v1254_v6   ;;  %1274 = vperm.xlu0 %3633, %v1256_v53   ;;  %v1215_v37 = vadd.f32 0.9999997, %v1183_v45  ;;  %v1246_v38 = vmul.f32 %v1214_v46, %v4290_v18  ;;  %v1167_v51 = vmul.f32 %v1135_v11, %v4203_v27  ;;  %v1208_v47 = vadd.f32 0.9999997, %v1176_v59 }
 0x181   : > { %v1245_v16 = vmul.f32 %v1213_v4, %v4276_v10  ;;  %v1216_v23 = vadd.f32 0.9999997, %v1184_v8  ;;  %v1158_v18 = vmul.f32 %v1126_v25, %v4172_v43  ;;  %v1160_v7 = vmul.f32 %v1128_v50, %v4177_v63  ;;  %3544 = vmatmul.mubr.msk.f32.gmra.mxu0 %vm1277_vm1, %v4390_v3  ;;  %3548 = vmatmul.mubr.msk.f32.gmra.mxu1 %vm1277_vm1, %v4390_v3 }
 0x182   : > { %v1205_v56 = vadd.f32 0.9999997, %v1173_v15  ;;  %v1207_v24 = vadd.f32 0.9999997, %v1175_v17  ;;  %1492 = vmatprep.subr.mxu0 %v1246_v38  ;;  %v1157_v27 = vmul.f32 %v4236_v52, %v4156_v31  ;;  %v1238_v10 = vmul.f32 %v1206_v60, %v4262_v32  ;;  %1372 = vmatprep.mubr.f32.mxu0 %v5658_v0 }
 0x183   : > { %v1248_v44 = vmul.f32 %v1216_v23, %v4301_v34  ;;  %1493 = vmatpush1.msra.mxu0 %v1245_v16  ;;  %v1159_v36 = vmul.f32 %v1127_v5, %v4160_v33  ;;  %v1198_v26 = vadd.f32 0.9999997, %v1166_v39  ;;  %v1200_v14 = vadd.f32 0.9999997, %v1168_v49  ;;  %1461 = vmatprep.mubr.f32.mxu1 %v5658_v0 }
 0x184   : > { %1259 = vperm.xlu1 %3634, %v1253_v41   ;;  %v1247_v43 = vmul.f32 %v1215_v37, %v4278_v30  ;;  %v1197_v63 = vadd.f32 0.9999997, %v1165_v58  ;;  %v1199_v31 = vadd.f32 0.9999997, %v1167_v51  ;;  %v1240_v52 = vmul.f32 %v1208_v47, %v4264_v9  ;;  %1494 = vmatprep.subr.mxu0 %v1238_v10  ;;  %v1252_v30 = vld [vmem:[%s5649_s2 + $0x18] sm:$0xff] }
 0x185   : > { %1581 = vmatprep.subr.mxu1 %v1248_v44  ;;  %v1190_v32 = vadd.f32 0.9999997, %v1158_v18  ;;  %v1192_v34 = vadd.f32 0.9999997, %v1160_v7  ;;  %v1237_v33 = vmul.f32 %v1205_v56, %v4250_v22  ;;  %v1239_v25 = vmul.f32 %v1207_v24, %v4252_v40  ;;  %3545 = vmatmul.mubr.msk.f32.gmra.mxu0 %vm1277_vm1, %v1252_v30 }
 0x186   : > { %1582 = vmatpush1.msra.mxu1 %v1247_v43  ;;  %v1189_v48 = vadd.f32 0.9999997, %v1157_v27  ;;  %v1191_v9 = vadd.f32 0.9999997, %v1159_v36  ;;  %v1230_v13 = vmul.f32 %v1198_v26, %v4198_v42  ;;  %v1232_v57 = vmul.f32 %v1200_v14, %v4212_v54  ;;  %1532 = vmatprep.mubr.f32.mxu0 %v5658_v0 }
 0x187   : > { %1583 = vmatprep.subr.mxu1 %v1240_v52  ;;  %1495 = vmatpush1.msra.mxu0 %v1237_v33  ;;  %v1229_v22 = vmul.f32 %v1197_v63, %v4179_v28  ;;  %v1231_v40 = vmul.f32 %v1199_v31, %v4181_v12  ;;  %v1222_v2 = vmul.f32 %v1190_v32, %v4163_v20  ;;  %v1255_v20 = vld [vmem:[%s5650_s3 + $0x10] sm:$0xff]  ;;  %v2195_v28 = vld [vmem:[%s5652_s5 + $0x8] sm:$0xff]  ;;  %v3131_v12 = vld [vmem:[%s5654_s7] sm:$0xff] }
 0x188   : > { %1584 = vmatpush1.msra.mxu1 %v1239_v25  ;;  %v1224_v45 = vmul.f32 %v1192_v34, %v4165_v61  ;;  %1496 = vmatprep.subr.mxu0 %v1230_v13  ;;  %v1221_v42 = vmul.f32 %v1189_v48, %v4150_v19  ;;  %v1223_v54 = vmul.f32 %v1191_v9, %v4152_v21  ;;  %v2196_v19 = vld [vmem:[%s5652_s5 + $0x10] sm:$0xff]  ;;  %v2197_v21 = vld [vmem:[%s5652_s5 + $0x18] sm:$0xff]  ;;  %v2194_v61 = vld [vmem:[%s5652_s5] sm:$0xff] }
 0x189   : > { %3549 = vmatmul.mubr.msk.f32.gmra.mxu1 %vm1277_vm1, %v1252_v30  ;;  %1585 = vmatprep.subr.mxu1 %v1232_v57 }
 0x18a   : > { %1497 = vmatpush1.msra.mxu0 %v1229_v22  ;;  %1586 = vmatpush1.msra.mxu1 %v1231_v40 }
 0x18b   : > { %1498 = vmatprep.subr.mxu0 %v1222_v2  ;;  %1587 = vmatprep.subr.mxu1 %v1224_v45 }
 0x18c   : > { %1499 = vmatpush1.msra.mxu0 %v1221_v42  ;;  %1588 = vmatpush1.msra.mxu1 %v1223_v54 }
 0x18d   : > { %1621 = vmatprep.mubr.f32.mxu1 %v5658_v0  ;;  %3550 = vmatmul.mubr.msk.f32.vlgmr.msra.gmra.mxu0 %vm1277_vm1, %v4342_v29 }
 0x18e   : > { %3554 = vmatmul.mubr.msk.f32.vlgmr.msra.gmra.mxu1 %vm1277_vm1, %v4342_v29  ;;  %1538 = vmatprep.mubr.f32.mxu0 %v5658_v0 }
 0x18f   : > { %1627 = vmatprep.mubr.f32.mxu1 %v5658_v0  ;;  %1269 = vperm.xlu0 %3633, %v1255_v20  }
 0x190   : > { %2210 = vperm.xlu1 %3634, %v2196_v19  }
 0x191   : > { %3551 = vmatmul.mubr.msk.f32.gmra.mxu0 %vm1277_vm1, %v4351_v62 }
 0x192   : > { %3555 = vmatmul.mubr.msk.f32.gmra.mxu1 %vm1277_vm1, %v4351_v62  ;;  %1544 = vmatprep.mubr.f32.mxu0 %v5658_v0 }
 0x193   : > { %1633 = vmatprep.mubr.f32.mxu1 %v5658_v0  ;;  %2215 = vperm.xlu0 %3633, %v2197_v21  }
 0x194   : > { %2200 = vperm.xlu1 %3634, %v2194_v61  }
 0x195   : > { %3552 = vmatmul.mubr.msk.f32.gmra.mxu0 %vm1277_vm1, %v4390_v3 }
 0x196   : > { %3556 = vmatmul.mubr.msk.f32.gmra.mxu1 %vm1277_vm1, %v4390_v3  ;;  %1550 = vmatprep.mubr.f32.mxu0 %v5658_v0 }
 0x197   : > { %1639 = vmatprep.mubr.f32.mxu1 %v5658_v0  ;;  %2205 = vperm.xlu0 %3633, %v2195_v28  }
 0x199   : > { %3553 = vmatmul.mubr.msk.f32.gmra.mxu0 %vm1277_vm1, %v1252_v30 }
 0x19a   : > { %3557 = vmatmul.mubr.msk.f32.gmra.mxu1 %vm1277_vm1, %v1252_v30  ;;  %2294 = vmatprep.mubr.f32.mxu0 %v5658_v0 }
 0x19b   : > { %2383 = vmatprep.mubr.f32.mxu1 %v5658_v0  ;;  %3134 = vperm.xlu0 %3633, %v3131_v12  }
 0x1fb   : > { %v4464_v29 = vpop.permute.xlu1 %1264  ;;  %v4475_v16 = vpop.permute.xlu0 %1274 }
 0x1ff   : > { %v4466_v62 = vpop.permute.xlu1 %1259 }
 0x20a   : > { %v4502_v25 = vpop.permute.xlu0 %1269 }
 0x236   : > { %v1356_v35 = vpop.f32.mrf.mxu0  ;;  %v1445_v6 = vpop.f32.mrf.mxu1 }
 0x237   : > { %v1357_v53 = vadd.f32 %v1356_v35, %v4466_v62  ;;  %v1446_v11 = vadd.f32 %v1445_v6, %v4466_v62 }
 0x238   : > { %v1358_v59 = vpop.f32.mrf.mxu0  ;;  %v1447_v4 = vpop.f32.mrf.mxu1 }
 0x239   : > { %v1646_v1 = vmul.f32 0.15915494, %v1357_v53  ;;  %v1648_v50 = vmul.f32 0.15915494, %v1446_v11  ;;  %v4473_v41 = vadd.f32 %v1358_v59, %v4466_v62  ;;  %v4478_v23 = vadd.f32 %v1447_v4, %v4466_v62 }
 0x23a   : > { %v1362_v15 = vpop.f32.mrf.mxu0  ;;  %v1451_v17 = vpop.f32.mrf.mxu1 }
 0x23b   : > { %v1678_v46 = vadd.f32 0.5, %v1646_v1  ;;  %v1680_v55 = vadd.f32 0.5, %v1648_v50  ;;  %v1363_v5 = vadd.f32 %v1362_v15, %v4464_v29  ;;  %v1452_v58 = vadd.f32 %v1451_v17, %v4464_v29 }
 0x23c   : > { %v1364_v51 = vpop.f32.mrf.mxu0  ;;  %v1453_v47 = vpop.f32.mrf.mxu1  ;;  %v1647_v14 = vmul.f32 0.15915494, %v4473_v41  ;;  %v1649_v43 = vmul.f32 0.15915494, %v4478_v23 }
 0x23d   : > { %v1710_v60 = vfloor.f32 %v1678_v46  ;;  %v1712_v8 = vfloor.f32 %v1680_v55  ;;  %v1654_v39 = vmul.f32 0.15915494, %v1363_v5  ;;  %v1656_v49 = vmul.f32 0.15915494, %v1452_v58 }
 0x23e   : > { %v4485_v10 = vadd.f32 %v1364_v51, %v4464_v29  ;;  %v4488_v44 = vadd.f32 %v1453_v47, %v4464_v29  ;;  %v1679_v45 = vadd.f32 0.5, %v1647_v14  ;;  %v1681_v42 = vadd.f32 0.5, %v1649_v43 }
 0x23f   : > { %v1742_v37 = vmul.f32 6.2831855, %v1710_v60  ;;  %v1744_v38 = vmul.f32 6.2831855, %v1712_v8  ;;  %v1686_v3 = vadd.f32 0.5, %v1654_v39  ;;  %v1688_v18 = vadd.f32 0.5, %v1656_v49 }
 0x240   : > { %v1655_v9 = vmul.f32 0.15915494, %v4485_v10  ;;  %v1657_v13 = vmul.f32 0.15915494, %v4488_v44  ;;  %v1711_v49 = vfloor.f32 %v1679_v45 }
 0x241   : > { %v4480_v7 = vsub.f32 %v1357_v53, %v1742_v37  ;;  %v4482_v56 = vsub.f32 %v1446_v11, %v1744_v38  ;;  %v1718_v24 = vfloor.f32 %v1686_v3  ;;  %v1720_v27 = vfloor.f32 %v1688_v18  ;;  %v1368_v52 = vpop.f32.mrf.mxu0  ;;  %v1457_v32 = vpop.f32.mrf.mxu1 }
 0x242   : > { %v1369_v40 = vadd.f32 %v1368_v52, %v4502_v25  ;;  %v1458_v2 = vadd.f32 %v1457_v32, %v4502_v25  ;;  %v1687_v11 = vadd.f32 0.5, %v1655_v9  ;;  %v1689_v59 = vadd.f32 0.5, %v1657_v13 }
 0x243   : > { %v4492_v36 = vmul.f32 %v4480_v7, %v4480_v7  ;;  %v4496_v26 = vmul.f32 %v4482_v56, %v4482_v56  ;;  %v1750_v63 = vmul.f32 6.2831855, %v1718_v24  ;;  %v1752_v31 = vmul.f32 6.2831855, %v1720_v27  ;;  %v1370_v12 = vpop.f32.mrf.mxu0  ;;  %v1459_v35 = vpop.f32.mrf.mxu1 }
 0x244   : > { %v1662_v61 = vmul.f32 0.15915494, %v1369_v40  ;;  %v1664_v28 = vmul.f32 0.15915494, %v1458_v2  ;;  %v4525_v55 = vadd.f32 %v1370_v12, %v4502_v25  ;;  %v1713_v3 = vfloor.f32 %v1681_v42 }
 0x245   : > { %v1838_v34 = vmul.f32 -2.0532243e-08, %v4492_v36  ;;  %v1840_v33 = vmul.f32 -2.0532243e-08, %v4496_v26  ;;  %v4504_v30 = vsub.f32 %v1363_v5, %v1750_v63  ;;  %v4506_v48 = vsub.f32 %v1452_v58, %v1752_v31 }
 0x246   : > { %v1694_v50 = vadd.f32 0.5, %v1662_v61  ;;  %v1696_v15 = vadd.f32 0.5, %v1664_v28  ;;  %v4528_v5 = vadd.f32 %v1459_v35, %v4502_v25  ;;  %v1719_v27 = vfloor.f32 %v1687_v11 }
 0x247   : > { %v1870_v57 = vadd.f32 2.704004e-06, %v1838_v34  ;;  %v1872_v22 = vadd.f32 2.704004e-06, %v1840_v33  ;;  %v4514_v54 = vmul.f32 %v4504_v30, %v4504_v30  ;;  %v4518_v20 = vmul.f32 %v4506_v48, %v4506_v48 }
 0x248   : > { %v1726_v8 = vfloor.f32 %v1694_v50  ;;  %v1728_v39 = vfloor.f32 %v1696_v15  ;;  %v1663_v43 = vmul.f32 0.15915494, %v4525_v55  ;;  %v1721_v31 = vfloor.f32 %v1689_v59 }
 0x249   : > { %v1902_v19 = vmul.f32 %v1870_v57, %v4492_v36  ;;  %v1904_v21 = vmul.f32 %v1872_v22, %v4496_v26  ;;  %v1846_v6 = vmul.f32 -2.0532243e-08, %v4514_v54  ;;  %v1848_v53 = vmul.f32 -2.0532243e-08, %v4518_v20  ;;  %v1463_v61 = vpop.f32.mrf.mxu1 }
 0x24a   : > { %v1758_v18 = vmul.f32 6.2831855, %v1726_v8  ;;  %v1760_v14 = vmul.f32 6.2831855, %v1728_v39  ;;  %v1665_v32 = vmul.f32 0.15915494, %v4528_v5  ;;  %v1464_v15 = vadd.f32 %v1463_v61, %v4475_v16 }
 0x24b   : > { %v1934_v4 = vadd.f32 -0.00019812536, %v1902_v19  ;;  %v1936_v1 = vadd.f32 -0.00019812536, %v1904_v21  ;;  %v1878_v17 = vadd.f32 2.704004e-06, %v1846_v6  ;;  %v1374_v21 = vpop.f32.mrf.mxu0 }
 0x24c   : > { %v1880_v46 = vadd.f32 2.704004e-06, %v1848_v53  ;;  %v4535_v52 = vsub.f32 %v1369_v40, %v1758_v18  ;;  %v1743_v33 = vmul.f32 6.2831855, %v1711_v49  ;;  %v4540_v13 = vsub.f32 %v1458_v2, %v1760_v14  ;;  %v1465_v49 = vpop.f32.mrf.mxu1 }
 0x24d   : > { %v1966_v58 = vmul.f32 %v1934_v4, %v4492_v36  ;;  %v1968_v60 = vmul.f32 %v1936_v1, %v4496_v26  ;;  %v1910_v37 = vmul.f32 %v1878_v17, %v4514_v54  ;;  %v1745_v45 = vmul.f32 6.2831855, %v1713_v3  ;;  %v1376_v39 = vpop.f32.mrf.mxu0 }
 0x24e   : > { %v1912_v38 = vmul.f32 %v1880_v46, %v4518_v20  ;;  %v4545_v22 = vmul.f32 %v4535_v52, %v4535_v52  ;;  %v1751_v42 = vmul.f32 6.2831855, %v1719_v27  ;;  %v4549_v40 = vmul.f32 %v4540_v13, %v4540_v13 }
 0x24f   : > { %v1998_v51 = vadd.f32 0.008332557, %v1966_v58  ;;  %v2000_v47 = vadd.f32 0.008332557, %v1968_v60  ;;  %v1942_v24 = vadd.f32 -0.00019812536, %v1910_v37  ;;  %v4554_v53 = vsub.f32 %v4473_v41, %v1743_v33 }
 0x250   : > { %v1944_v63 = vadd.f32 -0.00019812536, %v1912_v38  ;;  %v1695_v19 = vadd.f32 0.5, %v1663_v43  ;;  %v1753_v12 = vmul.f32 6.2831855, %v1721_v31  ;;  %v1697_v35 = vadd.f32 0.5, %v1665_v32  ;;  %v1534_v31 = vpop.f32.mrf.mxu0  ;;  %v1623_v32 = vpop.f32.mrf.mxu1 }
 0x251   : > { %v2030_v34 = vmul.f32 %v1998_v51, %v4492_v36  ;;  %v1974_v9 = vmul.f32 %v1942_v24, %v4514_v54  ;;  %v2032_v57 = vmul.f32 %v2000_v47, %v4496_v26  ;;  %v1854_v2 = vmul.f32 -2.0532243e-08, %v4545_v22 }
 0x252   : > { %v1976_v28 = vmul.f32 %v1944_v63, %v4518_v20  ;;  %v1856_v59 = vmul.f32 -2.0532243e-08, %v4549_v40  ;;  %v1375_v50 = vadd.f32 %v1374_v21, %v4475_v16  ;;  %v4560_v17 = vsub.f32 %v4478_v23, %v1745_v45 }
 0x253   : > { %v2062_v6 = vadd.f32 -0.16666576, %v2030_v34  ;;  %v2006_v11 = vadd.f32 0.008332557, %v1974_v9  ;;  %v2064_v4 = vadd.f32 -0.16666576, %v2032_v57  ;;  %v4563_v46 = vsub.f32 %v4485_v10, %v1751_v42 }
 0x254   : > { %v1886_v1 = vadd.f32 2.704004e-06, %v1854_v2  ;;  %v1888_v58 = vadd.f32 2.704004e-06, %v1856_v59  ;;  %v1727_v60 = vfloor.f32 %v1695_v19  ;;  %v2008_v8 = vadd.f32 0.008332557, %v1976_v28 }
 0x255   : > { %v1729_v41 = vfloor.f32 %v1697_v35  ;;  %v2094_v37 = vmul.f32 %v2062_v6, %v4492_v36  ;;  %v2038_v38 = vmul.f32 %v2006_v11, %v4514_v54  ;;  %v4568_v51 = vsub.f32 %v4488_v44, %v1753_v12 }
 0x256   : > { %v1918_v47 = vmul.f32 %v1886_v1, %v4545_v22  ;;  %v2096_v23 = vmul.f32 %v2064_v4, %v4496_v26  ;;  %v4574_v10 = vmul.f32 %v4554_v53, %v4554_v53  ;;  %v1670_v3 = vmul.f32 0.15915494, %v1375_v50 }
 0x257   : > { %v1672_v18 = vmul.f32 0.15915494, %v1464_v15  ;;  %v4578_v24 = vmul.f32 %v4560_v17, %v4560_v17  ;;  %v4582_v36 = vmul.f32 %v4563_v46, %v4563_v46  ;;  %v1920_v44 = vmul.f32 %v1888_v58, %v4549_v40 }
 0x258   : > { %v1759_v27 = vmul.f32 6.2831855, %v1727_v60  ;;  %v2040_v14 = vmul.f32 %v2008_v8, %v4518_v20  ;;  %v1761_v26 = vmul.f32 6.2831855, %v1729_v41  ;;  %v1702_v43 = vadd.f32 0.5, %v1670_v3 }
 0x259   : > { %v1704_v63 = vadd.f32 0.5, %v1672_v18  ;;  %v2126_v34 = vadd.f32 0.9999997, %v2094_v37  ;;  %v2070_v33 = vadd.f32 -0.16666576, %v2038_v38  ;;  %v4588_v9 = vmul.f32 %v4568_v51, %v4568_v51 }
 0x25a   : > { %v1950_v57 = vadd.f32 -0.00019812536, %v1918_v47  ;;  %v2128_v45 = vadd.f32 0.9999997, %v2096_v23  ;;  %v1734_v42 = vfloor.f32 %v1702_v43  ;;  %v4591_v21 = vadd.f32 %v1376_v39, %v4475_v16  ;;  %v1536_v47 = vpop.f32.mrf.mxu0 }
 0x25b   : > { %v1736_v19 = vfloor.f32 %v1704_v63  ;;  %v1952_v61 = vadd.f32 -0.00019812536, %v1920_v44  ;;  %v4594_v28 = vsub.f32 %v4525_v55, %v1759_v27  ;;  %v1535_v12 = vadd.f32 %v1534_v31, %v4466_v62 }
 0x25c   : > { %v1624_v2 = vadd.f32 %v1623_v32, %v4466_v62  ;;  %v2072_v35 = vadd.f32 -0.16666576, %v2040_v14  ;;  %v1766_v6 = vmul.f32 6.2831855, %v1734_v42  ;;  %v4599_v59 = vadd.f32 %v1465_v49, %v4475_v16 }
 0x25d   : > { %v1768_v11 = vmul.f32 6.2831855, %v1736_v19  ;;  %v2102_v4 = vmul.f32 %v2070_v33, %v4514_v54  ;;  %v1982_v1 = vmul.f32 %v1950_v57, %v4545_v22  ;;  %v1650_v58 = vmul.f32 0.15915494, %v1535_v12  ;;  %v1540_v33 = vpop.f32.mrf.mxu0 }
 0x25e   : > { %v1652_v60 = vmul.f32 0.15915494, %v1624_v2  ;;  %v4604_v8 = vsub.f32 %v4528_v5, %v1761_v26  ;;  %v4606_v55 = vsub.f32 %v1375_v50, %v1766_v6  ;;  %v1671_v39 = vmul.f32 0.15915494, %v4591_v21 }
 0x25f   : > { %v4608_v41 = vsub.f32 %v1464_v15, %v1768_v11  ;;  %v4612_v37 = vmul.f32 %v2126_v34, %v4480_v7  ;;  %v1984_v49 = vmul.f32 %v1952_v61, %v4549_v40  ;;  %v1682_v38 = vadd.f32 0.5, %v1650_v58  ;;  %v1625_v7 = vpop.f32.mrf.mxu1 }
 0x260   : > { %v1684_v54 = vadd.f32 0.5, %v1652_v60  ;;  %v4616_v23 = vmul.f32 %v2128_v45, %v4482_v56  ;;  %v4620_v5 = vmul.f32 %v4606_v55, %v4606_v55  ;;  %v1673_v15 = vmul.f32 0.15915494, %v4599_v59 }
 0x261   : > { %v4624_v50 = vmul.f32 %v4608_v41, %v4608_v41  ;;  %v2134_v3 = vadd.f32 0.9999997, %v2102_v4  ;;  %v2014_v18 = vadd.f32 0.008332557, %v1982_v1  ;;  %v1714_v44 = vfloor.f32 %v1682_v38  ;;  %v1629_v61 = vpop.f32.mrf.mxu1 }
 0x262   : > { %v1716_v27 = vfloor.f32 %v1684_v54  ;;  %v4629_v14 = vmul.f32 %v4594_v28, %v4594_v28  ;;  %v1862_v56 = vmul.f32 -2.0532243e-08, %v4620_v5  ;;  %v1703_v43 = vadd.f32 0.5, %v1671_v39 }
 0x263   : > { %v1864_v26 = vmul.f32 -2.0532243e-08, %v4624_v50  ;;  %v2104_v63 = vmul.f32 %v2072_v35, %v4518_v20  ;;  %v2016_v31 = vadd.f32 0.008332557, %v1984_v49  ;;  %v1746_v32 = vmul.f32 6.2831855, %v1714_v44 }
 0x264   : > { %v1748_v34 = vmul.f32 6.2831855, %v1716_v27  ;;  %v1894_v57 = vadd.f32 2.704004e-06, %v1862_v56  ;;  %v1705_v42 = vadd.f32 0.5, %v1673_v15  ;;  %v4635_v19 = vadd.f32 %v1536_v47, %v4466_v62 }
 0x265   : > { %v1896_v45 = vadd.f32 2.704004e-06, %v1864_v26  ;;  %v2046_v6 = vmul.f32 %v2014_v18, %v4545_v22  ;;  %v4638_v11 = vsub.f32 %v1535_v12, %v1746_v32  ;;  %v4643_v1 = vadd.f32 %v1625_v7, %v4466_v62 }
 0x266   : > { %v4640_v4 = vsub.f32 %v1624_v2, %v1748_v34  ;;  %v1926_v20 = vmul.f32 %v1894_v57, %v4620_v5  ;;  %v1651_v58 = vmul.f32 0.15915494, %v4635_v19  ;;  %v1541_v60 = vadd.f32 %v1540_v33, %v4464_v29 }
 0x267   : > { %5696 = vst [vmem:[#allocation9_spill] sm:$0xff] %v4638_v11  ;;  %v1928_v35 = vmul.f32 %v1896_v45, %v4624_v50  ;;  %v4651_v39 = vmul.f32 %v4638_v11, %v4638_v11  ;;  %v1653_v2 = vmul.f32 0.15915494, %v4643_v1  ;;  %v1630_v62 = vadd.f32 %v1629_v61, %v4464_v29 }
 0x268   : > { %5697 = vst [vmem:[#allocation10_spill] sm:$0xff] %v4640_v4  ;;  %v4655_v12 = vmul.f32 %v4640_v4, %v4640_v4  ;;  %v2048_v49 = vmul.f32 %v2016_v31, %v4549_v40  ;;  %v1958_v38 = vadd.f32 -0.00019812536, %v1926_v20  ;;  %v1735_v47 = vfloor.f32 %v1703_v43 }
 0x269   : > { %5698 = vst [vmem:[#allocation11_spill] sm:$0xff] %v4651_v39  ;;  %v1960_v54 = vadd.f32 -0.00019812536, %v1928_v35  ;;  %v2136_v15 = vadd.f32 0.9999997, %v2104_v63  ;;  %v1737_v7 = vfloor.f32 %v1705_v42  ;;  %v1683_v33 = vadd.f32 0.5, %v1651_v58 }
 0x26a   : > { %5699 = vst [vmem:[#allocation12_spill] sm:$0xff] %v4655_v12  ;;  %v1842_v18 = vmul.f32 -2.0532243e-08, %v4651_v39  ;;  %v1844_v44 = vmul.f32 -2.0532243e-08, %v4655_v12  ;;  %v1990_v56 = vmul.f32 %v1958_v38, %v4620_v5  ;;  %v1685_v57 = vadd.f32 0.5, %v1653_v2  ;;  %v1542_v38 = vpop.f32.mrf.mxu0 }
 0x26b   : > { %v2078_v27 = vadd.f32 -0.16666576, %v2046_v6  ;;  %v1992_v26 = vmul.f32 %v1960_v54, %v4624_v50  ;;  %v1658_v32 = vmul.f32 0.15915494, %v1541_v60  ;;  %v1660_v45 = vmul.f32 0.15915494, %v1630_v62 }
 0x26c   : > { %v1874_v34 = vadd.f32 2.704004e-06, %v1842_v18  ;;  %v2080_v31 = vadd.f32 -0.16666576, %v2048_v49  ;;  %v4666_v43 = vmul.f32 %v4604_v8, %v4604_v8  ;;  %v1767_v63 = vmul.f32 6.2831855, %v1735_v47 }
 0x26d   : > { %v1876_v42 = vadd.f32 2.704004e-06, %v1844_v44  ;;  %v4669_v61 = vmul.f32 %v2134_v3, %v4504_v30  ;;  %v2022_v6 = vadd.f32 0.008332557, %v1990_v56  ;;  %v2024_v20 = vadd.f32 0.008332557, %v1992_v26  ;;  %v1631_v44 = vpop.f32.mrf.mxu1 }
 0x26e   : > { %v1690_v35 = vadd.f32 0.5, %v1658_v32  ;;  %v4672_v54 = vmul.f32 %v2136_v15, %v4506_v48  ;;  %v2110_v58 = vmul.f32 %v2078_v27, %v4545_v22  ;;  %v1769_v2 = vmul.f32 6.2831855, %v1737_v7  ;;  %v1546_v27 = vpop.f32.mrf.mxu0 }
 0x26f   : > { %v1692_v49 = vadd.f32 0.5, %v1660_v45  ;;  %v1906_v18 = vmul.f32 %v1874_v34, %v4651_v39  ;;  %v1715_v0 = vfloor.f32 %v1683_v33  ;;  %v1717_v4 = vfloor.f32 %v1685_v57 }
 0x270   : > { %v1722_v47 = vfloor.f32 %v1690_v35  ;;  %v2112_v30 = vmul.f32 %v2080_v31, %v4549_v40  ;;  %v4678_v3 = vsub.f32 %v4591_v21, %v1767_v63  ;;  %v1908_v56 = vmul.f32 %v1876_v42, %v4655_v12 }
 0x271   : > { %v1724_v26 = vfloor.f32 %v1692_v49  ;;  %v2054_v48 = vmul.f32 %v2022_v6, %v4620_v5  ;;  %v2056_v22 = vmul.f32 %v2024_v20, %v4624_v50  ;;  %v4684_v7 = vadd.f32 %v1542_v38, %v4464_v29 }
 0x272   : > { %v1754_v15 = vmul.f32 6.2831855, %v1722_v47  ;;  %v2142_v32 = vadd.f32 0.9999997, %v2110_v58  ;;  %v4687_v34 = vsub.f32 %v4599_v59, %v1769_v2  ;;  %v4690_v21 = vadd.f32 %v1631_v44, %v4464_v29  ;;  %v1635_v59 = vpop.f32.mrf.mxu1 }
 0x273   : > { %v1756_v40 = vmul.f32 6.2831855, %v1724_v26  ;;  %v1938_v33 = vadd.f32 -0.00019812536, %v1906_v18  ;;  %v1747_v57 = vmul.f32 6.2831855, %v1715_v0  ;;  %v4696_v63 = vmul.f32 %v4678_v3, %v4678_v3 }
 0x274   : > { %v1749_v45 = vmul.f32 6.2831855, %v1717_v4  ;;  %v4692_v31 = vsub.f32 %v1541_v60, %v1754_v15  ;;  %v1940_v42 = vadd.f32 -0.00019812536, %v1908_v56  ;;  %v1547_v20 = vadd.f32 %v1546_v27, %v4502_v25 }
 0x275   : > { %v4698_v6 = vsub.f32 %v1630_v62, %v1756_v40  ;;  %v2086_v35 = vadd.f32 -0.16666576, %v2054_v48  ;;  %v2088_v38 = vadd.f32 -0.16666576, %v2056_v22  ;;  %v1659_v0 = vmul.f32 0.15915494, %v4684_v7  ;;  %v1548_v48 = vpop.f32.mrf.mxu0  ;;  %v1637_v22 = vpop.f32.mrf.mxu1 }
 0x276   : > { %5700 = vst [vmem:[#allocation13_spill] sm:$0xff] %v4692_v31  ;;  %v4703_v29 = vmul.f32 %v4692_v31, %v4692_v31  ;;  %v2144_v4 = vadd.f32 0.9999997, %v2112_v30  ;;  %v4708_v60 = vmul.f32 %v4687_v34, %v4687_v34  ;;  %v1661_v58 = vmul.f32 0.15915494, %v4690_v21 }
 0x277   : > { %5701 = vst [vmem:[#allocation14_spill] sm:$0xff] %v4698_v6  ;;  %v4712_v62 = vmul.f32 %v4698_v6, %v4698_v6  ;;  %v1970_v2 = vmul.f32 %v1938_v33, %v4651_v39  ;;  %v4717_v49 = vsub.f32 %v4635_v19, %v1747_v57  ;;  %v4720_v18 = vsub.f32 %v4643_v1, %v1749_v45 }
 0x278   : > { %v1850_v47 = vmul.f32 -2.0532243e-08, %v4703_v29  ;;  %v1972_v44 = vmul.f32 %v1940_v42, %v4655_v12  ;;  %v1666_v56 = vmul.f32 0.15915494, %v1547_v20  ;;  %v1636_v26 = vadd.f32 %v1635_v59, %v4502_v25 }
 0x279   : > { %5702 = vst [vmem:[#allocation15_spill] sm:$0xff] %v4712_v62  ;;  %5703 = vst [vmem:[#allocation16_spill] sm:$0xff] %v4717_v49  ;;  %v1852_v30 = vmul.f32 -2.0532243e-08, %v4712_v62  ;;  %v2118_v15 = vmul.f32 %v2086_v35, %v4620_v5  ;;  %v2120_v27 = vmul.f32 %v2088_v38, %v4624_v50  ;;  %v1691_v40 = vadd.f32 0.5, %v1659_v0 }
 0x27a   : > { %5704 = vst [vmem:[#allocation17_spill] sm:$0xff] %v4720_v18  ;;  %v1882_v19 = vadd.f32 2.704004e-06, %v1850_v47  ;;  %v4729_v1 = vmul.f32 %v2142_v32, %v4535_v52  ;;  %v1693_v33 = vadd.f32 0.5, %v1661_v58  ;;  %v1698_v57 = vadd.f32 0.5, %v1666_v56  ;;  %v1552_v32 = vpop.f32.mrf.mxu0  ;;  %v1641_v58 = vpop.f32.mrf.mxu1 }
 0x27b   : > { %v1668_v45 = vmul.f32 0.15915494, %v1636_v26  ;;  %v4732_v42 = vmul.f32 %v2144_v4, %v4540_v13  ;;  %v4736_v59 = vmul.f32 %v4717_v49, %v4717_v49  ;;  %v4740_v5 = vmul.f32 %v4720_v18, %v4720_v18 }
 0x27c   : > { %v1884_v50 = vadd.f32 2.704004e-06, %v1852_v30  ;;  %v2002_v35 = vadd.f32 0.008332557, %v1970_v2  ;;  %v2004_v38 = vadd.f32 0.008332557, %v1972_v44  ;;  %v1730_v0 = vfloor.f32 %v1698_v57 }
 0x27d   : > { %v1700_v52 = vadd.f32 0.5, %v1668_v45  ;;  %v2150_v47 = vadd.f32 0.9999997, %v2118_v15  ;;  %v2152_v56 = vadd.f32 0.9999997, %v2120_v27  ;;  %v1914_v13 = vmul.f32 %v1882_v19, %v4703_v29 }
 0x27e   : > { %v1723_v4 = vfloor.f32 %v1691_v40  ;;  %v1725_v11 = vfloor.f32 %v1693_v33  ;;  %v1762_v6 = vmul.f32 6.2831855, %v1730_v0  ;;  %v4744_v31 = vadd.f32 %v1548_v48, %v4502_v25 }
 0x27f   : > { %v1732_v49 = vfloor.f32 %v1700_v52  ;;  %v1916_v18 = vmul.f32 %v1884_v50, %v4712_v62  ;;  %v4748_v2 = vadd.f32 %v1637_v22, %v4502_v25  ;;  %v1553_v44 = vadd.f32 %v1552_v32, %v4475_v16 }
 0x280   : > { %v1642_v30 = vadd.f32 %v1641_v58, %v4475_v16  ;;  %v2034_v15 = vmul.f32 %v2002_v35, %v4651_v39  ;;  %v4753_v27 = vsub.f32 %v1547_v20, %v1762_v6  ;;  %v1667_v40 = vmul.f32 0.15915494, %v4744_v31 }
 0x281   : > { %v1764_v19 = vmul.f32 6.2831855, %v1732_v49  ;;  %v4757_v33 = vmul.f32 %v2004_v38, %v4655_v12  ;;  %v1946_v48 = vadd.f32 -0.00019812536, %v1914_v13  ;;  %v1669_v57 = vmul.f32 0.15915494, %v4748_v2 }
 0x282   : > { %5705 = vst [vmem:[#allocation18_spill] sm:$0xff] %v4753_v27  ;;  %v1674_v45 = vmul.f32 0.15915494, %v1553_v44  ;;  %v1755_v25 = vmul.f32 6.2831855, %v1723_v4  ;;  %v4762_v50 = vmul.f32 %v4753_v27, %v4753_v27  ;;  %v1699_v20 = vadd.f32 0.5, %v1667_v40  ;;  %v1554_v40 = vpop.f32.mrf.mxu0 }
 0x283   : > { %5706 = vst [vmem:[#allocation19_spill] sm:$0xff] %v4757_v33  ;;  %v1757_v22 = vmul.f32 6.2831855, %v1725_v11  ;;  %v4764_v0 = vsub.f32 %v1636_v26, %v1764_v19  ;;  %v1948_v6 = vadd.f32 -0.00019812536, %v1916_v18  ;;  %v4767_v52 = vmul.f32 %v2150_v47, %v4606_v55 }
 0x284   : > { %v1706_v49 = vadd.f32 0.5, %v1674_v45  ;;  %v1676_v35 = vmul.f32 0.15915494, %v1642_v30  ;;  %v1858_v38 = vmul.f32 -2.0532243e-08, %v4762_v50  ;;  %v1701_v11 = vadd.f32 0.5, %v1669_v57  ;;  %v1643_v45 = vpop.f32.mrf.mxu1 }
 0x285   : > { %5707 = vst [vmem:[#allocation20_spill] sm:$0xff] %v4764_v0  ;;  %v4772_v32 = vmul.f32 %v4764_v0, %v4764_v0  ;;  %v4775_v58 = vmul.f32 %v2152_v56, %v4608_v41  ;;  %v1978_v26 = vmul.f32 %v1946_v48, %v4703_v29  ;;  %v4778_v4 = vadd.f32 -0.16666576, %v2034_v15 }
 0x286   : > { %v1738_v13 = vfloor.f32 %v1706_v49  ;;  %v1708_v18 = vadd.f32 0.5, %v1676_v35  ;;  %v4781_v19 = vsub.f32 %v4684_v7, %v1755_v25  ;;  %v1890_v55 = vadd.f32 2.704004e-06, %v1858_v38 }
 0x287   : > { %5708 = vst [vmem:[#allocation21_spill] sm:$0xff] %v4778_v4  ;;  %v1860_v47 = vmul.f32 -2.0532243e-08, %v4772_v32  ;;  %v1980_v12 = vmul.f32 %v1948_v6, %v4712_v62  ;;  %v4786_v57 = vsub.f32 %v4690_v21, %v1757_v22  ;;  %v1731_v41 = vfloor.f32 %v1699_v20 }
 0x288   : > { %5709 = vst [vmem:[#allocation22_spill] sm:$0xff] %v4781_v19  ;;  %v1770_v56 = vmul.f32 6.2831855, %v1738_v13  ;;  %v1922_v48 = vmul.f32 %v1890_v55, %v4762_v50  ;;  %v1733_v15 = vfloor.f32 %v1701_v11  ;;  %v1740_v35 = vfloor.f32 %v1708_v18 }
 0x289   : > { %5710 = vst [vmem:[#allocation23_spill] sm:$0xff] %v4786_v57  ;;  %v1892_v49 = vadd.f32 2.704004e-06, %v1860_v47  ;;  %v2010_v4 = vadd.f32 0.008332557, %v1978_v26  ;;  %v1555_v25 = vadd.f32 %v1554_v40, %v4475_v16  ;;  %v4793_v38 = vadd.f32 %v1643_v45, %v4475_v16 }
 0x28a   : > { %v4789_v7 = vsub.f32 %v1553_v44, %v1770_v56  ;;  %v4797_v6 = vmul.f32 %v4781_v19, %v4781_v19  ;;  %v1954_v21 = vadd.f32 -0.00019812536, %v1922_v48  ;;  %v1772_v20 = vmul.f32 6.2831855, %v1740_v35 }
 0x28b   : > { %v1924_v22 = vmul.f32 %v1892_v49, %v4772_v32  ;;  %v2012_v13 = vadd.f32 0.008332557, %v1980_v12  ;;  %v4802_v11 = vmul.f32 %v4786_v57, %v4786_v57  ;;  %v1763_v44 = vmul.f32 6.2831855, %v1731_v41 }
 0x28c   : > { %v4806_v26 = vmul.f32 %v4789_v7, %v4789_v7  ;;  %v1986_v16 = vmul.f32 %v1954_v21, %v4762_v50  ;;  %v1765_v55 = vmul.f32 6.2831855, %v1733_v15  ;;  %v4809_v47 = vsub.f32 %v1642_v30, %v1772_v20 }
 0x28d   : > { %v1956_v18 = vadd.f32 -0.00019812536, %v1924_v22  ;;  %v2042_v40 = vmul.f32 %v2010_v4, %v4703_v29  ;;  %v1675_v12 = vmul.f32 0.15915494, %v1555_v25  ;;  %v1677_v56 = vmul.f32 0.15915494, %v4793_v38 }
 0x28e   : > { %v1866_v45 = vmul.f32 -2.0532243e-08, %v4806_v26  ;;  %v2018_v48 = vadd.f32 0.008332557, %v1986_v16  ;;  %v4817_v49 = vmul.f32 %v4809_v47, %v4809_v47  ;;  %v1863_v35 = vmul.f32 -2.0532243e-08, %v4696_v63 }
 0x28f   : > { %v1988_v41 = vmul.f32 %v1956_v18, %v4772_v32  ;;  %v1707_v15 = vadd.f32 0.5, %v1675_v12  ;;  %v1709_v30 = vadd.f32 0.5, %v1677_v56  ;;  %v1865_v22 = vmul.f32 -2.0532243e-08, %v4708_v60 }
 0x290   : > { %v1898_v21 = vadd.f32 2.704004e-06, %v1866_v45  ;;  %v2050_v4 = vmul.f32 %v2018_v48, %v4762_v50  ;;  %v1868_v57 = vmul.f32 -2.0532243e-08, %v4817_v49  ;;  %v1895_v19 = vadd.f32 2.704004e-06, %v1863_v35 }
 0x291   : > { %v2020_v20 = vadd.f32 0.008332557, %v1988_v41  ;;  %v2044_v16 = vmul.f32 %v2012_v13, %v4712_v62  ;;  %v1739_v39 = vfloor.f32 %v1707_v15  ;;  %v1897_v0 = vadd.f32 2.704004e-06, %v1865_v22 }
 0x292   : > { %v1930_v18 = vmul.f32 %v1898_v21, %v4806_v26  ;;  %v4826_v27 = vsub.f32 %v4744_v31, %v1763_v44  ;;  %v1900_v45 = vadd.f32 2.704004e-06, %v1868_v57  ;;  %v1741_v12 = vfloor.f32 %v1709_v30 }
 0x293   : > { %v1927_v56 = vmul.f32 %v1895_v19, %v4696_v63  ;;  %v2082_v33 = vadd.f32 -0.16666576, %v2050_v4  ;;  %v4830_v48 = vsub.f32 %v4748_v2, %v1765_v55  ;;  %v1929_v35 = vmul.f32 %v1897_v0, %v4708_v60 }
 0x294   : > { %v1962_v41 = vadd.f32 -0.00019812536, %v1930_v18  ;;  %v2052_v13 = vmul.f32 %v2020_v20, %v4772_v32  ;;  %v1932_v21 = vmul.f32 %v1900_v45, %v4817_v49  ;;  %v1771_v15 = vmul.f32 6.2831855, %v1739_v39 }
 0x295   : > { %v1959_v22 = vadd.f32 -0.00019812536, %v1927_v56  ;;  %v4835_v62 = vadd.f32 -0.16666576, %v2042_v40  ;;  %v4837_v31 = vadd.f32 -0.16666576, %v2044_v16  ;;  %v4842_v2 = vmul.f32 %v4826_v27, %v4826_v27 }
 0x296   : > { %v1994_v57 = vmul.f32 %v1962_v41, %v4806_v26  ;;  %v1961_v19 = vadd.f32 -0.00019812536, %v1929_v35  ;;  %v1964_v44 = vadd.f32 -0.00019812536, %v1932_v21  ;;  %v1773_v55 = vmul.f32 6.2831855, %v1741_v12 }
 0x297   : > { %v1991_v0 = vmul.f32 %v1959_v22, %v4696_v63  ;;  %v4846_v30 = vmul.f32 %v2082_v33, %v4762_v50  ;;  %v4850_v39 = vmul.f32 %v4830_v48, %v4830_v48  ;;  %v4853_v20 = vadd.f32 -0.16666576, %v2052_v13 }
 0x298   : > { %v2026_v40 = vadd.f32 0.008332557, %v1994_v57  ;;  %v1993_v4 = vmul.f32 %v1961_v19, %v4708_v60  ;;  %v1996_v16 = vmul.f32 %v1964_v44, %v4817_v49  ;;  %v4856_v18 = vsub.f32 %v1555_v25, %v1771_v15 }
 0x299   : > { %v2023_v45 = vadd.f32 0.008332557, %v1991_v0  ;;  %v1855_v33 = vmul.f32 -2.0532243e-08, %v4629_v14  ;;  %v1857_v50 = vmul.f32 -2.0532243e-08, %v4666_v43  ;;  %v4862_v35 = vsub.f32 %v4793_v38, %v1773_v55 }
 0x29a   : > { %v2058_v12 = vmul.f32 %v2026_v40, %v4806_v26  ;;  %v2025_v56 = vadd.f32 0.008332557, %v1993_v4  ;;  %v2028_v41 = vadd.f32 0.008332557, %v1996_v16  ;;  %v1847_v13 = vmul.f32 -2.0532243e-08, %v4582_v36 }
 0x29b   : > { %v2055_v21 = vmul.f32 %v2023_v45, %v4696_v63  ;;  %v1887_v15 = vadd.f32 2.704004e-06, %v1855_v33  ;;  %v1889_v57 = vadd.f32 2.704004e-06, %v1857_v50  ;;  %v1849_v40 = vmul.f32 -2.0532243e-08, %v4588_v9 }
 0x29c   : > { %v2090_v22 = vadd.f32 -0.16666576, %v2058_v12  ;;  %v2057_v25 = vmul.f32 %v2025_v56, %v4708_v60  ;;  %v2060_v19 = vmul.f32 %v2028_v41, %v4817_v49  ;;  %v1879_v0 = vadd.f32 2.704004e-06, %v1847_v13 }
 0x29d   : > { %v2087_v44 = vadd.f32 -0.16666576, %v2055_v21  ;;  %v1919_v38 = vmul.f32 %v1887_v15, %v4629_v14  ;;  %v1921_v55 = vmul.f32 %v1889_v57, %v4666_v43  ;;  %v1881_v33 = vadd.f32 2.704004e-06, %v1849_v40 }
 0x29e   : > { %v2122_v4 = vmul.f32 %v2090_v22, %v4806_v26  ;;  %v2089_v16 = vadd.f32 -0.16666576, %v2057_v25  ;;  %v2092_v45 = vadd.f32 -0.16666576, %v2060_v19  ;;  %v1911_v56 = vmul.f32 %v1879_v0, %v4582_v36 }
 0x29f   : > { %v2119_v12 = vmul.f32 %v2087_v44, %v4696_v63  ;;  %v4876_v50 = vmul.f32 %v4856_v18, %v4856_v18  ;;  %v1951_v21 = vadd.f32 -0.00019812536, %v1919_v38  ;;  %v1953_v13 = vadd.f32 -0.00019812536, %v1921_v55 }
 0x2a0   : > { %v2121_v41 = vmul.f32 %v2089_v16, %v4708_v60  ;;  %v2124_v26 = vmul.f32 %v2092_v45, %v4817_v49  ;;  %v1943_v25 = vadd.f32 -0.00019812536, %v1911_v56  ;;  %v1913_v15 = vmul.f32 %v1881_v33, %v4588_v9 }
 0x2a1   : > { %v2151_v22 = vadd.f32 0.9999997, %v2119_v12  ;;  %v4883_v63 = vmul.f32 %v4862_v35, %v4862_v35  ;;  %v1983_v19 = vmul.f32 %v1951_v21, %v4629_v14  ;;  %v1985_v44 = vmul.f32 %v1953_v13, %v4666_v43 }
 0x2a2   : > { %v2153_v57 = vadd.f32 0.9999997, %v2121_v41  ;;  %v4887_v0 = vadd.f32 0.9999997, %v2122_v4  ;;  %v1975_v40 = vmul.f32 %v1943_v25, %v4582_v36  ;;  %v1945_v49 = vadd.f32 -0.00019812536, %v1913_v15 }
 0x2a3   : > { %v2183_v60 = vmul.f32 %v2151_v22, %v4678_v3  ;;  %v2015_v38 = vadd.f32 0.008332557, %v1983_v19  ;;  %v2017_v55 = vadd.f32 0.008332557, %v1985_v44  ;;  %v1839_v45 = vmul.f32 -2.0532243e-08, %v4574_v10 }
 0x2a4   : > { %v2185_v16 = vmul.f32 %v2153_v57, %v4687_v34  ;;  %v4893_v12 = vadd.f32 0.9999997, %v2124_v26  ;;  %v2007_v56 = vadd.f32 0.008332557, %v1975_v40  ;;  %v1977_v33 = vmul.f32 %v1945_v49, %v4588_v9 }
 0x2a5   : > { %2254 = vmatprep.subr.mxu0 %v2183_v60  ;;  %v1841_v4 = vmul.f32 -2.0532243e-08, %v4578_v24  ;;  %v2047_v3 = vmul.f32 %v2015_v38, %v4629_v14  ;;  %v2049_v41 = vmul.f32 %v2017_v55, %v4666_v43  ;;  %v1871_v34 = vadd.f32 2.704004e-06, %v1839_v45 }
 0x2a6   : > { %2343 = vmatprep.subr.mxu1 %v2185_v16  ;;  %2255 = vmatpush1.msra.mxu0 %v4767_v52  ;;  %v1867_v21 = vmul.f32 -2.0532243e-08, %v4876_v50  ;;  %v2039_v13 = vmul.f32 %v2007_v56, %v4582_v36  ;;  %v2009_v26 = vadd.f32 0.008332557, %v1977_v33  ;;  %v1869_v25 = vmul.f32 -2.0532243e-08, %v4883_v63 }
 0x2a7   : > { %2344 = vmatpush1.msra.mxu1 %v4775_v58  ;;  %v1873_v22 = vadd.f32 2.704004e-06, %v1841_v4  ;;  %v2079_v15 = vadd.f32 -0.16666576, %v2047_v3  ;;  %v2081_v57 = vadd.f32 -0.16666576, %v2049_v41  ;;  %v1903_v19 = vmul.f32 %v1871_v34, %v4574_v10 }
 0x2a8   : > { %v1899_v52 = vadd.f32 2.704004e-06, %v1867_v21  ;;  %v2071_v44 = vadd.f32 -0.16666576, %v2039_v13  ;;  %v2041_v60 = vmul.f32 %v2009_v26, %v4588_v9  ;;  %v1901_v49 = vadd.f32 2.704004e-06, %v1869_v25 }
 0x2a9   : > { %v1905_v40 = vmul.f32 %v1873_v22, %v4578_v24  ;;  %v2111_v16 = vmul.f32 %v2079_v15, %v4629_v14  ;;  %v2113_v58 = vmul.f32 %v2081_v57, %v4666_v43  ;;  %v1935_v38 = vadd.f32 -0.00019812536, %v1903_v19 }
 0x2aa   : > { %v1931_v55 = vmul.f32 %v1899_v52, %v4876_v50  ;;  %v2103_v45 = vmul.f32 %v2071_v44, %v4582_v36  ;;  %v2073_v56 = vadd.f32 -0.16666576, %v2041_v60  ;;  %v1933_v4 = vmul.f32 %v1901_v49, %v4883_v63 }
 0x2ab   : > { %v1937_v33 = vadd.f32 -0.00019812536, %v1905_v40  ;;  %v2143_v3 = vadd.f32 0.9999997, %v2111_v16  ;;  %v2145_v41 = vadd.f32 0.9999997, %v2113_v58  ;;  %v1967_v34 = vmul.f32 %v1935_v38, %v4574_v10 }
 0x2ac   : > { %v1963_v21 = vadd.f32 -0.00019812536, %v1931_v55  ;;  %v2135_v13 = vadd.f32 0.9999997, %v2103_v45  ;;  %v2105_v26 = vmul.f32 %v2073_v56, %v4588_v9  ;;  %v1965_v43 = vadd.f32 -0.00019812536, %v1933_v4 }
 0x2ad   : > { %v1969_v14 = vmul.f32 %v1937_v33, %v4578_v24  ;;  %v2175_v22 = vmul.f32 %v2143_v3, %v4594_v28  ;;  %v2177_v25 = vmul.f32 %v2145_v41, %v4604_v8  ;;  %v1999_v36 = vadd.f32 0.008332557, %v1967_v34 }
 0x2ae   : > { %v1995_v15 = vmul.f32 %v1963_v21, %v4876_v50  ;;  %v2167_v57 = vmul.f32 %v2135_v13, %v4563_v46  ;;  %v2137_v19 = vadd.f32 0.9999997, %v2105_v26  ;;  %v1997_v44 = vmul.f32 %v1965_v43, %v4883_v63 }
 0x2af   : > { %v2001_v52 = vadd.f32 0.008332557, %v1969_v14  ;;  %2256 = vmatprep.subr.mxu0 %v2175_v22  ;;  %2345 = vmatprep.subr.mxu1 %v2177_v25  ;;  %v2031_v9 = vmul.f32 %v1999_v36, %v4574_v10  ;;  %v1859_v40 = vmul.f32 -2.0532243e-08, %v4842_v2  ;;  %v1861_v28 = vmul.f32 -2.0532243e-08, %v4850_v39 }
 0x2b0   : > { %v2027_v60 = vadd.f32 0.008332557, %v1995_v15  ;;  %2257 = vmatpush1.msra.mxu0 %v4729_v1  ;;  %2346 = vmatpush1.msra.mxu1 %v4732_v42  ;;  %v2169_v8 = vmul.f32 %v2137_v19, %v4568_v51  ;;  %v2029_v49 = vadd.f32 0.008332557, %v1997_v44  ;;  %v1851_v16 = vmul.f32 -2.0532243e-08, %v4797_v6 }
 0x2b1   : > { %v2033_v46 = vmul.f32 %v2001_v52, %v4578_v24  ;;  %2258 = vmatprep.subr.mxu0 %v2167_v57  ;;  %v2063_v58 = vadd.f32 -0.16666576, %v2031_v9  ;;  %v1891_v55 = vadd.f32 2.704004e-06, %v1859_v40  ;;  %v1893_v45 = vadd.f32 2.704004e-06, %v1861_v28 }
 0x2b2   : > { %v2059_v38 = vmul.f32 %v2027_v60, %v4876_v50  ;;  %2347 = vmatprep.subr.mxu1 %v2169_v8  ;;  %2259 = vmatpush1.msra.mxu0 %v4669_v61  ;;  %v2061_v1 = vmul.f32 %v2029_v49, %v4883_v63  ;;  %v1883_v42 = vadd.f32 2.704004e-06, %v1851_v16  ;;  %v1853_v51 = vmul.f32 -2.0532243e-08, %v4802_v11 }
 0x2b3   : > { %v2065_v56 = vadd.f32 -0.16666576, %v2033_v46  ;;  %2348 = vmatpush1.msra.mxu1 %v4672_v54  ;;  %v2095_v33 = vmul.f32 %v2063_v58, %v4574_v10  ;;  %v1923_v3 = vmul.f32 %v1891_v55, %v4842_v2  ;;  %v1925_v41 = vmul.f32 %v1893_v45, %v4850_v39 }
 0x2b4   : > { %v2091_v4 = vadd.f32 -0.16666576, %v2059_v38  ;;  %v2093_v21 = vadd.f32 -0.16666576, %v2061_v1  ;;  %v1915_v61 = vmul.f32 %v1883_v42, %v4797_v6  ;;  %v1885_v13 = vadd.f32 2.704004e-06, %v1853_v51 }
 0x2b5   : > { %v2097_v34 = vmul.f32 %v2065_v56, %v4578_v24  ;;  %v2127_v26 = vadd.f32 0.9999997, %v2095_v33  ;;  %v1955_v43 = vadd.f32 -0.00019812536, %v1923_v3  ;;  %v1957_v22 = vadd.f32 -0.00019812536, %v1925_v41 }
 0x2b6   : > { %v2123_v14 = vmul.f32 %v2091_v4, %v4876_v50  ;;  %v2125_v54 = vmul.f32 %v2093_v21, %v4883_v63  ;;  %v1947_v10 = vadd.f32 -0.00019812536, %v1915_v61  ;;  %v1917_v36 = vmul.f32 %v1885_v13, %v4802_v11  ;;  %v4948_v50 = vld [vmem:[%s5651_s4] sm:$0xff]  ;;  %v5712_v4 = vld [vmem:[#allocation15_spill] sm:$0xff] }
 0x2b7   : > { %v2129_v25 = vadd.f32 0.9999997, %v2097_v34  ;;  %v2159_v15 = vmul.f32 %v2127_v26, %v4554_v53  ;;  %v1987_v24 = vmul.f32 %v1955_v43, %v4842_v2  ;;  %v1989_v19 = vmul.f32 %v1957_v22, %v4850_v39 }
 0x2b8   : > { %v2155_v57 = vadd.f32 0.9999997, %v2123_v14  ;;  %v2157_v44 = vadd.f32 0.9999997, %v2125_v54  ;;  %v1979_v63 = vmul.f32 %v1947_v10, %v4797_v6  ;;  %v1949_v9 = vadd.f32 -0.00019812536, %v1917_v36 }
 0x2b9   : > { %v2161_v52 = vmul.f32 %v2129_v25, %v4560_v17  ;;  %2260 = vmatprep.subr.mxu0 %v2159_v15  ;;  %v2019_v53 = vadd.f32 0.008332557, %v1987_v24  ;;  %v2021_v40 = vadd.f32 0.008332557, %v1989_v19  ;;  %v1843_v28 = vmul.f32 -2.0532243e-08, %v4736_v59 }
 0x2ba   : > { %v2187_v60 = vmul.f32 %v2155_v57, %v4856_v18  ;;  %2261 = vmatpush1.msra.mxu0 %v4612_v37  ;;  %v2189_v17 = vmul.f32 %v2157_v44, %v4862_v35  ;;  %v2011_v8 = vadd.f32 0.008332557, %v1979_v63  ;;  %v1981_v46 = vmul.f32 %v1949_v9, %v4802_v11  ;;  %v2193_v10 = vld [vmem:[%s5651_s4 + $0x18] sm:$0xff]  ;;  %v5714_v57 = vld [vmem:[#allocation18_spill] sm:$0xff]  ;;  %v5717_v63 = vld [vmem:[#allocation21_spill] sm:$0xff] }
 0x2bb   : > { %2349 = vmatprep.subr.mxu1 %v2161_v52  ;;  %v1845_v49 = vmul.f32 -2.0532243e-08, %v4740_v5  ;;  %v2116_v16 = vmul.f32 %v4853_v20, %v4772_v32  ;;  %3558 = vmatmul.mubr.msk.f32.vlgmr.msra.gmra.mxu0 %vm1277_vm1, %v4948_v50  ;;  %v2051_v18 = vmul.f32 %v2019_v53, %v4842_v2  ;;  %v2053_v58 = vmul.f32 %v2021_v40, %v4850_v39  ;;  %v5715_v52 = vld [vmem:[#allocation20_spill] sm:$0xff] }
 0x2bc   : > { %2350 = vmatpush1.msra.mxu1 %v4616_v23  ;;  %v1875_v37 = vadd.f32 2.704004e-06, %v1843_v28  ;;  %v2186_v35 = vmul.f32 %v4887_v0, %v4789_v7  ;;  %v5711_v38 = vmov 0.0   ;;  %v4972_v23 = vld [vmem:[%s5651_s4 + $0x8] sm:$0xff]  ;;  %v2043_v32 = vmul.f32 %v2011_v8, %v4797_v6  ;;  %2432 = vmatprep.subr.mxu0 %v2187_v60  ;;  %v5719_v28 = vld [vmem:[#allocation12_spill] sm:$0xff]  ;;  %v5720_v8 = vld [vmem:[#allocation13_spill] sm:$0xff] }
 0x2bd   : > { %3562 = vmatmul.mubr.msk.f32.vlgmr.msra.gmra.mxu1 %vm1277_vm1, %v4948_v50  ;;  %2300 = vmatprep.mubr.f32.mxu0 %v5711_v38  ;;  %v2013_v20 = vadd.f32 0.008332557, %v1981_v46  ;;  %v1877_v55 = vadd.f32 2.704004e-06, %v1845_v49  ;;  %v2188_v45 = vmul.f32 %v4893_v12, %v4809_v47  ;;  %v2083_v7 = vadd.f32 -0.16666576, %v2051_v18 }
 0x2be   : > { %2389 = vmatprep.mubr.f32.mxu1 %v5711_v38  ;;  %v2085_v0 = vadd.f32 -0.16666576, %v2053_v58  ;;  %v1907_v56 = vmul.f32 %v1875_v37, %v4736_v59  ;;  %v2106_v1 = vmul.f32 %v4835_v62, %v4703_v29  ;;  %2521 = vmatprep.subr.mxu1 %v2189_v17  ;;  %v2075_v42 = vadd.f32 -0.16666576, %v2043_v32  ;;  %v4990_v12 = vld [vmem:[%s5651_s4 + $0x10] sm:$0xff]  ;;  %v5718_v60 = vld [vmem:[#allocation22_spill] sm:$0xff] }
 0x2bf   : > { %2433 = vmatpush1.msra.mxu0 %v2186_v35  ;;  %v2045_v51 = vmul.f32 %v2013_v20, %v4802_v11  ;;  %v1909_v33 = vmul.f32 %v1877_v55, %v4740_v5  ;;  %v2108_v47 = vmul.f32 %v4837_v31, %v5712_v4  ;;  %2522 = vmatpush1.msra.mxu1 %v2188_v45  ;;  %v2146_v41 = vadd.f32 0.9999997, %v4846_v30  ;;  %v5721_v49 = vld [vmem:[#allocation23_spill] sm:$0xff]  ;;  %v5722_v58 = vld [vmem:[#allocation14_spill] sm:$0xff] }
 0x2c0   : > { %3559 = vmatmul.mubr.msk.f32.gmra.mxu0 %vm1277_vm1, %v4972_v23  ;;  %v2115_v29 = vmul.f32 %v2083_v7, %v4842_v2  ;;  %v2117_v62 = vmul.f32 %v2085_v0, %v4850_v39  ;;  %v1939_v3 = vadd.f32 -0.00019812536, %v1907_v56  ;;  %v2107_v31 = vmul.f32 %v2075_v42, %v4797_v6  ;;  %v5713_v39 = vld [vmem:[#allocation19_spill] sm:$0xff]  ;;  %v5723_v56 = vld [vmem:[#allocation16_spill] sm:$0xff]  ;;  %v5724_v42 = vld [vmem:[#allocation9_spill] sm:$0xff] }
 0x2c1   : > { %3563 = vmatmul.mubr.msk.f32.gmra.mxu1 %vm1277_vm1, %v4972_v23  ;;  %2306 = vmatprep.mubr.f32.mxu0 %v5711_v38  ;;  %v2077_v34 = vadd.f32 -0.16666576, %v2045_v51  ;;  %v1941_v21 = vadd.f32 -0.00019812536, %v1909_v33  ;;  %v2148_v61 = vadd.f32 0.9999997, %v2116_v16  ;;  %v2178_v24 = vmul.f32 %v2146_v41, %v5714_v57 }
 0x2c2   : > { %2395 = vmatprep.mubr.f32.mxu1 %v5711_v38  ;;  %v2147_v13 = vadd.f32 0.9999997, %v2115_v29  ;;  %v2149_v26 = vadd.f32 0.9999997, %v2117_v62  ;;  %v1971_v2 = vmul.f32 %v1939_v3, %v4736_v59  ;;  %v2068_v14 = vadd.f32 -0.16666576, %v5713_v39 }
 0x2c3   : > { %v2139_v43 = vadd.f32 0.9999997, %v2107_v31  ;;  %v2109_v30 = vmul.f32 %v2077_v34, %v4802_v11  ;;  %v1973_v22 = vmul.f32 %v1941_v21, %v4740_v5  ;;  %v2138_v25 = vadd.f32 0.9999997, %v2106_v1  ;;  %v5725_v33 = vld [vmem:[#allocation17_spill] sm:$0xff] }
 0x2c4   : > { %3560 = vmatmul.mubr.msk.f32.gmra.mxu0 %vm1277_vm1, %v4990_v12  ;;  %v2179_v6 = vmul.f32 %v2147_v13, %v4826_v27  ;;  %v2181_v54 = vmul.f32 %v2149_v26, %v4830_v48  ;;  %v2003_v36 = vadd.f32 0.008332557, %v1971_v2  ;;  %v2140_v15 = vadd.f32 0.9999997, %v2108_v47  ;;  %v5716_v48 = vld [vmem:[#allocation11_spill] sm:$0xff]  ;;  %v5726_v47 = vld [vmem:[#allocation10_spill] sm:$0xff] }
 0x2c5   : > { %3564 = vmatmul.mubr.msk.f32.gmra.mxu1 %vm1277_vm1, %v4990_v12  ;;  %2312 = vmatprep.mubr.f32.mxu0 %v5711_v38  ;;  %v2141_v11 = vadd.f32 0.9999997, %v2109_v30  ;;  %v2005_v19 = vadd.f32 0.008332557, %v1973_v22  ;;  %v2180_v44 = vmul.f32 %v2148_v61, %v5715_v52  ;;  %v2098_v9 = vmul.f32 %v5717_v63, %v5716_v48 }
 0x2c6   : > { %2434 = vmatprep.subr.mxu0 %v2179_v6  ;;  %2523 = vmatprep.subr.mxu1 %v2181_v54  ;;  %v2035_v27 = vmul.f32 %v2003_v36, %v4736_v59  ;;  %v2171_v53 = vmul.f32 %v2139_v43, %v5718_v60  ;;  %v2100_v17 = vmul.f32 %v2068_v14, %v5719_v28 }
 0x2c7   : > { %2401 = vmatprep.mubr.f32.mxu1 %v5711_v38  ;;  %2435 = vmatpush1.msra.mxu0 %v2178_v24  ;;  %v2037_v40 = vmul.f32 %v2005_v19, %v4740_v5  ;;  %v2170_v46 = vmul.f32 %v2138_v25, %v5720_v8  ;;  %v2173_v16 = vmul.f32 %v2141_v11, %v5721_v49  ;;  %v2130_v20 = vadd.f32 0.9999997, %v2098_v9 }
 0x2c8   : > { %2524 = vmatpush1.msra.mxu1 %v2180_v44  ;;  %3561 = vmatmul.mubr.msk.f32.gmra.mxu0 %vm1277_vm1, %v2193_v10  ;;  %v2067_v18 = vadd.f32 -0.16666576, %v2035_v27  ;;  %v2172_v37 = vmul.f32 %v2140_v15, %v5722_v58  ;;  %v2132_v45 = vadd.f32 0.9999997, %v2100_v17 }
 0x2c9   : > { %3565 = vmatmul.mubr.msk.f32.gmra.mxu1 %vm1277_vm1, %v2193_v10  ;;  %2436 = vmatprep.subr.mxu0 %v2171_v53  ;;  %v2069_v35 = vadd.f32 -0.16666576, %v2037_v40  ;;  %v2162_v51 = vmul.f32 %v2130_v20, %v5724_v42 }
 0x2ca   : > { %2525 = vmatprep.subr.mxu1 %v2173_v16  ;;  %2437 = vmatpush1.msra.mxu0 %v2170_v46  ;;  %v2099_v32 = vmul.f32 %v2067_v18, %v4736_v59  ;;  %v2164_v29 = vmul.f32 %v2132_v45, %v5726_v47  ;;  %v5058_v59 = vpop.permute.xlu1 %2210 }
 0x2cb   : > { %2526 = vmatpush1.msra.mxu1 %v2172_v37  ;;  %v2101_v55 = vmul.f32 %v2069_v35, %v4740_v5  ;;  %2472 = vmatprep.mubr.f32.mxu0 %v5711_v38  ;;  %v5060_v5 = vpop.permute.xlu0 %2215 }
 0x2cc   : > { %v2131_v7 = vadd.f32 0.9999997, %v2099_v32  ;;  %2561 = vmatprep.mubr.f32.mxu1 %v5711_v38 }
 0x2cd   : > { %v2133_v0 = vadd.f32 0.9999997, %v2101_v55 }
 0x2ce   : > { %v2163_v1 = vmul.f32 %v2131_v7, %v5723_v56 }
 0x2cf   : > { %v2165_v4 = vmul.f32 %v2133_v0, %v5725_v33  ;;  %v5066_v21 = vpop.permute.xlu0 %2205 }
 0x2d0   : > { %2438 = vmatprep.subr.mxu0 %v2163_v1 }
 0x2d1   : > { %2527 = vmatprep.subr.mxu1 %v2165_v4  ;;  %2439 = vmatpush1.msra.mxu0 %v2162_v51 }
 0x2d2   : > { %2528 = vmatpush1.msra.mxu1 %v2164_v29  ;;  %3566 = vmatmul.mubr.msk.f32.vlgmr.msra.gmra.mxu0 %vm1277_vm1, %v4948_v50 }
 0x2d3   : > { %3570 = vmatmul.mubr.msk.f32.vlgmr.msra.gmra.mxu1 %vm1277_vm1, %v4948_v50  ;;  %2478 = vmatprep.mubr.f32.mxu0 %v5711_v38  ;;  %v5062_v50 = vpop.permute.xlu1 %2200 }
 0x2d4   : > { %2567 = vmatprep.mubr.f32.mxu1 %v5711_v38 }
 0x2d6   : > { %3567 = vmatmul.mubr.msk.f32.gmra.mxu0 %vm1277_vm1, %v4972_v23 }
 0x2d7   : > { %3571 = vmatmul.mubr.msk.f32.gmra.mxu1 %vm1277_vm1, %v4972_v23  ;;  %2484 = vmatprep.mubr.f32.mxu0 %v5711_v38 }
 0x2d8   : > { %2573 = vmatprep.mubr.f32.mxu1 %v5711_v38 }
 0x2da   : > { %3568 = vmatmul.mubr.msk.f32.gmra.mxu0 %vm1277_vm1, %v4990_v12 }
 0x2db   : > { %3572 = vmatmul.mubr.msk.f32.gmra.mxu1 %vm1277_vm1, %v4990_v12  ;;  %2490 = vmatprep.mubr.f32.mxu0 %v5711_v38 }
 0x2dc   : > { %2579 = vmatprep.mubr.f32.mxu1 %v5711_v38 }
 0x2de   : > { %3569 = vmatmul.mubr.msk.f32.gmra.mxu0 %vm1277_vm1, %v2193_v10 }
 0x2df   : > { %3573 = vmatmul.mubr.msk.f32.gmra.mxu1 %vm1277_vm1, %v2193_v10  ;;  %3204 = vmatprep.mubr.f32.mxu0 %v5711_v38 }
 0x2e0   : > { %3275 = vmatprep.mubr.f32.mxu1 %v5711_v38 }
 0x37b   : > { %v2296_v23 = vpop.f32.mrf.mxu0 }
 0x37c   : > { %v2297_v12 = vadd.f32 %v2296_v23, %v5062_v50 }
 0x37d   : > { %v2385_v62 = vpop.f32.mrf.mxu1  ;;  %v2298_v41 = vpop.f32.mrf.mxu0 }
 0x37e   : > { %v2386_v3 = vadd.f32 %v2385_v62, %v5062_v50  ;;  %v2586_v31 = vmul.f32 0.15915494, %v2297_v12  ;;  %v5071_v22 = vadd.f32 %v2298_v41, %v5062_v50 }
 0x37f   : > { %v2387_v34 = vpop.f32.mrf.mxu1 }
 0x380   : > { %v2588_v61 = vmul.f32 0.15915494, %v2386_v3  ;;  %v2302_v13 = vpop.f32.mrf.mxu0  ;;  %v2618_v26 = vadd.f32 0.5, %v2586_v31  ;;  %v5074_v36 = vadd.f32 %v2387_v34, %v5062_v50  ;;  %v2587_v52 = vmul.f32 0.15915494, %v5071_v22 }
 0x381   : > { %v2303_v2 = vadd.f32 %v2302_v13, %v5066_v21  ;;  %v2391_v39 = vpop.f32.mrf.mxu1 }
 0x382   : > { %v2620_v14 = vadd.f32 0.5, %v2588_v61  ;;  %v2392_v43 = vadd.f32 %v2391_v39, %v5066_v21  ;;  %v2650_v30 = vfloor.f32 %v2618_v26  ;;  %v2304_v57 = vpop.f32.mrf.mxu0  ;;  %v2589_v53 = vmul.f32 0.15915494, %v5074_v36 }
 0x383   : > { %v2594_v25 = vmul.f32 0.15915494, %v2303_v2  ;;  %v2393_v27 = vpop.f32.mrf.mxu1  ;;  %v5082_v9 = vadd.f32 %v2304_v57, %v5066_v21  ;;  %v2619_v16 = vadd.f32 0.5, %v2587_v52 }
 0x384   : > { %v2652_v6 = vfloor.f32 %v2620_v14  ;;  %v2596_v54 = vmul.f32 0.15915494, %v2392_v43  ;;  %v2682_v10 = vmul.f32 6.2831855, %v2650_v30  ;;  %v5094_v8 = vadd.f32 %v2393_v27, %v5066_v21  ;;  %v2308_v46 = vpop.f32.mrf.mxu0 }
 0x385   : > { %v2626_v15 = vadd.f32 0.5, %v2594_v25  ;;  %v2397_v58 = vpop.f32.mrf.mxu1  ;;  %v2595_v32 = vmul.f32 0.15915494, %v5082_v9  ;;  %v2621_v55 = vadd.f32 0.5, %v2589_v53  ;;  %v2309_v7 = vadd.f32 %v2308_v46, %v5058_v59 }
 0x386   : > { %v2684_v24 = vmul.f32 6.2831855, %v2652_v6  ;;  %v2628_v11 = vadd.f32 0.5, %v2596_v54  ;;  %v5076_v19 = vsub.f32 %v2297_v12, %v2682_v10  ;;  %v2597_v1 = vmul.f32 0.15915494, %v5094_v8  ;;  %v2310_v51 = vpop.f32.mrf.mxu0 }
 0x387   : > { %v2658_v44 = vfloor.f32 %v2626_v15  ;;  %v2398_v42 = vadd.f32 %v2397_v58, %v5058_v59  ;;  %v2651_v4 = vfloor.f32 %v2619_v16  ;;  %v2602_v29 = vmul.f32 0.15915494, %v2309_v7  ;;  %v2399_v41 = vpop.f32.mrf.mxu1 }
 0x388   : > { %v5079_v48 = vsub.f32 %v2386_v3, %v2684_v24  ;;  %v2660_v63 = vfloor.f32 %v2628_v11  ;;  %v5086_v60 = vmul.f32 %v5076_v19, %v5076_v19  ;;  %v2627_v62 = vadd.f32 0.5, %v2595_v32 }
 0x389   : > { %v2690_v40 = vmul.f32 6.2831855, %v2658_v44  ;;  %v2604_v3 = vmul.f32 0.15915494, %v2398_v42  ;;  %v2634_v61 = vadd.f32 0.5, %v2602_v29  ;;  %v5119_v13 = vadd.f32 %v2310_v51, %v5058_v59 }
 0x38a   : > { %v5091_v28 = vmul.f32 %v5079_v48, %v5079_v48  ;;  %v2692_v17 = vmul.f32 6.2831855, %v2660_v63  ;;  %v2778_v49 = vmul.f32 -2.0532243e-08, %v5086_v60  ;;  %v2629_v39 = vadd.f32 0.5, %v2597_v1 }
 0x38b   : > { %v5097_v18 = vsub.f32 %v2303_v2, %v2690_v40  ;;  %v2636_v14 = vadd.f32 0.5, %v2604_v3  ;;  %v2666_v25 = vfloor.f32 %v2634_v61  ;;  %v5124_v6 = vadd.f32 %v2399_v41, %v5058_v59 }
 0x38c   : > { %v2780_v37 = vmul.f32 -2.0532243e-08, %v5091_v28  ;;  %v5100_v35 = vsub.f32 %v2392_v43, %v2692_v17  ;;  %v2810_v20 = vadd.f32 2.704004e-06, %v2778_v49  ;;  %v2603_v57 = vmul.f32 0.15915494, %v5119_v13 }
 0x38d   : > { %v5105_v45 = vmul.f32 %v5097_v18, %v5097_v18  ;;  %v2668_v15 = vfloor.f32 %v2636_v14  ;;  %v2653_v11 = vfloor.f32 %v2621_v55  ;;  %v2698_v44 = vmul.f32 6.2831855, %v2666_v25 }
 0x38e   : > { %v2812_v0 = vadd.f32 2.704004e-06, %v2780_v37  ;;  %v5110_v56 = vmul.f32 %v5100_v35, %v5100_v35  ;;  %v2842_v33 = vmul.f32 %v2810_v20, %v5086_v60  ;;  %v2659_v53 = vfloor.f32 %v2627_v62 }
 0x38f   : > { %v2786_v47 = vmul.f32 -2.0532243e-08, %v5105_v45  ;;  %v2700_v40 = vmul.f32 6.2831855, %v2668_v15  ;;  %v2661_v17 = vfloor.f32 %v2629_v39  ;;  %v5129_v46 = vsub.f32 %v2309_v7, %v2698_v44 }
 0x390   : > { %v2844_v23 = vmul.f32 %v2812_v0, %v5091_v28  ;;  %v2788_v12 = vmul.f32 -2.0532243e-08, %v5110_v56  ;;  %v2874_v31 = vadd.f32 -0.00019812536, %v2842_v33  ;;  %v2605_v49 = vmul.f32 0.15915494, %v5124_v6 }
 0x391   : > { %v2818_v34 = vadd.f32 2.704004e-06, %v2786_v47  ;;  %v5134_v37 = vsub.f32 %v2398_v42, %v2700_v40  ;;  %v2635_v32 = vadd.f32 0.5, %v2603_v57  ;;  %v2683_v55 = vmul.f32 6.2831855, %v2651_v4  ;;  %v2314_v47 = vpop.f32.mrf.mxu0 }
 0x392   : > { %v2876_v26 = vadd.f32 -0.00019812536, %v2844_v23  ;;  %v2820_v2 = vadd.f32 2.704004e-06, %v2788_v12  ;;  %v2906_v43 = vmul.f32 %v2874_v31, %v5086_v60  ;;  %v5139_v0 = vmul.f32 %v5129_v46, %v5129_v46  ;;  %v2403_v12 = vpop.f32.mrf.mxu1 }
 0x393   : > { %v2850_v30 = vmul.f32 %v2818_v34, %v5105_v45  ;;  %v2685_v1 = vmul.f32 6.2831855, %v2653_v11  ;;  %v2691_v51 = vmul.f32 6.2831855, %v2659_v53  ;;  %v5144_v33 = vmul.f32 %v5134_v37, %v5134_v37 }
 0x394   : > { %v2908_v54 = vmul.f32 %v2876_v26, %v5091_v28  ;;  %v2852_v10 = vmul.f32 %v2820_v2, %v5110_v56  ;;  %v2938_v24 = vadd.f32 0.008332557, %v2906_v43  ;;  %v2693_v29 = vmul.f32 6.2831855, %v2661_v17 }
 0x395   : > { %v2882_v52 = vadd.f32 -0.00019812536, %v2850_v30  ;;  %v2794_v42 = vmul.f32 -2.0532243e-08, %v5139_v0  ;;  %v2637_v23 = vadd.f32 0.5, %v2605_v49  ;;  %v2667_v41 = vfloor.f32 %v2635_v32  ;;  %v2316_v30 = vpop.f32.mrf.mxu0 }
 0x396   : > { %v2940_v27 = vadd.f32 0.008332557, %v2908_v54  ;;  %v2884_v63 = vadd.f32 -0.00019812536, %v2852_v10  ;;  %v2970_v16 = vmul.f32 %v2938_v24, %v5086_v60  ;;  %v2796_v3 = vmul.f32 -2.0532243e-08, %v5144_v33 }
 0x397   : > { %v2914_v58 = vmul.f32 %v2882_v52, %v5105_v45  ;;  %v5149_v34 = vsub.f32 %v5071_v22, %v2683_v55  ;;  %v2826_v61 = vadd.f32 2.704004e-06, %v2794_v42  ;;  %v2315_v26 = vadd.f32 %v2314_v47, %v5060_v5  ;;  %v2405_v22 = vpop.f32.mrf.mxu1 }
 0x398   : > { %v2972_v20 = vmul.f32 %v2940_v27, %v5091_v28  ;;  %v2916_v7 = vmul.f32 %v2884_v63, %v5110_v56  ;;  %v3002_v62 = vadd.f32 -0.16666576, %v2970_v16  ;;  %v5153_v2 = vsub.f32 %v5074_v36, %v2685_v1  ;;  %v2474_v63 = vpop.f32.mrf.mxu0 }
 0x399   : > { %v2946_v4 = vadd.f32 0.008332557, %v2914_v58  ;;  %v5156_v14 = vsub.f32 %v5082_v9, %v2691_v51  ;;  %v2404_v43 = vadd.f32 %v2403_v12, %v5060_v5  ;;  %v5160_v25 = vsub.f32 %v5094_v8, %v2693_v29  ;;  %v2563_v49 = vpop.f32.mrf.mxu1 }
 0x39a   : > { %v3004_v31 = vadd.f32 -0.16666576, %v2972_v20  ;;  %v2948_v39 = vadd.f32 0.008332557, %v2916_v7  ;;  %v2828_v54 = vadd.f32 2.704004e-06, %v2796_v3  ;;  %v2669_v10 = vfloor.f32 %v2637_v23 }
 0x39b   : > { %v3034_v15 = vmul.f32 %v3002_v62, %v5086_v60  ;;  %v2978_v57 = vmul.f32 %v2946_v4, %v5105_v45  ;;  %v2699_v24 = vmul.f32 6.2831855, %v2667_v41  ;;  %v5167_v9 = vmul.f32 %v5149_v34, %v5149_v34 }
 0x39c   : > { %v3036_v36 = vmul.f32 %v3004_v31, %v5091_v28  ;;  %v2858_v11 = vmul.f32 %v2826_v61, %v5139_v0  ;;  %v2610_v52 = vmul.f32 0.15915494, %v2315_v26  ;;  %v5172_v8 = vmul.f32 %v5153_v2, %v5153_v2 }
 0x39d   : > { %v2980_v44 = vmul.f32 %v2948_v39, %v5110_v56  ;;  %v5177_v60 = vmul.f32 %v5156_v14, %v5156_v14  ;;  %v2612_v27 = vmul.f32 0.15915494, %v2404_v43  ;;  %v5181_v28 = vmul.f32 %v5160_v25, %v5160_v25 }
 0x39e   : > { %v2860_v53 = vmul.f32 %v2828_v54, %v5144_v33  ;;  %v2701_v40 = vmul.f32 6.2831855, %v2669_v10  ;;  %v2642_v17 = vadd.f32 0.5, %v2610_v52  ;;  %v3066_v16 = vadd.f32 0.9999997, %v3034_v15 }
 0x39f   : > { %v3010_v58 = vadd.f32 -0.16666576, %v2978_v57  ;;  %v5185_v32 = vsub.f32 %v5119_v13, %v2699_v24  ;;  %v2644_v20 = vadd.f32 0.5, %v2612_v27  ;;  %v3068_v55 = vadd.f32 0.9999997, %v3036_v36 }
 0x3a0   : > { %v2890_v1 = vadd.f32 -0.00019812536, %v2858_v11  ;;  %v2674_v7 = vfloor.f32 %v2642_v17  ;;  %v2475_v51 = vadd.f32 %v2474_v63, %v5062_v50  ;;  %v3012_v47 = vadd.f32 -0.16666576, %v2980_v44  ;;  %v2565_v11 = vpop.f32.mrf.mxu1 }
 0x3a1   : > { %v2676_v29 = vfloor.f32 %v2644_v20  ;;  %v5189_v42 = vadd.f32 %v2316_v30, %v5060_v5  ;;  %v2564_v23 = vadd.f32 %v2563_v49, %v5062_v50  ;;  %v2892_v12 = vadd.f32 -0.00019812536, %v2860_v53 }
 0x3a2   : > { %v5193_v62 = vsub.f32 %v5124_v6, %v2701_v40  ;;  %v2706_v4 = vmul.f32 6.2831855, %v2674_v7  ;;  %v2590_v13 = vmul.f32 0.15915494, %v2475_v51  ;;  %v3042_v3 = vmul.f32 %v3010_v58, %v5105_v45 }
 0x3a3   : > { %v2708_v41 = vmul.f32 6.2831855, %v2676_v29  ;;  %v5197_v31 = vadd.f32 %v2405_v22, %v5060_v5  ;;  %v2592_v61 = vmul.f32 0.15915494, %v2564_v23  ;;  %v5200_v39 = vmul.f32 %v3066_v16, %v5076_v19  ;;  %v2476_v22 = vpop.f32.mrf.mxu0 }
 0x3a4   : > { %v2922_v30 = vmul.f32 %v2890_v1, %v5139_v0  ;;  %v5203_v54 = vsub.f32 %v2315_v26, %v2706_v4  ;;  %v2622_v10 = vadd.f32 0.5, %v2590_v13  ;;  %v5207_v6 = vmul.f32 %v5185_v32, %v5185_v32 }
 0x3a5   : > { %v5209_v15 = vsub.f32 %v2404_v43, %v2708_v41  ;;  %v2611_v45 = vmul.f32 0.15915494, %v5189_v42  ;;  %v2624_v57 = vadd.f32 0.5, %v2592_v61  ;;  %v5213_v24 = vmul.f32 %v3068_v55, %v5079_v48  ;;  %v2480_v20 = vpop.f32.mrf.mxu0 }
 0x3a6   : > { %v2924_v19 = vmul.f32 %v2892_v12, %v5144_v33  ;;  %v5218_v26 = vmul.f32 %v5203_v54, %v5203_v54  ;;  %v2654_v36 = vfloor.f32 %v2622_v10  ;;  %v3074_v52 = vadd.f32 0.9999997, %v3042_v3 }
 0x3a7   : > { %5727 = vst [vmem:[#allocation15_spill] sm:$0xff] %v5213_v24  ;;  %v5222_v43 = vmul.f32 %v5209_v15, %v5209_v15  ;;  %v2613_v44 = vmul.f32 0.15915494, %v5197_v31  ;;  %v2656_v27 = vfloor.f32 %v2624_v57  ;;  %v3044_v63 = vmul.f32 %v3012_v47, %v5110_v56  ;;  %v2569_v56 = vpop.f32.mrf.mxu1 }
 0x3a8   : > { %v2954_v48 = vadd.f32 0.008332557, %v2922_v30  ;;  %v2802_v53 = vmul.f32 -2.0532243e-08, %v5218_v26  ;;  %v2686_v40 = vmul.f32 6.2831855, %v2654_v36  ;;  %v5229_v17 = vmul.f32 %v5193_v62, %v5193_v62 }
 0x3a9   : > { %v2804_v49 = vmul.f32 -2.0532243e-08, %v5222_v43  ;;  %v2643_v16 = vadd.f32 0.5, %v2611_v45  ;;  %v2688_v58 = vmul.f32 6.2831855, %v2656_v27  ;;  %v5235_v29 = vadd.f32 %v2476_v22, %v5062_v50 }
 0x3aa   : > { %v2956_v55 = vadd.f32 0.008332557, %v2924_v19  ;;  %v2834_v1 = vadd.f32 2.704004e-06, %v2802_v53  ;;  %v5232_v7 = vsub.f32 %v2475_v51, %v2686_v40  ;;  %v2645_v12 = vadd.f32 0.5, %v2613_v44 }
 0x3ab   : > { %v2836_v47 = vadd.f32 2.704004e-06, %v2804_v49  ;;  %v5237_v4 = vsub.f32 %v2564_v23, %v2688_v58  ;;  %v5240_v13 = vadd.f32 %v2565_v11, %v5062_v50  ;;  %v2591_v51 = vmul.f32 0.15915494, %v5235_v29 }
 0x3ac   : > { %5728 = vst [vmem:[#allocation19_spill] sm:$0xff] %v5232_v7  ;;  %v2866_v3 = vmul.f32 %v2834_v1, %v5218_v26  ;;  %v5245_v41 = vmul.f32 %v5232_v7, %v5232_v7  ;;  %v2481_v61 = vadd.f32 %v2480_v20, %v5066_v21  ;;  %v2570_v50 = vadd.f32 %v2569_v56, %v5066_v21 }
 0x3ad   : > { %5729 = vst [vmem:[#allocation18_spill] sm:$0xff] %v5237_v4  ;;  %v2868_v30 = vmul.f32 %v2836_v47, %v5222_v43  ;;  %v5252_v10 = vmul.f32 %v5237_v4, %v5237_v4  ;;  %v2593_v23 = vmul.f32 0.15915494, %v5240_v13  ;;  %v3076_v45 = vadd.f32 0.9999997, %v3044_v63 }
 0x3ae   : > { %5730 = vst [vmem:[#allocation20_spill] sm:$0xff] %v5245_v41  ;;  %v2986_v57 = vmul.f32 %v2954_v48, %v5139_v0  ;;  %v2898_v22 = vadd.f32 -0.00019812536, %v2866_v3  ;;  %v2782_v19 = vmul.f32 -2.0532243e-08, %v5245_v41  ;;  %v2988_v36 = vmul.f32 %v2956_v55, %v5144_v33 }
 0x3af   : > { %5731 = vst [vmem:[#allocation11_spill] sm:$0xff] %v5252_v10  ;;  %v2900_v11 = vadd.f32 -0.00019812536, %v2868_v30  ;;  %v2675_v44 = vfloor.f32 %v2643_v16  ;;  %v2784_v27 = vmul.f32 -2.0532243e-08, %v5252_v10  ;;  %v2677_v40 = vfloor.f32 %v2645_v12 }
 0x3b0   : > { %v2930_v53 = vmul.f32 %v2898_v22, %v5218_v26  ;;  %v2814_v49 = vadd.f32 2.704004e-06, %v2782_v19  ;;  %v2598_v58 = vmul.f32 0.15915494, %v2481_v61  ;;  %v2623_v1 = vadd.f32 0.5, %v2591_v51  ;;  %v2482_v51 = vpop.f32.mrf.mxu0 }
 0x3b1   : > { %v2932_v20 = vmul.f32 %v2900_v11, %v5222_v43  ;;  %v2625_v63 = vadd.f32 0.5, %v2593_v23  ;;  %v2600_v56 = vmul.f32 0.15915494, %v2570_v50  ;;  %v2816_v3 = vadd.f32 2.704004e-06, %v2784_v27  ;;  %v2571_v23 = vpop.f32.mrf.mxu1 }
 0x3b2   : > { %v2962_v48 = vadd.f32 0.008332557, %v2930_v53  ;;  %v2846_v47 = vmul.f32 %v2814_v49, %v5245_v41  ;;  %v2630_v4 = vadd.f32 0.5, %v2598_v58  ;;  %v5264_v55 = vmul.f32 %v3074_v52, %v5097_v18 }
 0x3b3   : > { %v5267_v16 = vmul.f32 %v3076_v45, %v5100_v35  ;;  %v2964_v30 = vadd.f32 0.008332557, %v2932_v20  ;;  %v2632_v12 = vadd.f32 0.5, %v2600_v56  ;;  %v3018_v22 = vadd.f32 -0.16666576, %v2986_v57 }
 0x3b4   : > { %v3020_v19 = vadd.f32 -0.16666576, %v2988_v36  ;;  %v2707_v7 = vmul.f32 6.2831855, %v2675_v44  ;;  %v2662_v11 = vfloor.f32 %v2630_v4  ;;  %v2709_v38 = vmul.f32 6.2831855, %v2677_v40 }
 0x3b5   : > { %v2655_v53 = vfloor.f32 %v2623_v1  ;;  %v2657_v24 = vfloor.f32 %v2625_v63  ;;  %v2664_v49 = vfloor.f32 %v2632_v12  ;;  %v2994_v27 = vmul.f32 %v2962_v48, %v5218_v26 }
 0x3b6   : > { %v2878_v58 = vadd.f32 -0.00019812536, %v2846_v47  ;;  %v2848_v18 = vmul.f32 %v2816_v3, %v5252_v10  ;;  %v2694_v52 = vmul.f32 6.2831855, %v2662_v11  ;;  %v2996_v35 = vmul.f32 %v2964_v30, %v5222_v43 }
 0x3b7   : > { %v2696_v45 = vmul.f32 6.2831855, %v2664_v49  ;;  %v5273_v57 = vadd.f32 %v2482_v51, %v5066_v21  ;;  %v5276_v4 = vadd.f32 %v2571_v23, %v5066_v21  ;;  %v3050_v36 = vmul.f32 %v3018_v22, %v5139_v0 }
 0x3b8   : > { %v3052_v44 = vmul.f32 %v3020_v19, %v5144_v33  ;;  %v5281_v40 = vsub.f32 %v5189_v42, %v2707_v7  ;;  %v5283_v20 = vsub.f32 %v2481_v61, %v2694_v52  ;;  %v5286_v1 = vsub.f32 %v5197_v31, %v2709_v38  ;;  %v2486_v33 = vpop.f32.mrf.mxu0  ;;  %v2575_v42 = vpop.f32.mrf.mxu1 }
 0x3b9   : > { %v2687_v63 = vmul.f32 6.2831855, %v2655_v53  ;;  %v2689_v56 = vmul.f32 6.2831855, %v2657_v24  ;;  %v5288_v48 = vsub.f32 %v2570_v50, %v2696_v45  ;;  %v3026_v47 = vadd.f32 -0.16666576, %v2994_v27 }
 0x3ba   : > { %5732 = vst [vmem:[#allocation21_spill] sm:$0xff] %v5283_v20  ;;  %v2910_v21 = vmul.f32 %v2878_v58, %v5245_v41  ;;  %v2880_v3 = vadd.f32 -0.00019812536, %v2848_v18  ;;  %v5293_v0 = vmul.f32 %v5283_v20, %v5283_v20  ;;  %v3028_v7 = vadd.f32 -0.16666576, %v2996_v35  ;;  %v2488_v58 = vpop.f32.mrf.mxu0  ;;  %v2577_v18 = vpop.f32.mrf.mxu1 }
 0x3bb   : > { %5733 = vst [vmem:[#allocation22_spill] sm:$0xff] %v5288_v48  ;;  %v5297_v61 = vmul.f32 %v5288_v48, %v5288_v48  ;;  %v2599_v38 = vmul.f32 0.15915494, %v5273_v57  ;;  %v2601_v31 = vmul.f32 0.15915494, %v5276_v4  ;;  %v5303_v30 = vmul.f32 %v5281_v40, %v5281_v40 }
 0x3bc   : > { %v3082_v24 = vadd.f32 0.9999997, %v3050_v36  ;;  %v3084_v50 = vadd.f32 0.9999997, %v3052_v44  ;;  %v2790_v12 = vmul.f32 -2.0532243e-08, %v5293_v0  ;;  %v5308_v22 = vmul.f32 %v5286_v1, %v5286_v1 }
 0x3bd   : > { %v5311_v19 = vsub.f32 %v5235_v29, %v2687_v63  ;;  %v5314_v11 = vsub.f32 %v5240_v13, %v2689_v56  ;;  %v2792_v51 = vmul.f32 -2.0532243e-08, %v5297_v61  ;;  %v3058_v23 = vmul.f32 %v3026_v47, %v5218_v26 }
 0x3be   : > { %v2942_v53 = vadd.f32 0.008332557, %v2910_v21  ;;  %v2912_v49 = vmul.f32 %v2880_v3, %v5252_v10  ;;  %v2487_v27 = vadd.f32 %v2486_v33, %v5058_v59  ;;  %v3060_v52 = vmul.f32 %v3028_v7, %v5222_v43  ;;  %v2581_v7 = vpop.f32.mrf.mxu1 }
 0x3bf   : > { %5734 = vst [vmem:[#allocation12_spill] sm:$0xff] %v5311_v19  ;;  %5735 = vst [vmem:[#allocation13_spill] sm:$0xff] %v5314_v11  ;;  %v2631_v35 = vadd.f32 0.5, %v2599_v38  ;;  %v2633_v45 = vadd.f32 0.5, %v2601_v31  ;;  %v2576_v29 = vadd.f32 %v2575_v42, %v5058_v59  ;;  %v5323_v13 = vmul.f32 %v3082_v24, %v5129_v46  ;;  %v2492_v42 = vpop.f32.mrf.mxu0 }
 0x3c0   : > { %v2822_v36 = vadd.f32 2.704004e-06, %v2790_v12  ;;  %v2824_v44 = vadd.f32 2.704004e-06, %v2792_v51  ;;  %v2606_v63 = vmul.f32 0.15915494, %v2487_v27  ;;  %v5326_v26 = vmul.f32 %v3084_v50, %v5134_v37 }
 0x3c1   : > { %v5330_v56 = vmul.f32 %v5311_v19, %v5311_v19  ;;  %v5334_v43 = vmul.f32 %v5314_v11, %v5314_v11  ;;  %v2608_v47 = vmul.f32 0.15915494, %v2576_v29  ;;  %v3090_v21 = vadd.f32 0.9999997, %v3058_v23 }
 0x3c2   : > { %v2974_v3 = vmul.f32 %v2942_v53, %v5245_v41  ;;  %v2944_v46 = vadd.f32 0.008332557, %v2912_v49  ;;  %v2638_v33 = vadd.f32 0.5, %v2606_v63  ;;  %v3092_v38 = vadd.f32 0.9999997, %v3060_v52 }
 0x3c3   : > { %v2663_v31 = vfloor.f32 %v2631_v35  ;;  %v2665_v37 = vfloor.f32 %v2633_v45  ;;  %v2640_v24 = vadd.f32 0.5, %v2608_v47  ;;  %v2854_v50 = vmul.f32 %v2822_v36, %v5293_v0 }
 0x3c4   : > { %v2856_v12 = vmul.f32 %v2824_v44, %v5297_v61  ;;  %v2670_v51 = vfloor.f32 %v2638_v33  ;;  %v5340_v11 = vadd.f32 %v2488_v58, %v5058_v59  ;;  %v5343_v23 = vadd.f32 %v2577_v18, %v5058_v59 }
 0x3c5   : > { %v2672_v19 = vfloor.f32 %v2640_v24  ;;  %v2493_v53 = vadd.f32 %v2492_v42, %v5060_v5  ;;  %v2582_v49 = vadd.f32 %v2581_v7, %v5060_v5  ;;  %v5347_v52 = vadd.f32 -0.16666576, %v2974_v3 }
 0x3c6   : > { %v2976_v35 = vmul.f32 %v2944_v46, %v5252_v10  ;;  %v2702_v45 = vmul.f32 6.2831855, %v2670_v51  ;;  %v2607_v36 = vmul.f32 0.15915494, %v5340_v11  ;;  %v5352_v44 = vmul.f32 %v3090_v21, %v5203_v54 }
 0x3c7   : > { %5736 = vst [vmem:[#allocation23_spill] sm:$0xff] %v5347_v52  ;;  %v2695_v58 = vmul.f32 6.2831855, %v2663_v31  ;;  %v2697_v63 = vmul.f32 6.2831855, %v2665_v37  ;;  %v5360_v51 = vmul.f32 %v3092_v38, %v5209_v15  ;;  %v2494_v15 = vpop.f32.mrf.mxu0  ;;  %v2583_v38 = vpop.f32.mrf.mxu1 }
 0x3c8   : > { %v2704_v47 = vmul.f32 6.2831855, %v2672_v19  ;;  %v2886_v33 = vadd.f32 -0.00019812536, %v2854_v50  ;;  %v2888_v59 = vadd.f32 -0.00019812536, %v2856_v12  ;;  %v5354_v18 = vsub.f32 %v2487_v27, %v2702_v45 }
 0x3c9   : > { %v2614_v42 = vmul.f32 0.15915494, %v2493_v53  ;;  %v2639_v3 = vadd.f32 0.5, %v2607_v36  ;;  %v2609_v7 = vmul.f32 0.15915494, %v5343_v23  ;;  %v5369_v27 = vsub.f32 %v5273_v57, %v2695_v58 }
 0x3ca   : > { %5737 = vst [vmem:[#allocation14_spill] sm:$0xff] %v5354_v18  ;;  %v5356_v24 = vsub.f32 %v2576_v29, %v2704_v47  ;;  %v2616_v46 = vmul.f32 0.15915494, %v2582_v49  ;;  %v5362_v48 = vadd.f32 -0.16666576, %v2976_v35  ;;  %v5366_v54 = vmul.f32 %v5354_v18, %v5354_v18 }
 0x3cb   : > { %v2646_v19 = vadd.f32 0.5, %v2614_v42  ;;  %5740 = vst [vmem:[#allocation17_spill] sm:$0xff] %v5369_v27  ;;  %v5372_v29 = vsub.f32 %v5276_v4, %v2697_v63  ;;  %v2918_v37 = vmul.f32 %v2886_v33, %v5293_v0  ;;  %v2920_v50 = vmul.f32 %v2888_v59, %v5297_v61 }
 0x3cc   : > { %5738 = vst [vmem:[#allocation16_spill] sm:$0xff] %v5356_v24  ;;  %5739 = vst [vmem:[#allocation9_spill] sm:$0xff] %v5362_v48  ;;  %v5376_v21 = vmul.f32 %v5356_v24, %v5356_v24  ;;  %v2648_v31 = vadd.f32 0.5, %v2616_v46  ;;  %v2798_v12 = vmul.f32 -2.0532243e-08, %v5366_v54  ;;  %v2671_v45 = vfloor.f32 %v2639_v3 }
 0x3cd   : > { %5741 = vst [vmem:[#allocation10_spill] sm:$0xff] %v5372_v29  ;;  %v2678_v35 = vfloor.f32 %v2646_v19  ;;  %v2641_v36 = vadd.f32 0.5, %v2609_v7  ;;  %v2495_v47 = vadd.f32 %v2494_v15, %v5060_v5  ;;  %v5384_v42 = vadd.f32 %v2583_v38, %v5060_v5 }
 0x3ce   : > { %v2800_v57 = vmul.f32 -2.0532243e-08, %v5376_v21  ;;  %v2680_v4 = vfloor.f32 %v2648_v31  ;;  %v2830_v58 = vadd.f32 2.704004e-06, %v2798_v12  ;;  %v5388_v33 = vmul.f32 %v5369_v27, %v5369_v27 }
 0x3cf   : > { %v2710_v63 = vmul.f32 6.2831855, %v2678_v35  ;;  %v5392_v59 = vmul.f32 %v5372_v29, %v5372_v29  ;;  %v2950_v3 = vadd.f32 0.008332557, %v2918_v37  ;;  %v2952_v7 = vadd.f32 0.008332557, %v2920_v50 }
 0x3d0   : > { %v2832_v46 = vadd.f32 2.704004e-06, %v2800_v57  ;;  %v2712_v19 = vmul.f32 6.2831855, %v2680_v4  ;;  %v2862_v31 = vmul.f32 %v2830_v58, %v5366_v54  ;;  %v2703_v5 = vmul.f32 6.2831855, %v2671_v45 }
 0x3d1   : > { %v5395_v12 = vsub.f32 %v2493_v53, %v2710_v63  ;;  %v2673_v38 = vfloor.f32 %v2641_v36  ;;  %v2615_v29 = vmul.f32 0.15915494, %v2495_v47  ;;  %v2617_v57 = vmul.f32 0.15915494, %v5384_v42 }
 0x3d2   : > { %v2864_v15 = vmul.f32 %v2832_v46, %v5376_v21  ;;  %v5398_v35 = vsub.f32 %v2582_v49, %v2712_v19  ;;  %v2894_v20 = vadd.f32 -0.00019812536, %v2862_v31  ;;  %v2803_v53 = vmul.f32 -2.0532243e-08, %v5303_v30 }
 0x3d3   : > { %v5402_v27 = vmul.f32 %v5395_v12, %v5395_v12  ;;  %v2805_v45 = vmul.f32 -2.0532243e-08, %v5308_v22  ;;  %v2647_v4 = vadd.f32 0.5, %v2615_v29  ;;  %v2649_v58 = vadd.f32 0.5, %v2617_v57 }
 0x3d4   : > { %5742 = vst [vmem:[#allocation24_spill] sm:$0xff] %v5398_v35  ;;  %v2896_v37 = vadd.f32 -0.00019812536, %v2864_v15  ;;  %v5407_v50 = vmul.f32 %v5398_v35, %v5398_v35  ;;  %v2926_v49 = vmul.f32 %v2894_v20, %v5366_v54  ;;  %v2835_v19 = vadd.f32 2.704004e-06, %v2803_v53 }
 0x3d5   : > { %v2806_v36 = vmul.f32 -2.0532243e-08, %v5402_v27  ;;  %v2837_v31 = vadd.f32 2.704004e-06, %v2805_v45  ;;  %v2705_v48 = vmul.f32 6.2831855, %v2673_v38  ;;  %v2679_v52 = vfloor.f32 %v2647_v4 }
 0x3d6   : > { %v2928_v63 = vmul.f32 %v2896_v37, %v5376_v21  ;;  %v2808_v46 = vmul.f32 -2.0532243e-08, %v5407_v50  ;;  %v2958_v15 = vadd.f32 0.008332557, %v2926_v49  ;;  %v2681_v24 = vfloor.f32 %v2649_v58 }
 0x3d7   : > { %v2838_v10 = vadd.f32 2.704004e-06, %v2806_v36  ;;  %v2867_v18 = vmul.f32 %v2835_v19, %v5303_v30  ;;  %v2869_v20 = vmul.f32 %v2837_v31, %v5308_v22  ;;  %v2982_v35 = vmul.f32 %v2950_v3, %v5293_v0 }
 0x3d8   : > { %v2840_v41 = vadd.f32 2.704004e-06, %v2808_v46  ;;  %v2960_v29 = vadd.f32 0.008332557, %v2928_v63  ;;  %v5419_v57 = vsub.f32 %v5340_v11, %v2703_v5  ;;  %v2711_v45 = vmul.f32 6.2831855, %v2679_v52 }
 0x3d9   : > { %v2870_v37 = vmul.f32 %v2838_v10, %v5402_v27  ;;  %v2899_v38 = vadd.f32 -0.00019812536, %v2867_v18  ;;  %v2901_v49 = vadd.f32 -0.00019812536, %v2869_v20  ;;  %v5424_v36 = vmul.f32 %v2952_v7, %v5297_v61 }
 0x3da   : > { %v2872_v53 = vmul.f32 %v2840_v41, %v5407_v50  ;;  %v2990_v4 = vmul.f32 %v2958_v15, %v5366_v54  ;;  %v5428_v58 = vsub.f32 %v5343_v23, %v2705_v48  ;;  %v2713_v46 = vmul.f32 6.2831855, %v2681_v24 }
 0x3db   : > { %v2902_v3 = vadd.f32 -0.00019812536, %v2870_v37  ;;  %v2931_v11 = vmul.f32 %v2899_v38, %v5303_v30  ;;  %v2933_v10 = vmul.f32 %v2901_v49, %v5308_v22  ;;  %v5432_v5 = vadd.f32 -0.16666576, %v2982_v35 }
 0x3dc   : > { %v2904_v63 = vadd.f32 -0.00019812536, %v2872_v53  ;;  %v2992_v41 = vmul.f32 %v2960_v29, %v5376_v21  ;;  %v5437_v52 = vmul.f32 %v5419_v57, %v5419_v57  ;;  %v5441_v23 = vsub.f32 %v2495_v47, %v2711_v45 }
 0x3dd   : > { %v2934_v18 = vmul.f32 %v2902_v3, %v5402_v27  ;;  %v2963_v7 = vadd.f32 0.008332557, %v2931_v11  ;;  %v2965_v24 = vadd.f32 0.008332557, %v2933_v10  ;;  %v3022_v19 = vadd.f32 -0.16666576, %v2990_v4 }
 0x3de   : > { %v2936_v48 = vmul.f32 %v2904_v63, %v5407_v50  ;;  %v5445_v31 = vmul.f32 %v5428_v58, %v5428_v58  ;;  %v2795_v15 = vmul.f32 -2.0532243e-08, %v5207_v6  ;;  %v5449_v29 = vsub.f32 %v5384_v42, %v2713_v46 }
 0x3df   : > { %v2966_v35 = vadd.f32 0.008332557, %v2934_v18  ;;  %v2995_v37 = vmul.f32 %v2963_v7, %v5303_v30  ;;  %v2997_v53 = vmul.f32 %v2965_v24, %v5308_v22  ;;  %v5453_v47 = vadd.f32 -0.16666576, %v2992_v41 }
 0x3e0   : > { %v2968_v20 = vadd.f32 0.008332557, %v2936_v48  ;;  %v2827_v38 = vadd.f32 2.704004e-06, %v2795_v15  ;;  %v2797_v49 = vmul.f32 -2.0532243e-08, %v5229_v17  ;;  %v5460_v3 = vmul.f32 %v5441_v23, %v5441_v23 }
 0x3e1   : > { %v2998_v45 = vmul.f32 %v2966_v35, %v5402_v27  ;;  %v3027_v63 = vadd.f32 -0.16666576, %v2995_v37  ;;  %v3029_v42 = vadd.f32 -0.16666576, %v2997_v53  ;;  %v2787_v41 = vmul.f32 -2.0532243e-08, %v5177_v60 }
 0x3e2   : > { %v3000_v4 = vmul.f32 %v2968_v20, %v5407_v50  ;;  %v2859_v11 = vmul.f32 %v2827_v38, %v5207_v6  ;;  %v2829_v10 = vadd.f32 2.704004e-06, %v2797_v49  ;;  %v2789_v24 = vmul.f32 -2.0532243e-08, %v5181_v28 }
 0x3e3   : > { %v3030_v46 = vadd.f32 -0.16666576, %v2998_v45  ;;  %v3059_v48 = vmul.f32 %v3027_v63, %v5303_v30  ;;  %v3061_v7 = vmul.f32 %v3029_v42, %v5308_v22  ;;  %v2819_v37 = vadd.f32 2.704004e-06, %v2787_v41 }
 0x3e4   : > { %v3032_v18 = vadd.f32 -0.16666576, %v3000_v4  ;;  %v2891_v15 = vadd.f32 -0.00019812536, %v2859_v11  ;;  %v2861_v20 = vmul.f32 %v2829_v10, %v5229_v17  ;;  %v2821_v49 = vadd.f32 2.704004e-06, %v2789_v24 }
 0x3e5   : > { %v3062_v35 = vmul.f32 %v3030_v46, %v5402_v27  ;;  %v3091_v45 = vadd.f32 0.9999997, %v3059_v48  ;;  %v3093_v38 = vadd.f32 0.9999997, %v3061_v7  ;;  %v5472_v4 = vmul.f32 %v5449_v29, %v5449_v29 }
 0x3e6   : > { %v3064_v53 = vmul.f32 %v3032_v18, %v5407_v50  ;;  %v2923_v30 = vmul.f32 %v2891_v15, %v5207_v6  ;;  %v2893_v22 = vadd.f32 -0.00019812536, %v2861_v20  ;;  %v2851_v63 = vmul.f32 %v2819_v37, %v5177_v60 }
 0x3e7   : > { %v5476_v42 = vadd.f32 0.9999997, %v3062_v35  ;;  %v3123_v27 = vmul.f32 %v3091_v45, %v5281_v40  ;;  %v3125_v46 = vmul.f32 %v3093_v38, %v5286_v1  ;;  %v2853_v50 = vmul.f32 %v2821_v49, %v5181_v28 }
 0x3e8   : > { %v5481_v11 = vadd.f32 0.9999997, %v3064_v53  ;;  %v2955_v10 = vadd.f32 0.008332557, %v2923_v30  ;;  %v2925_v41 = vmul.f32 %v2893_v22, %v5229_v17  ;;  %v2883_v18 = vadd.f32 -0.00019812536, %v2851_v63 }
 0x3e9   : > { %v5485_v48 = vmul.f32 %v3022_v19, %v5366_v54  ;;  %3164 = vmatprep.subr.mxu0 %v3123_v27  ;;  %3235 = vmatprep.subr.mxu1 %v3125_v46  ;;  %v2885_v7 = vadd.f32 -0.00019812536, %v2853_v50  ;;  %v2779_v24 = vmul.f32 -2.0532243e-08, %v5167_v9  ;;  %v2781_v40 = vmul.f32 -2.0532243e-08, %v5172_v8 }
 0x3ea   : > { %3165 = vmatpush1.msra.mxu0 %v5352_v44  ;;  %3236 = vmatpush1.msra.mxu1 %v5360_v51  ;;  %v2987_v1 = vmul.f32 %v2955_v10, %v5207_v6  ;;  %v2957_v35 = vadd.f32 0.008332557, %v2925_v41  ;;  %v2915_v15 = vmul.f32 %v2883_v18, %v5177_v60  ;;  %v2807_v20 = vmul.f32 -2.0532243e-08, %v5460_v3 }
 0x3eb   : > { %v2917_v54 = vmul.f32 %v2885_v7, %v5181_v28  ;;  %v2811_v19 = vadd.f32 2.704004e-06, %v2779_v24  ;;  %v2813_v37 = vadd.f32 2.704004e-06, %v2781_v40  ;;  %v2809_v53 = vmul.f32 -2.0532243e-08, %v5472_v4 }
 0x3ec   : > { %v3019_v45 = vadd.f32 -0.16666576, %v2987_v1  ;;  %v2989_v38 = vmul.f32 %v2957_v35, %v5229_v17  ;;  %v2947_v49 = vadd.f32 0.008332557, %v2915_v15  ;;  %v2839_v44 = vadd.f32 2.704004e-06, %v2807_v20 }
 0x3ed   : > { %v2949_v30 = vadd.f32 0.008332557, %v2917_v54  ;;  %v2843_v51 = vmul.f32 %v2811_v19, %v5167_v9  ;;  %v2845_v22 = vmul.f32 %v2813_v37, %v5172_v8  ;;  %v2841_v63 = vadd.f32 2.704004e-06, %v2809_v53 }
 0x3ee   : > { %v3051_v27 = vmul.f32 %v3019_v45, %v5207_v6  ;;  %v3021_v46 = vadd.f32 -0.16666576, %v2989_v38  ;;  %v2979_v50 = vmul.f32 %v2947_v49, %v5177_v60  ;;  %v2871_v10 = vmul.f32 %v2839_v44, %v5460_v3 }
 0x3ef   : > { %v2981_v41 = vmul.f32 %v2949_v30, %v5181_v28  ;;  %v2875_v18 = vadd.f32 -0.00019812536, %v2843_v51  ;;  %v2877_v7 = vadd.f32 -0.00019812536, %v2845_v22  ;;  %v2873_v24 = vmul.f32 %v2841_v63, %v5472_v4 }
 0x3f0   : > { %v3083_v40 = vadd.f32 0.9999997, %v3051_v27  ;;  %v3053_v1 = vmul.f32 %v3021_v46, %v5229_v17  ;;  %v3011_v35 = vadd.f32 -0.16666576, %v2979_v50  ;;  %v2903_v15 = vadd.f32 -0.00019812536, %v2871_v10 }
 0x3f1   : > { %v3013_v20 = vadd.f32 -0.16666576, %v2981_v41  ;;  %v2907_v54 = vmul.f32 %v2875_v18, %v5167_v9  ;;  %v2909_v6 = vmul.f32 %v2877_v7, %v5172_v8  ;;  %v2905_v19 = vadd.f32 -0.00019812536, %v2873_v24 }
 0x3f2   : > { %v3115_v37 = vmul.f32 %v3083_v40, %v5185_v32  ;;  %v3085_v53 = vadd.f32 0.9999997, %v3053_v1  ;;  %v3043_v45 = vmul.f32 %v3011_v35, %v5177_v60  ;;  %v2935_v38 = vmul.f32 %v2903_v15, %v5460_v3 }
 0x3f3   : > { %v3045_v49 = vmul.f32 %v3013_v20, %v5181_v28  ;;  %v2939_v44 = vadd.f32 0.008332557, %v2907_v54  ;;  %v2941_v30 = vadd.f32 0.008332557, %v2909_v6  ;;  %v2937_v17 = vmul.f32 %v2905_v19, %v5472_v4 }
 0x3f4   : > { %3166 = vmatprep.subr.mxu0 %v3115_v37  ;;  %v3117_v51 = vmul.f32 %v3085_v53, %v5193_v62  ;;  %v3075_v22 = vadd.f32 0.9999997, %v3043_v45  ;;  %v2967_v63 = vadd.f32 0.008332557, %v2935_v38  ;;  %v2799_v27 = vmul.f32 -2.0532243e-08, %v5437_v52 }
 0x3f5   : > { %3167 = vmatpush1.msra.mxu0 %v5323_v13  ;;  %v3077_v32 = vadd.f32 0.9999997, %v3045_v49  ;;  %v2971_v60 = vmul.f32 %v2939_v44, %v5167_v9  ;;  %v2973_v46 = vmul.f32 %v2941_v30, %v5172_v8  ;;  %v2969_v50 = vadd.f32 0.008332557, %v2937_v17 }
 0x3f6   : > { %3237 = vmatprep.subr.mxu1 %v3117_v51  ;;  %v3107_v28 = vmul.f32 %v3075_v22, %v5156_v14  ;;  %v2999_v10 = vmul.f32 %v2967_v63, %v5460_v3  ;;  %v2831_v41 = vadd.f32 2.704004e-06, %v2799_v27  ;;  %v2801_v62 = vmul.f32 -2.0532243e-08, %v5445_v31  ;;  %v5541_v51 = vld [vmem:[%s5653_s6] sm:$0xff] }
 0x3f7   : > { %3238 = vmatpush1.msra.mxu1 %v5326_v26  ;;  %v3109_v18 = vmul.f32 %v3077_v32, %v5160_v25  ;;  %v3003_v7 = vadd.f32 -0.16666576, %v2971_v60  ;;  %v3005_v13 = vadd.f32 -0.16666576, %v2973_v46  ;;  %v3001_v24 = vmul.f32 %v2969_v50, %v5472_v4  ;;  %v5743_v50 = vld [vmem:[#allocation15_spill] sm:$0xff] }
 0x3f8   : > { %3168 = vmatprep.subr.mxu0 %v3107_v28  ;;  %v3031_v40 = vadd.f32 -0.16666576, %v2999_v10  ;;  %v2863_v1 = vmul.f32 %v2831_v41, %v5437_v52  ;;  %v2833_v35 = vadd.f32 2.704004e-06, %v2801_v62  ;;  %v2791_v14 = vmul.f32 -2.0532243e-08, %v5388_v33 }
 0x3f9   : > { %3239 = vmatprep.subr.mxu1 %v3109_v18  ;;  %3169 = vmatpush1.msra.mxu0 %v5264_v55  ;;  %v3035_v15 = vmul.f32 %v3003_v7, %v5167_v9  ;;  %v3037_v26 = vmul.f32 %v3005_v13, %v5172_v8  ;;  %v3033_v20 = vadd.f32 -0.16666576, %v3001_v24  ;;  %v2793_v25 = vmul.f32 -2.0532243e-08, %v5392_v59  ;;  %v5744_v41 = vld [vmem:[#allocation24_spill] sm:$0xff] }
 0x3fa   : > { %3240 = vmatpush1.msra.mxu1 %v5267_v16  ;;  %v3063_v54 = vmul.f32 %v3031_v40, %v5460_v3  ;;  %v2895_v6 = vadd.f32 -0.00019812536, %v2863_v1  ;;  %v2865_v19 = vmul.f32 %v2833_v35, %v5445_v31  ;;  %v2823_v37 = vadd.f32 2.704004e-06, %v2791_v14 }
 0x3fb   : > { %v3067_v53 = vadd.f32 0.9999997, %v3035_v15  ;;  %v3069_v45 = vadd.f32 0.9999997, %v3037_v26  ;;  %v3065_v38 = vmul.f32 %v3033_v20, %v5472_v4  ;;  %v2825_v55 = vadd.f32 2.704004e-06, %v2793_v25 }
 0x3fc   : > { %v3095_v49 = vadd.f32 0.9999997, %v3063_v54  ;;  %v2927_v9 = vmul.f32 %v2895_v6, %v5437_v52  ;;  %v2897_v8 = vadd.f32 -0.00019812536, %v2865_v19  ;;  %v2855_v44 = vmul.f32 %v2823_v37, %v5388_v33 }
 0x3fd   : > { %v3099_v30 = vmul.f32 %v3067_v53, %v5149_v34  ;;  %v3101_v16 = vmul.f32 %v3069_v45, %v5153_v2  ;;  %v3097_v3 = vadd.f32 0.9999997, %v3065_v38  ;;  %v2857_v17 = vmul.f32 %v2825_v55, %v5392_v59 }
 0x3fe   : > { %v3127_v4 = vmul.f32 %v3095_v49, %v5441_v23  ;;  %v2959_v22 = vadd.f32 0.008332557, %v2927_v9  ;;  %v2929_v63 = vmul.f32 %v2897_v8, %v5445_v31  ;;  %v2887_v27 = vadd.f32 -0.00019812536, %v2855_v44  ;;  %v5746_v49 = vld [vmem:[#allocation14_spill] sm:$0xff] }
 0x3ff   : > { %3170 = vmatprep.subr.mxu0 %v3099_v30  ;;  %3241 = vmatprep.subr.mxu1 %v3101_v16  ;;  %v3129_v34 = vmul.f32 %v3097_v3, %v5449_v29  ;;  %v2889_v32 = vadd.f32 -0.00019812536, %v2857_v17  ;;  %v2783_v2 = vmul.f32 -2.0532243e-08, %v5330_v56  ;;  %v2785_v60 = vmul.f32 -2.0532243e-08, %v5334_v43 }
 0x400   : > { %v3126_v46 = vmul.f32 %v5476_v42, %v5395_v12  ;;  %3171 = vmatpush1.msra.mxu0 %v5200_v39  ;;  %3242 = vmatpush1.msra.mxu1 %v5743_v50  ;;  %v2991_v23 = vmul.f32 %v2959_v22, %v5437_v52  ;;  %v2961_v28 = vadd.f32 0.008332557, %v2929_v63  ;;  %v2919_v10 = vmul.f32 %v2887_v27, %v5388_v33  ;;  %v5747_v3 = vld [vmem:[#allocation16_spill] sm:$0xff]  ;;  %v5749_v63 = vld [vmem:[#allocation23_spill] sm:$0xff]  ;;  %v5754_v50 = vld [vmem:[#allocation10_spill] sm:$0xff] }
 0x401   : > { %v3128_v29 = vmul.f32 %v5481_v11, %v5744_v41  ;;  %3574 = vmatmul.mubr.msk.f32.vlgmr.msra.gmra.mxu0 %vm1277_vm1, %v5541_v51  ;;  %3575 = vmatmul.mubr.msk.f32.vlgmr.msra.gmra.mxu1 %vm1277_vm1, %v5541_v51  ;;  %v2921_v12 = vmul.f32 %v2889_v32, %v5392_v59  ;;  %v2815_v42 = vadd.f32 2.704004e-06, %v2783_v2  ;;  %v2817_v39 = vadd.f32 2.704004e-06, %v2785_v60  ;;  %v5752_v2 = vld [vmem:[#allocation17_spill] sm:$0xff]  ;;  %v5755_v41 = vld [vmem:[#allocation22_spill] sm:$0xff] }
 0x402   : > { %v3016_v62 = vadd.f32 -0.16666576, %v5424_v36  ;;  %3306 = vmatprep.subr.mxu0 %v3127_v4  ;;  %3377 = vmatprep.subr.mxu1 %v3129_v34  ;;  %v3023_v18 = vadd.f32 -0.16666576, %v2991_v23  ;;  %v2993_v7 = vmul.f32 %v2961_v28, %v5445_v31  ;;  %v2951_v13 = vadd.f32 0.008332557, %v2919_v10 }
 0x403   : > { %v3056_v11 = vmul.f32 %v5453_v47, %v5376_v21  ;;  %3307 = vmatpush1.msra.mxu0 %v3126_v46  ;;  %3378 = vmatpush1.msra.mxu1 %v3128_v29  ;;  %v2953_v24 = vadd.f32 0.008332557, %v2921_v12  ;;  %v2847_v40 = vmul.f32 %v2815_v42, %v5330_v56  ;;  %v2849_v1 = vmul.f32 %v2817_v39, %v5334_v43  ;;  %v5750_v34 = vld [vmem:[#allocation11_spill] sm:$0xff]  ;;  %v5753_v46 = vld [vmem:[#allocation21_spill] sm:$0xff] }
 0x404   : > { %v3046_v35 = vmul.f32 %v5432_v5, %v5293_v0  ;;  %v3055_v36 = vmul.f32 %v3023_v18, %v5437_v52  ;;  %v3025_v14 = vadd.f32 -0.16666576, %v2993_v7  ;;  %v2983_v15 = vmul.f32 %v2951_v13, %v5388_v33  ;;  %v5756_v13 = vld [vmem:[#allocation12_spill] sm:$0xff] }
 0x405   : > { %v5745_v26 = vmov 0.0   ;;  %v3086_v21 = vadd.f32 0.9999997, %v5485_v48  ;;  %v2985_v47 = vmul.f32 %v2953_v24, %v5392_v59  ;;  %v2879_v20 = vadd.f32 -0.00019812536, %v2847_v40  ;;  %v5757_v24 = vld [vmem:[#allocation13_spill] sm:$0xff] }
 0x406   : > { %3346 = vmatprep.mubr.f32.mxu0 %v5745_v26  ;;  %3417 = vmatprep.mubr.f32.mxu1 %v5745_v26  ;;  %v2881_v25 = vadd.f32 -0.00019812536, %v2849_v1  ;;  %v3048_v54 = vmul.f32 %v3016_v62, %v5297_v61  ;;  %v3087_v6 = vadd.f32 0.9999997, %v3055_v36  ;;  %v3057_v0 = vmul.f32 %v3025_v14, %v5445_v31  ;;  %v5758_v1 = vld [vmem:[#allocation19_spill] sm:$0xff]  ;;  %v5759_v36 = vld [vmem:[#allocation18_spill] sm:$0xff] }
 0x407   : > { %v3015_v5 = vadd.f32 -0.16666576, %v2983_v15  ;;  %v3088_v52 = vadd.f32 0.9999997, %v3056_v11  ;;  %v3017_v19 = vadd.f32 -0.16666576, %v2985_v47  ;;  %v2911_v37 = vmul.f32 %v2879_v20, %v5330_v56 }
 0x408   : > { %v2913_v53 = vmul.f32 %v2881_v25, %v5334_v43  ;;  %v3078_v45 = vadd.f32 0.9999997, %v3046_v35  ;;  %v3119_v38 = vmul.f32 %v3087_v6, %v5419_v57  ;;  %v3089_v48 = vadd.f32 0.9999997, %v3057_v0 }
 0x409   : > { %v3047_v55 = vmul.f32 %v3015_v5, %v5388_v33  ;;  %v3118_v9 = vmul.f32 %v3086_v21, %v5746_v49  ;;  %v3049_v61 = vmul.f32 %v3017_v19, %v5392_v59  ;;  %v2943_v8 = vadd.f32 0.008332557, %v2911_v37  ;;  %v5748_v33 = vld [vmem:[#allocation20_spill] sm:$0xff]  ;;  %v5751_v59 = vld [vmem:[#allocation9_spill] sm:$0xff] }
 0x40a   : > { %v2945_v44 = vadd.f32 0.008332557, %v2913_v53  ;;  %v3080_v31 = vadd.f32 0.9999997, %v3048_v54  ;;  %3308 = vmatprep.subr.mxu0 %v3119_v38  ;;  %v3121_v30 = vmul.f32 %v3089_v48, %v5428_v58  ;;  %v3120_v17 = vmul.f32 %v3088_v52, %v5747_v3 }
 0x40b   : > { %v3079_v16 = vadd.f32 0.9999997, %v3047_v55  ;;  %3309 = vmatpush1.msra.mxu0 %v3118_v9  ;;  %v3081_v4 = vadd.f32 0.9999997, %v3049_v61  ;;  %v2975_v57 = vmul.f32 %v2943_v8, %v5330_v56  ;;  %v3038_v27 = vmul.f32 %v5749_v63, %v5748_v33 }
 0x40c   : > { %v2977_v22 = vmul.f32 %v2945_v44, %v5334_v43  ;;  %v3040_v32 = vmul.f32 %v5751_v59, %v5750_v34  ;;  %3379 = vmatprep.subr.mxu1 %v3121_v30  ;;  %v3110_v58 = vmul.f32 %v3078_v45, %v5753_v46  ;;  %v3112_v29 = vmul.f32 %v3080_v31, %v5755_v41 }
 0x40d   : > { %v3111_v60 = vmul.f32 %v3079_v16, %v5752_v2  ;;  %3380 = vmatpush1.msra.mxu1 %v3120_v17  ;;  %v3113_v23 = vmul.f32 %v3081_v4, %v5754_v50  ;;  %v3007_v28 = vadd.f32 -0.16666576, %v2975_v57  ;;  %v3070_v39 = vadd.f32 0.9999997, %v3038_v27 }
 0x40e   : > { %v3009_v10 = vadd.f32 -0.16666576, %v2977_v22  ;;  %v3072_v62 = vadd.f32 0.9999997, %v3040_v32 }
 0x40f   : > { %3310 = vmatprep.subr.mxu0 %v3111_v60  ;;  %3381 = vmatprep.subr.mxu1 %v3113_v23  ;;  %v3039_v12 = vmul.f32 %v3007_v28, %v5330_v56  ;;  %v3102_v35 = vmul.f32 %v3070_v39, %v5758_v1  ;;  %v3135_v56 = vpop.permute.xlu0 %3134 }
 0x410   : > { %3311 = vmatpush1.msra.mxu0 %v3110_v58  ;;  %v3041_v42 = vmul.f32 %v3009_v10, %v5334_v43  ;;  %3382 = vmatpush1.msra.mxu1 %v3112_v29  ;;  %v3104_v14 = vmul.f32 %v3072_v62, %v5759_v36 }
 0x411   : > { %v3071_v18 = vadd.f32 0.9999997, %v3039_v12 }
 0x412   : > { %v3073_v7 = vadd.f32 0.9999997, %v3041_v42 }
 0x413   : > { %v3103_v11 = vmul.f32 %v3071_v18, %v5756_v13 }
 0x414   : > { %v3105_v40 = vmul.f32 %v3073_v7, %v5757_v24 }
 0x415   : > { %3312 = vmatprep.subr.mxu0 %v3103_v11 }
 0x416   : > { %3383 = vmatprep.subr.mxu1 %v3105_v40  ;;  %3313 = vmatpush1.msra.mxu0 %v3102_v35 }
 0x417   : > { %3384 = vmatpush1.msra.mxu1 %v3104_v14  ;;  %3576 = vmatmul.mubr.msk.f32.vlgmr.msra.gmra.mxu0 %vm1277_vm1, %v5541_v51 }
 0x418   : > { %3577 = vmatmul.mubr.msk.f32.vlgmr.msra.gmra.mxu1 %vm1277_vm1, %v5541_v51 }
 0x4c1   : > { %v3206_v43 = vpop.f32.mrf.mxu0  ;;  %v3277_v15 = vpop.f32.mrf.mxu1 }
 0x4c2   : > { %v3207_v26 = vadd.f32 %v3206_v43, %v3135_v56  ;;  %v3278_v21 = vadd.f32 %v3277_v15, %v3135_v56 }
 0x4c3   : > { %v3208_v47 = vpop.f32.mrf.mxu0  ;;  %v3279_v20 = vpop.f32.mrf.mxu1 }
 0x4c4   : > { %3424 = vst [vmem:[%s321_s25] sm:$0xff] %v3207_v26  ;;  %3426 = vst [vmem:[%s321_s25 + $0x10] sm:$0xff] %v3278_v21  ;;  %v3209_v25 = vadd.f32 %v3208_v47, %v3135_v56  ;;  %v3280_v54 = vadd.f32 %v3279_v20, %v3135_v56 }
 0x4c6   : > { %3425 = vst [vmem:[%s321_s25 + $0x8] sm:$0xff] %v3209_v25  ;;  %3427 = vst [vmem:[%s321_s25 + $0x18] sm:$0xff] %v3280_v54 }
 0x4d7   : > { %v3348_v6 = vpop.f32.mrf.mxu0 }
 0x4d8   : > { %v3419_v0 = vpop.f32.mrf.mxu1  ;;  %v3349_v51 = vadd.f32 %v3348_v6, %v3135_v56 }
 0x4d9   : > { %v3420_v5 = vadd.f32 %v3419_v0, %v3135_v56  ;;  %v3350_v52 = vpop.f32.mrf.mxu0 }
 0x4da   : > { %v3421_v19 = vpop.f32.mrf.mxu1  ;;  %3428 = vst [vmem:[%s321_s25 + $0x20] sm:$0xff] %v3349_v51  ;;  %v3351_v37 = vadd.f32 %v3350_v52, %v3135_v56 }
 0x4db   : > { %3430 = vst [vmem:[%s321_s25 + $0x30] sm:$0xff] %v3420_v5  ;;  %v3422_v53 = vadd.f32 %v3421_v19, %v3135_v56 }
 0x4dc   : > { %3429 = vst [vmem:[%s321_s25 + $0x28] sm:$0xff] %v3351_v37 }
 0x4dd   : > { %3431 = vst [vmem:[%s321_s25 + $0x38] sm:$0xff] %v3422_v53 }
 0x4de   : > { %3676 = shalt.err (!%p3673_p9)
}
 0x4df   : > { %s3677_s22 = scalar_lea.hbm %s5611_s24, 1024  ;;  %s3681_s19 = scalar_lea.hbm %s5655_s8, 8192 }
 0x4e0   : > { %p3678_p1 = scmp.ne.s32.totalorder %s5611_s24, %s3677_s22  ;;  %p3682_p5 = scmp.lt.s32.totalorder %s5611_s24, %s5655_s8 }
 0x4e1   : > { %p3683_p13 = scmp.lt.s32.totalorder %s3681_s19, %s3677_s22 }
 0x4e2   : > { %p3679_p3 = pnand %p3678_p1, %p5760_p11 }
 0x4e3   : > { %p3684_p6 = por %p3683_p13, %p3682_p5 }
 0x4e4   : > { %p3680_p4 = pneg %p3679_p3 }
 0x4e6   : > { %p3685_p10 = pnand %p3684_p6, %p3680_p4 }
 0x4e8   : > { %3688 = shalt.err (!%p3685_p10)
}
 0x4e9   : > { %3587 = dma.vmem_to_hbm [thread:$0]  (%p5760_p11), %s3448_s21, 1024, %s5611_s24, %s3433_s26  }
 0x4ea PF: > { %p3598_p12 = scmp.ge.s32.totalorder %s3727_s30, 2  ;;  %s3459_s14 = sand.u32 1, %s3715_s27  }
 0x4eb   : > { %p5761_p0 = scmp.ne.s32.totalorder %s5691_s18, 0  ;;  %s3460_s10 = scalar_lea.sflag [#allocation4], %s3459_s14 }
 0x4ed   : > { %p3594_p2 = pnand %p3598_p12, %p5761_p0 }
 0x4ef   : > { %p3595_p7 = pneg %p3594_p2 }
 0x4f1   : > { %3710 = dma.done.wait (%p3595_p7), %s3460_s10, 1024  }
 0x4f2   : > { %3712 = vsyncadd (%p3595_p7), %s3460_s10, 4294966272  ;;  %s5762_s9 = sld [smem:[#allocation8_spill]]  ;;  %p21_p8 = scmp.ge.s32.totalorder %s3803_s11, 10  }
 0x4f3   : > { %s5763_s27 = smov %s3719_s28  ;;  %s5764_s28 = smov %s3723_s29 }
 0x4f4   : > { %s5766_s30 = smov %s3803_s11  ;;  %23 = sbr.rel (!%p21_p8) target bundleno = 5 (0x5), region = 97 }
 0x4f8   : > { %s5765_s29 = smov %s5762_s9 }
 0x4f9   :  { %3465 = vsyncpa [#allocation3], 1 }
 0x4fa   :  { %3467 = vsyncpa [#allocation3 + $0x1], 1 }
 0x4fb   :  { %3468 = vsyncpa [#allocation4], 1 }
 0x4fc   :  { %3470 = vsyncpa [#allocation4 + $0x1], 1 }

</bundles_post_ra>
